<compile_context>
chip_gen: v5e
topology: v5e:2x2
jax: 0.10.0
libtpu: 0.0.40
codegen_flags: <defaults>
</compile_context>

<pallas_src>
import functools

import jax
import jax.numpy as jnp
from jax.experimental import pallas as pl
from jax.experimental.pallas import tpu as pltpu

MATMUL_DTYPE = jnp.bfloat16   # MXU / activation dtype (accumulation stays f32).
_LEFT = 16                    # sublane-aligned offset of the data inside the padded
                              # scratch (>= padding, multiple of 16 -> aligned for
                              # both bf16 (16,128) and f32 (8,128) tiling).


def _make_kernel(N, H, W, Cin, Cout, K, P, eps):
    M = N * H * W

    def kernel(x_ref, w_ref, gb_ref, o_ref, *scratch):
        # x_ref : (N, H, W, Cin)   MATMUL_DTYPE, NHWC (channels on lanes)
        # w_ref : (K*K*Cin, Cout)  MATMUL_DTYPE, rows ordered (kh, kw, cin)
        # gb_ref: (2, Cout)        f32, packed [gamma; beta]
        # o_ref : (N, H, W, Cout)  f32
        # scratch[0] (only if P>0): (N, H+2P, _LEFT+W+P, Cin) padded-ReLU buffer
        relu_x = jnp.maximum(x_ref[...], 0.0)

        if P > 0:
            rp_ref = scratch[0]
            # Zero-init once (aligned full stores), then write ReLU(x) at a
            # sublane-tile-aligned offset so the interior store is aligned too.
            rp_ref[...] = jnp.zeros((N, H + 2 * P, _LEFT + W + P, Cin),
                                    rp_ref.dtype)
            rp_ref[:, P:P + H, _LEFT:_LEFT + W, :] = relu_x
            p = rp_ref[...]
            # One shifted window per conv tap, built once and concatenated on the
            # lane axis -> single im2col matrix, single MXU contraction.
            patches = [
                p[:, kh:kh + H, _LEFT - P + kw:_LEFT - P + kw + W, :].reshape(M, Cin)
                for kh in range(K) for kw in range(K)
            ]
            im2col = jnp.concatenate(patches, axis=-1)            # (M, K*K*Cin)
        else:                                                     # 1x1 convolution
            im2col = relu_x.reshape(M, Cin)

        # ---- Convolution as ONE MXU matmul, f32 accumulation. ----
        conv = jnp.dot(im2col, w_ref[...],
                       preferred_element_type=jnp.float32)        # (M, Cout) f32

        # ---- BatchNorm2d, training mode, single-pass batch statistics. ----
        inv_m = 1.0 / M                                           # trace-time constant
        mean = jnp.sum(conv, axis=0, keepdims=True) * inv_m       # (1, Cout)
        ex2 = jnp.sum(conv * conv, axis=0, keepdims=True) * inv_m
        var = ex2 - mean * mean                                   # biased variance
        gamma = gb_ref[0:1, :]
        beta = gb_ref[1:2, :]
        scale = gamma * jax.lax.rsqrt(var + eps)                  # folded BN scale
        shift = beta - mean * scale
        y = conv * scale + shift                                  # one fused FMA

        o_ref[...] = y.reshape(N, H, W, Cout).astype(o_ref.dtype)

    return kernel


def relu_conv_bn(x_nchw, w_oihw, gamma, beta, *, padding, eps=1e-5):
    """ReLU -> Conv2d(KxK, stride=1, `padding`, no bias) -> BatchNorm2d (train mode).

    x_nchw: (N, Cin, H, W); w_oihw: (Cout, Cin, K, K); gamma/beta: (Cout,).
    Returns (N, Cout, H, W), float32.
    """
    # TODO(synk): stride>1 / dilation>1 / use_bn=False configs not implemented
    #             (the NAS-Bench-201 cell ops use stride=1, dilation=1, use_bn=True).
    N, Cin, H, W = x_nchw.shape
    Cout, Cin2, KH, KW = w_oihw.shape
    assert Cin2 == Cin and KH == KW
    K, P = KH, padding
    assert H + 2 * P - K + 1 == H and W + 2 * P - K + 1 == W, "expects a 'same' conv"

    # External interface is NCHW (PyTorch); the kernel runs in NHWC.  Cast to the
    # MXU dtype in the wrapper so all DMAs / scratch run at half the bytes
    # (ReLU commutes with bf16 rounding, so this is numerically equivalent).
    x = jnp.transpose(x_nchw.astype(MATMUL_DTYPE), (0, 2, 3, 1))
    # OIHW -> HWIO -> (K*K*Cin, Cout); rows ordered (kh, kw, cin) to match im2col.
    w_mat = jnp.transpose(w_oihw, (2, 3, 1, 0)).reshape(K * K * Cin, Cout)
    w_mat = w_mat.astype(MATMUL_DTYPE)
    gb = jnp.stack([gamma, beta]).astype(jnp.float32)             # packed (2, Cout)

    scratch_shapes = []
    if P > 0:
        scratch_shapes.append(
            pltpu.VMEM((N, H + 2 * P, _LEFT + W + P, Cin), MATMUL_DTYPE))

    vmem = pl.BlockSpec(memory_space=pltpu.MemorySpace.VMEM)
    y = pl.pallas_call(
        _make_kernel(N, H, W, Cin, Cout, K, P, eps),
        out_shape=jax.ShapeDtypeStruct((N, H, W, Cout), jnp.float32),
        in_specs=[vmem, vmem, vmem],
        out_specs=vmem,
        scratch_shapes=scratch_shapes,
    )(x, w_mat, gb)
    # TODO(synk): for large N*H*W (and v7x's 2 TensorCores / 64 MiB VMEM) add a
    #             spatially tiled "parallel" grid with a two-phase BN (sum/sumsq
    #             accumulation pass + normalize pass) instead of this single
    #             fully-VMEM-resident call; exact BN needs the cross-tile stats.
    return jnp.transpose(y, (0, 3, 1, 2))                         # back to NCHW


def _reference(x_nchw, w_oihw, gamma, beta, *, padding, eps=1e-5):
    """Pure-JAX reference with the same bf16 rounding of the MXU inputs."""
    r = jnp.maximum(x_nchw.astype(jnp.float32), 0.0)
    r = jnp.transpose(r, (0, 2, 3, 1)).astype(MATMUL_DTYPE).astype(jnp.float32)
    w = jnp.transpose(w_oihw, (2, 3, 1, 0)).astype(MATMUL_DTYPE).astype(jnp.float32)
    z = jax.lax.conv_general_dilated(
        r, w, window_strides=(1, 1),
        padding=((padding, padding), (padding, padding)),
        dimension_numbers=("NHWC", "HWIO", "NHWC"))
    mean = jnp.mean(z, axis=(0, 1, 2), keepdims=True)
    var = jnp.mean((z - mean) ** 2, axis=(0, 1, 2), keepdims=True)
    y = gamma * (z - mean) * jax.lax.rsqrt(var + eps) + beta
    return jnp.transpose(y, (0, 3, 1, 2))


if __name__ == "__main__":
    key = jax.random.PRNGKey(0)
    kx, k3, k1 = jax.random.split(key, 3)

    N, C, H, W = 2, 16, 16, 16
    x = jax.random.normal(kx, (N, C, H, W), jnp.float32)

    # nor_conv_3x3: ReLUConvBN(C, C, 3, stride=1, padding=1, dilation=1, affine=True)
    w3 = jax.random.normal(k3, (C, C, 3, 3), jnp.float32) * 0.1
    g3 = jnp.ones((C,), jnp.float32)      # BatchNorm2d default init
    b3 = jnp.zeros((C,), jnp.float32)
    fwd3 = jax.jit(functools.partial(relu_conv_bn, padding=1))
    y3 = fwd3(x, w3, g3, b3)
    jax.block_until_ready(y3)
    assert y3.shape == (N, C, H, W) and y3.dtype == jnp.float32
    err3 = float(jnp.max(jnp.abs(y3 - _reference(x, w3, g3, b3, padding=1))))
    assert err3 < 5e-3, err3

    # nor_conv_1x1: ReLUConvBN(C, 2C, 1, stride=1, padding=0, dilation=1, affine=True)
    Cout = 2 * C
    w1 = jax.random.normal(k1, (Cout, C, 1, 1), jnp.float32) * 0.1
    g1 = jnp.ones((Cout,), jnp.float32)
    b1 = jnp.zeros((Cout,), jnp.float32)
    fwd1 = jax.jit(functools.partial(relu_conv_bn, padding=0))
    y1 = fwd1(x, w1, g1, b1)
    jax.block_until_ready(y1)
    assert y1.shape == (N, Cout, H, W) and y1.dtype == jnp.float32
    err1 = float(jnp.max(jnp.abs(y1 - _reference(x, w1, g1, b1, padding=0))))
    assert err1 < 5e-3, err1

    print("KERNEL_OK")
</pallas_src>

<mosaic_0001>
module attributes {stable_mosaic.version = 11 : i64} {
  func.func @kernel(%arg0: memref<2x16x16x16xbf16, #tpu.memory_space<vmem>>, %arg1: memref<144x16xbf16, #tpu.memory_space<vmem>>, %arg2: memref<2x16xf32, #tpu.memory_space<vmem>>, %arg3: memref<2x16x16x16xf32, #tpu.memory_space<vmem>>, %arg4: memref<2x18x33x16xbf16, #tpu.memory_space<vmem>>) attributes {dimension_semantics = [], scalar_prefetch = 0 : i64, scratch_operands = 1 : i64, tpu.core_type = #tpu.core_type<tc>} {
    %c0 = arith.constant 0 : index
    %c0_0 = arith.constant 0 : index
    %c0_1 = arith.constant 0 : index
    %c0_2 = arith.constant 0 : index
    %0 = vector.load %arg0[%c0, %c0_0, %c0_1, %c0_2] : memref<2x16x16x16xbf16, #tpu.memory_space<vmem>>, vector<2x16x16x16xbf16>
    %cst = arith.constant 0.000000e+00 : bf16
    %1 = vector.broadcast %cst : bf16 to vector<2x16x16x16xbf16>
    %2 = arith.maximumf %0, %1 : vector<2x16x16x16xbf16>
    %cst_3 = arith.constant 0.000000e+00 : bf16
    %3 = vector.broadcast %cst_3 : bf16 to vector<2x18x33x16xbf16>
    %c0_4 = arith.constant 0 : index
    %c0_5 = arith.constant 0 : index
    %c0_6 = arith.constant 0 : index
    %c0_7 = arith.constant 0 : index
    %4 = vector.load %arg4[%c0_4, %c0_5, %c0_6, %c0_7] : memref<2x18x33x16xbf16, #tpu.memory_space<vmem>>, vector<2x18x33x16xbf16>
    tpu.vector_store %arg4[%c0_4, %c0_5, %c0_6, %c0_7], %3 {strides = array<i32>} : memref<2x18x33x16xbf16, #tpu.memory_space<vmem>>, vector<2x18x33x16xbf16>,
    %c0_8 = arith.constant 0 : index
    %c1 = arith.constant 1 : index
    %c16 = arith.constant 16 : index
    %c0_9 = arith.constant 0 : index
    %5 = vector.load %arg4[%c0_8, %c1, %c16, %c0_9] : memref<2x18x33x16xbf16, #tpu.memory_space<vmem>>, vector<2x16x16x16xbf16>
    tpu.vector_store %arg4[%c0_8, %c1, %c16, %c0_9], %2 {strides = array<i32>} : memref<2x18x33x16xbf16, #tpu.memory_space<vmem>>, vector<2x16x16x16xbf16>,
    %c0_10 = arith.constant 0 : index
    %c0_11 = arith.constant 0 : index
    %c0_12 = arith.constant 0 : index
    %c0_13 = arith.constant 0 : index
    %6 = vector.load %arg4[%c0_10, %c0_11, %c0_12, %c0_13] : memref<2x18x33x16xbf16, #tpu.memory_space<vmem>>, vector<2x18x33x16xbf16>
    %7 = vector.extract_strided_slice %6 {offsets = [0, 0, 15, 0], sizes = [2, 16, 16, 16], strides = [1, 1, 1, 1]} : vector<2x18x33x16xbf16> to vector<2x16x16x16xbf16>
    %8 = vector.shape_cast %7 : vector<2x16x16x16xbf16> to vector<512x16xbf16>
    %9 = vector.extract_strided_slice %6 {offsets = [0, 0, 16, 0], sizes = [2, 16, 16, 16], strides = [1, 1, 1, 1]} : vector<2x18x33x16xbf16> to vector<2x16x16x16xbf16>
    %10 = vector.shape_cast %9 : vector<2x16x16x16xbf16> to vector<512x16xbf16>
    %11 = vector.extract_strided_slice %6 {offsets = [0, 0, 17, 0], sizes = [2, 16, 16, 16], strides = [1, 1, 1, 1]} : vector<2x18x33x16xbf16> to vector<2x16x16x16xbf16>
    %12 = vector.shape_cast %11 : vector<2x16x16x16xbf16> to vector<512x16xbf16>
    %13 = vector.extract_strided_slice %6 {offsets = [0, 1, 15, 0], sizes = [2, 16, 16, 16], strides = [1, 1, 1, 1]} : vector<2x18x33x16xbf16> to vector<2x16x16x16xbf16>
    %14 = vector.shape_cast %13 : vector<2x16x16x16xbf16> to vector<512x16xbf16>
    %15 = vector.extract_strided_slice %6 {offsets = [0, 1, 16, 0], sizes = [2, 16, 16, 16], strides = [1, 1, 1, 1]} : vector<2x18x33x16xbf16> to vector<2x16x16x16xbf16>
    %16 = vector.shape_cast %15 : vector<2x16x16x16xbf16> to vector<512x16xbf16>
    %17 = vector.extract_strided_slice %6 {offsets = [0, 1, 17, 0], sizes = [2, 16, 16, 16], strides = [1, 1, 1, 1]} : vector<2x18x33x16xbf16> to vector<2x16x16x16xbf16>
    %18 = vector.shape_cast %17 : vector<2x16x16x16xbf16> to vector<512x16xbf16>
    %19 = vector.extract_strided_slice %6 {offsets = [0, 2, 15, 0], sizes = [2, 16, 16, 16], strides = [1, 1, 1, 1]} : vector<2x18x33x16xbf16> to vector<2x16x16x16xbf16>
    %20 = vector.shape_cast %19 : vector<2x16x16x16xbf16> to vector<512x16xbf16>
    %21 = vector.extract_strided_slice %6 {offsets = [0, 2, 16, 0], sizes = [2, 16, 16, 16], strides = [1, 1, 1, 1]} : vector<2x18x33x16xbf16> to vector<2x16x16x16xbf16>
    %22 = vector.shape_cast %21 : vector<2x16x16x16xbf16> to vector<512x16xbf16>
    %23 = vector.extract_strided_slice %6 {offsets = [0, 2, 17, 0], sizes = [2, 16, 16, 16], strides = [1, 1, 1, 1]} : vector<2x18x33x16xbf16> to vector<2x16x16x16xbf16>
    %24 = vector.shape_cast %23 : vector<2x16x16x16xbf16> to vector<512x16xbf16>
    %25 = tpu.concatenate %8, %10, %12, %14, %16, %18, %20, %22, %24 in 1 : vector<512x16xbf16>, vector<512x16xbf16>, vector<512x16xbf16>, vector<512x16xbf16>, vector<512x16xbf16>, vector<512x16xbf16>, vector<512x16xbf16>, vector<512x16xbf16>, vector<512x16xbf16> -> vector<512x144xbf16>
    %c0_14 = arith.constant 0 : index
    %c0_15 = arith.constant 0 : index
    %26 = vector.load %arg1[%c0_14, %c0_15] : memref<144x16xbf16, #tpu.memory_space<vmem>>, vector<144x16xbf16>
    %cst_16 = arith.constant dense<0.000000e+00> : vector<512x16xf32>
    %27 = tpu.matmul %25, %26, %cst_16 {dimension_numbers = #tpu.dot_dimension_numbers<[1], [0], [0], [1], [0, 0, 1, 1], [], []>} : vector<512x144xbf16>, vector<144x16xbf16>, vector<512x16xf32> -> vector<512x16xf32>
    %cst_17 = arith.constant dense<0.000000e+00> : vector<16xf32>
    %28 = vector.multi_reduction <add>, %27, %cst_17 [0] : vector<512x16xf32> to vector<16xf32>
    %29 = vector.shape_cast %28 : vector<16xf32> to vector<1x16xf32>
    %cst_18 = arith.constant 0.001953125 : f32
    %30 = vector.broadcast %cst_18 : f32 to vector<1x16xf32>
    %31 = arith.mulf %29, %30 : vector<1x16xf32>
    %32 = arith.mulf %27, %27 : vector<512x16xf32>
    %cst_19 = arith.constant dense<0.000000e+00> : vector<16xf32>
    %33 = vector.multi_reduction <add>, %32, %cst_19 [0] : vector<512x16xf32> to vector<16xf32>
    %34 = vector.shape_cast %33 : vector<16xf32> to vector<1x16xf32>
    %cst_20 = arith.constant 0.001953125 : f32
    %35 = vector.broadcast %cst_20 : f32 to vector<1x16xf32>
    %36 = arith.mulf %34, %35 : vector<1x16xf32>
    %37 = arith.mulf %31, %31 : vector<1x16xf32>
    %38 = arith.subf %36, %37 : vector<1x16xf32>
    %c0_21 = arith.constant 0 : index
    %c0_22 = arith.constant 0 : index
    %39 = vector.load %arg2[%c0_21, %c0_22] : memref<2x16xf32, #tpu.memory_space<vmem>>, vector<1x16xf32>
    %c1_23 = arith.constant 1 : index
    %c0_24 = arith.constant 0 : index
    %40 = vector.load %arg2[%c1_23, %c0_24] : memref<2x16xf32, #tpu.memory_space<vmem>>, vector<1x16xf32>
    %cst_25 = arith.constant 9.99999974E-6 : f32
    %41 = vector.broadcast %cst_25 : f32 to vector<1x16xf32>
    %42 = arith.addf %38, %41 : vector<1x16xf32>
    %43 = math.rsqrt %42 : vector<1x16xf32>
    %44 = arith.mulf %39, %43 : vector<1x16xf32>
    %45 = arith.mulf %31, %44 : vector<1x16xf32>
    %46 = arith.subf %40, %45 : vector<1x16xf32>
    %47 = vector.broadcast %44 : vector<1x16xf32> to vector<512x16xf32>
    %48 = arith.mulf %27, %47 : vector<512x16xf32>
    %49 = vector.broadcast %46 : vector<1x16xf32> to vector<512x16xf32>
    %50 = arith.addf %48, %49 : vector<512x16xf32>
    %51 = vector.shape_cast %50 : vector<512x16xf32> to vector<2x16x16x16xf32>
    %c0_26 = arith.constant 0 : index
    %c0_27 = arith.constant 0 : index
    %c0_28 = arith.constant 0 : index
    %c0_29 = arith.constant 0 : index
    %52 = vector.load %arg3[%c0_26, %c0_27, %c0_28, %c0_29] : memref<2x16x16x16xf32, #tpu.memory_space<vmem>>, vector<2x16x16x16xf32>
    tpu.vector_store %arg3[%c0_26, %c0_27, %c0_28, %c0_29], %51 {strides = array<i32>} : memref<2x16x16x16xf32, #tpu.memory_space<vmem>>, vector<2x16x16x16xf32>,
    return
  }
}

</mosaic_0001>

<bundles_post_ra>
// kernel: relu_conv_bn.1
= control target key start
LH: loop header
LB: loop body
LE: loop exit
PB: predicated region body
PF: predicated region fallthrough
CT: control target
= control target key end

     0   :  { %vm271_vm0 = vcmask 125952   ;;  %v4955_v0 = vmov 0   ;;  %s4956_s12 = smov 16   ;;  %vm276_vm1 = vcmask 122880   ;;  %vm277_vm2 = vsmask.f32 256  ;;  %s8791_s0 = inlined_call_operand.vmem [shape: bf16[2,16,16,16], index: 0, kind: input, shape index: {}]   ;;  %s8792_s1 = inlined_call_operand.vmem [shape: bf16[144,16], index: 1, kind: input, shape index: {}]   ;;  %s8793_s2 = inlined_call_operand.vmem [shape: f32[2,16], index: 2, kind: input, shape index: {}]   ;;  %s8794_s3 = inlined_call_operand.vmem [shape: f32[2,16,16,16], index: 3, kind: output, shape index: {}]  }
   0x1   :  { %274 = vst.msk [vmem:[#allocation2 + $0x8] sm:$0xf] %vm271_vm0, %v4955_v0  ;;  %v4877_v2 = vld [vmem:[%s8791_s0 + $0x18] sm:$0xff]   ;;  %v4875_v3 = vld [vmem:[%s8791_s0 + $0x8] sm:$0xff]   ;;  %v4748_v6 = vld [vmem:[%s8791_s0] sm:$0xff]   ;;  %vm2881_vm7 = vcmask 130048  }
   0x2   :  { %275 = vst.msk [vmem:[#allocation2 + $0xc] sm:$0xf] %vm271_vm0, %v4955_v0  ;;  %v4761_v4 = vunpack.c.l.bf16 %v4877_v2  ;;  %v4762_v5 = vunpack.c.h.bf16 %v4877_v2  ;;  %v4753_v7 = vunpack.c.l.bf16 %v4875_v3  ;;  %v4754_v8 = vunpack.c.h.bf16 %v4875_v3  ;;  %v4878_v9 = vld [vmem:[%s8791_s0 + $0x20] sm:$0xff]   ;;  %v4876_v14 = vld [vmem:[%s8791_s0 + $0x10] sm:$0xff]   ;;  %v4879_v19 = vld [vmem:[%s8791_s0 + $0x28] sm:$0xff]   ;;  %s4957_s23 = smov 32  }
   0x3   :  { %273 = vst.msk [vmem:[#allocation2 + $0x4] sm:$0xf] %vm271_vm0, %v4955_v0  ;;  %v4749_v11 = vunpack.c.l.bf16 %v4748_v6  ;;  %v4750_v13 = vunpack.c.h.bf16 %v4748_v6  ;;  %v4765_v16 = vunpack.c.l.bf16 %v4878_v9  ;;  %v4766_v18 = vunpack.c.h.bf16 %v4878_v9  ;;  %v4881_v26 = vld [vmem:[%s8791_s0 + $0x38] sm:$0xff]   ;;  %v4880_v30 = vld [vmem:[%s8791_s0 + $0x30] sm:$0xff]   ;;  %v4882_v34 = vld [vmem:[%s8791_s0 + $0x40] sm:$0xff]   ;;  %s4959_s24 = smov 48  }
   0x4   :  { %283 = vst.msk [vmem:[#allocation2 + $0x18] sm:$0xf] %vm271_vm0, %v4955_v0  ;;  %v149_v10 = vmax.f32 %v4761_v4, 0.0  ;;  %v150_v12 = vmax.f32 %v4762_v5, 0.0  ;;  %v145_v15 = vmax.f32 %v4753_v7, 0.0  ;;  %v146_v17 = vmax.f32 %v4754_v8, 0.0  ;;  %vm5373_vm3 = vmand %vm276_vm1, %vm277_vm2 }
   0x5   :  { %284 = vst.msk [vmem:[#allocation2 + $0x1c] sm:$0xf] %vm271_vm0, %v4955_v0  ;;  %v143_v21 = vmax.f32 %v4749_v11, 0.0  ;;  %v4757_v22 = vunpack.c.l.bf16 %v4876_v14  ;;  %v144_v24 = vmax.f32 %v4750_v13, 0.0  ;;  %v4758_v25 = vunpack.c.h.bf16 %v4876_v14  ;;  %v4884_v48 = vld [vmem:[%s8791_s0 + $0x50] sm:$0xff]   ;;  %v4883_v55 = vld [vmem:[%s8791_s0 + $0x48] sm:$0xff]  }
   0x6   :  { %285 = vst.msk [vmem:[#allocation2 + $0x20] sm:$0xf] %vm271_vm0, %v4955_v0  ;;  %v213_v20 = vpack.c.bf16 %v149_v10, %v149_v10  ;;  %v214_v23 = vpack.c.bf16 %v150_v12, %v150_v12  ;;  %v209_v27 = vpack.c.bf16 %v145_v15, %v145_v15  ;;  %v151_v28 = vmax.f32 %v4765_v16, 0.0  ;;  %v4885_v62 = vld [vmem:[%s8791_s0 + $0x58] sm:$0xff]   ;;  %v4887_v3 = vld [vmem:[%s8791_s0 + $0x68] sm:$0xff]   ;;  %v4886_v7 = vld [vmem:[%s8791_s0 + $0x60] sm:$0xff]  }
   0x7   :  { %290 = vst.msk [vmem:[#allocation2 + $0x2c] sm:$0xf] %vm271_vm0, %v4955_v0  ;;  %v4769_v29 = vunpack.c.l.bf16 %v4879_v19  ;;  %v210_v31 = vpack.c.bf16 %v146_v17, %v146_v17  ;;  %v152_v32 = vmax.f32 %v4766_v18, 0.0  ;;  %v4770_v33 = vunpack.c.h.bf16 %v4879_v19  ;;  %v4888_v13 = vld [vmem:[%s8791_s0 + $0x70] sm:$0xff]   ;;  %v4890_v18 = vld [vmem:[%s8791_s0 + $0x80] sm:$0xff]   ;;  %s4960_s25 = smov 80  }
   0x8   :  { %291 = vst.msk [vmem:[#allocation2 + $0x30] sm:$0xf] %vm271_vm0, %v4955_v0  ;;  %v207_v35 = vpack.c.bf16 %v143_v21, %v143_v21  ;;  %v147_v36 = vmax.f32 %v4757_v22, 0.0  ;;  %v4777_v37 = vunpack.c.l.bf16 %v4881_v26  ;;  %v208_v38 = vpack.c.bf16 %v144_v24, %v144_v24  ;;  %s4961_s26 = smov 112   ;;  %s4962_s27 = smov 96  }
   0x9   :  { %v4702_v1 = vld [vmem:[#allocation2 + $0x8] sm:$0xff]  ;;  %292 = vst.msk [vmem:[#allocation2 + $0x34] sm:$0xf] %vm271_vm0, %v4955_v0  ;;  %v148_v39 = vmax.f32 %v4758_v25, 0.0  ;;  %v4778_v40 = vunpack.c.h.bf16 %v4881_v26  ;;  %v4773_v41 = vunpack.c.l.bf16 %v4880_v30  ;;  %v215_v42 = vpack.c.bf16 %v151_v28, %v151_v28 }
   0xa   :  { %2293 = vrot.lane.b32.xlu0 %v4702_v1, %s4956_s12  ;;  %297 = vst.msk [vmem:[#allocation2 + $0x40] sm:$0xf] %vm271_vm0, %v4955_v0  ;;  %v153_v43 = vmax.f32 %v4769_v29, 0.0  ;;  %v4774_v44 = vunpack.c.h.bf16 %v4880_v30  ;;  %v4781_v45 = vunpack.c.l.bf16 %v4882_v34  ;;  %v216_v46 = vpack.c.bf16 %v152_v32, %v152_v32  ;;  %v4891_v32 = vld [vmem:[%s8791_s0 + $0x88] sm:$0xff]  }
   0xb   :  { %298 = vst.msk [vmem:[#allocation2 + $0x44] sm:$0xf] %vm271_vm0, %v4955_v0  ;;  %v154_v47 = vmax.f32 %v4770_v33, 0.0  ;;  %v211_v49 = vpack.c.bf16 %v147_v36, %v147_v36  ;;  %v157_v50 = vmax.f32 %v4777_v37, 0.0  ;;  %v212_v51 = vpack.c.bf16 %v148_v39, %v148_v39 }
   0xc   :  { %299 = vst.msk [vmem:[#allocation2 + $0x48] sm:$0xf] %vm271_vm0, %v4955_v0  ;;  %v158_v52 = vmax.f32 %v4778_v40, 0.0  ;;  %v155_v53 = vmax.f32 %v4773_v41, 0.0  ;;  %v4782_v54 = vunpack.c.h.bf16 %v4882_v34  ;;  %v217_v56 = vpack.c.bf16 %v153_v43, %v153_v43 }
   0xd   :  { %304 = vst.msk [vmem:[#allocation2 + $0x54] sm:$0xf] %vm271_vm0, %v4955_v0  ;;  %v156_v57 = vmax.f32 %v4774_v44, 0.0  ;;  %v159_v58 = vmax.f32 %v4781_v45, 0.0  ;;  %v4789_v59 = vunpack.c.l.bf16 %v4884_v48  ;;  %v218_v60 = vpack.c.bf16 %v154_v47, %v154_v47 }
   0xe   :  { %305 = vst.msk [vmem:[#allocation2 + $0x58] sm:$0xf] %vm271_vm0, %v4955_v0  ;;  %v4790_v61 = vunpack.c.h.bf16 %v4884_v48  ;;  %v4785_v1 = vunpack.c.l.bf16 %v4883_v55  ;;  %v4786_v2 = vunpack.c.h.bf16 %v4883_v55  ;;  %v222_v4 = vpack.c.bf16 %v158_v52, %v158_v52 }
   0xf   :  { %306 = vst.msk [vmem:[#allocation2 + $0x5c] sm:$0xf] %vm271_vm0, %v4955_v0  ;;  %v219_v5 = vpack.c.bf16 %v155_v53, %v155_v53  ;;  %v160_v6 = vmax.f32 %v4782_v54, 0.0  ;;  %v220_v9 = vpack.c.bf16 %v156_v57, %v156_v57  ;;  %v223_v10 = vpack.c.bf16 %v159_v58, %v159_v58  ;;  %v4892_v58 = vld [vmem:[%s8791_s0 + $0x90] sm:$0xff]  }
  0x10   :  { %311 = vst.msk [vmem:[#allocation2 + $0x68] sm:$0xf] %vm271_vm0, %v4955_v0  ;;  %v163_v11 = vmax.f32 %v4789_v59, 0.0  ;;  %v4793_v12 = vunpack.c.l.bf16 %v4885_v62  ;;  %v164_v14 = vmax.f32 %v4790_v61, 0.0  ;;  %v4794_v15 = vunpack.c.h.bf16 %v4885_v62 }
  0x11   :  { %312 = vst.msk [vmem:[#allocation2 + $0x6c] sm:$0xf] %vm271_vm0, %v4955_v0  ;;  %v4801_v16 = vunpack.c.l.bf16 %v4887_v3  ;;  %v4802_v17 = vunpack.c.h.bf16 %v4887_v3  ;;  %v162_v21 = vmax.f32 %v4786_v2, 0.0  ;;  %v4797_v22 = vunpack.c.l.bf16 %v4886_v7 }
  0x12   :  { %313 = vst.msk [vmem:[#allocation2 + $0x70] sm:$0xf] %vm271_vm0, %v4955_v0  ;;  %v224_v24 = vpack.c.bf16 %v160_v6, %v160_v6  ;;  %v4805_v25 = vunpack.c.l.bf16 %v4888_v13  ;;  %v4806_v26 = vunpack.c.h.bf16 %v4888_v13  ;;  %v227_v28 = vpack.c.bf16 %v163_v11, %v163_v11 }
  0x13   :  { %318 = vst.msk [vmem:[#allocation2 + $0x7c] sm:$0xf] %vm271_vm0, %v4955_v0  ;;  %v165_v29 = vmax.f32 %v4793_v12, 0.0  ;;  %v4813_v30 = vunpack.c.l.bf16 %v4890_v18  ;;  %v228_v33 = vpack.c.bf16 %v164_v14, %v164_v14  ;;  %v166_v34 = vmax.f32 %v4794_v15, 0.0 }
  0x14   :  { %319 = vst.msk [vmem:[#allocation2 + $0x80] sm:$0xf] %vm271_vm0, %v4955_v0  ;;  %v170_v36 = vmax.f32 %v4802_v17, 0.0  ;;  %v226_v39 = vpack.c.bf16 %v162_v21, %v162_v21  ;;  %v167_v40 = vmax.f32 %v4797_v22, 0.0  ;;  %v5276_v43 = vmax.f32 %v4806_v26, 0.0  ;;  %v5349_v26 = vld [vmem:[%s8791_s0 + $0xb8] sm:$0xff]  }
  0x15   :  { %320 = vst.msk [vmem:[#allocation2 + $0x84] sm:$0xf] %vm271_vm0, %v4955_v0  ;;  %v4817_v44 = vunpack.c.l.bf16 %v4891_v32  ;;  %v4818_v45 = vunpack.c.h.bf16 %v4891_v32  ;;  %v229_v47 = vpack.c.bf16 %v165_v29, %v165_v29  ;;  %v5280_v48 = vmax.f32 %v4813_v30, 0.0  ;;  %v4746_v32 = vld [vmem:[%s8792_s1 + $0x40] sm:$0xff] }
  0x16   :  { %325 = vst.msk [vmem:[#allocation2 + $0x90] sm:$0xf] %vm271_vm0, %v4955_v0  ;;  %v234_v53 = vpack.c.bf16 %v170_v36, %v170_v36  ;;  %v236_v3 = vpack.c.bf16 %v5276_v43, %v5276_v43  ;;  %v4822_v12 = vunpack.c.h.bf16 %v4892_v58  ;;  %3744 = vmatpush.bf16.msra.mxu1 %v4746_v32  ;;  %vm1442_vm4 = vsmask.f32 3328  ;;  %4914 = vmatpush.bf16.msra.mxu3 %v4746_v32 }
  0x17   :  { %326 = vst.msk [vmem:[#allocation2 + $0x94] sm:$0xf] %vm271_vm0, %v4955_v0  ;;  %v5304_v62 = vmax.f32 %v4817_v44, 0.0  ;;  %vm1443_vm5 = vsmask.f32 7440  ;;  %vm2978_vm10 = vcmask 261120  }
  0x18   :  { %327 = vst.msk [vmem:[#allocation2 + $0x98] sm:$0xf] %vm271_vm0, %v4955_v0  ;;  %vm5403_vm6 = vmor %vm1442_vm4, %vm1443_vm5  ;;  %vm736_vm8 = vsmask.f32 4368  ;;  %vm3043_vm11 = vcmask 392192   ;;  %vm3108_vm12 = vcmask 523264  }
  0x19   :  { %332 = vst.msk [vmem:[#allocation2 + $0xa4] sm:$0xf] %vm271_vm0, %v4955_v0  ;;  %v241_v22 = vpack.c.bf16 %v5304_v62, %v5304_v62  ;;  %vm5677_vm9 = vmor %vm277_vm2, %vm736_vm8  ;;  %vm3173_vm13 = vcmask 654336   ;;  %vm3238_vm14 = vcmask 785408   ;;  %vm3303_vm15 = vcmask 916480  }
  0x1a   :  { %333 = vst.msk [vmem:[#allocation2 + $0xa8] sm:$0xf] %vm271_vm0, %v4955_v0 }
  0x1b   :  { %334 = vst.msk [vmem:[#allocation2 + $0xac] sm:$0xf] %vm271_vm0, %v4955_v0 }
  0x1c   :  { %339 = vst.msk [vmem:[#allocation2 + $0xb8] sm:$0xf] %vm271_vm0, %v4955_v0 }
  0x1d   :  { %340 = vst.msk [vmem:[#allocation2 + $0xbc] sm:$0xf] %vm271_vm0, %v4955_v0 }
  0x1e   :  { %341 = vst.msk [vmem:[#allocation2 + $0xc0] sm:$0xf] %vm271_vm0, %v4955_v0 }
  0x1f   :  { %346 = vst.msk [vmem:[#allocation2 + $0xcc] sm:$0xf] %vm271_vm0, %v4955_v0 }
  0x20   :  { %347 = vst.msk [vmem:[#allocation2 + $0xd0] sm:$0xf] %vm271_vm0, %v4955_v0 }
  0x21   :  { %348 = vst.msk [vmem:[#allocation2 + $0xd4] sm:$0xf] %vm271_vm0, %v4955_v0 }
  0x22   :  { %353 = vst.msk [vmem:[#allocation2 + $0xe0] sm:$0xf] %vm271_vm0, %v4955_v0 }
  0x23   :  { %354 = vst.msk [vmem:[#allocation2 + $0xe4] sm:$0xf] %vm271_vm0, %v4955_v0 }
  0x24   :  { %355 = vst.msk [vmem:[#allocation2 + $0xe8] sm:$0xf] %vm271_vm0, %v4955_v0 }
  0x25   :  { %360 = vst.msk [vmem:[#allocation2 + $0xf4] sm:$0xf] %vm271_vm0, %v4955_v0 }
  0x26   :  { %361 = vst.msk [vmem:[#allocation2 + $0xf8] sm:$0xf] %vm271_vm0, %v4955_v0 }
  0x27   :  { %362 = vst.msk [vmem:[#allocation2 + $0xfc] sm:$0xf] %vm271_vm0, %v4955_v0 }
  0x28   :  { %367 = vst.msk [vmem:[#allocation2 + $0x108] sm:$0xf] %vm271_vm0, %v4955_v0 }
  0x29   :  { %368 = vst.msk [vmem:[#allocation2 + $0x10c] sm:$0xf] %vm271_vm0, %v4955_v0 }
  0x2a   :  { %369 = vst.msk [vmem:[#allocation2 + $0x110] sm:$0xf] %vm271_vm0, %v4955_v0 }
  0x2b   :  { %374 = vst.msk [vmem:[#allocation2 + $0x11c] sm:$0xf] %vm271_vm0, %v4955_v0 }
  0x2c   :  { %375 = vst.msk [vmem:[#allocation2 + $0x120] sm:$0xf] %vm271_vm0, %v4955_v0 }
  0x2d   :  { %376 = vst.msk [vmem:[#allocation2 + $0x124] sm:$0xf] %vm271_vm0, %v4955_v0 }
  0x2e   :  { %381 = vst.msk [vmem:[#allocation2 + $0x130] sm:$0xf] %vm271_vm0, %v4955_v0 }
  0x2f   :  { %382 = vst.msk [vmem:[#allocation2 + $0x134] sm:$0xf] %vm271_vm0, %v4955_v0 }
  0x30   :  { %383 = vst.msk [vmem:[#allocation2 + $0x138] sm:$0xf] %vm271_vm0, %v4955_v0 }
  0x31   :  { %388 = vst.msk [vmem:[#allocation2 + $0x144] sm:$0xf] %vm271_vm0, %v4955_v0 }
  0x32   :  { %389 = vst.msk [vmem:[#allocation2 + $0x148] sm:$0xf] %vm271_vm0, %v4955_v0 }
  0x33   :  { %390 = vst.msk [vmem:[#allocation2 + $0x14c] sm:$0xf] %vm271_vm0, %v4955_v0 }
  0x34   :  { %395 = vst.msk [vmem:[#allocation2 + $0x158] sm:$0xf] %vm271_vm0, %v4955_v0 }
  0x35   :  { %396 = vst.msk [vmem:[#allocation2 + $0x15c] sm:$0xf] %vm271_vm0, %v4955_v0 }
  0x36   :  { %397 = vst.msk [vmem:[#allocation2 + $0x160] sm:$0xf] %vm271_vm0, %v4955_v0 }
  0x37   :  { %402 = vst.msk [vmem:[#allocation2 + $0x16c] sm:$0xf] %vm271_vm0, %v4955_v0 }
  0x38   :  { %403 = vst.msk [vmem:[#allocation2 + $0x170] sm:$0xf] %vm271_vm0, %v4955_v0 }
  0x39   :  { %404 = vst.msk [vmem:[#allocation2 + $0x174] sm:$0xf] %vm271_vm0, %v4955_v0 }
  0x3a   :  { %409 = vst.msk [vmem:[#allocation2 + $0x180] sm:$0xf] %vm271_vm0, %v4955_v0 }
  0x3b   :  { %410 = vst.msk [vmem:[#allocation2 + $0x184] sm:$0xf] %vm271_vm0, %v4955_v0 }
  0x3c   :  { %411 = vst.msk [vmem:[#allocation2 + $0x188] sm:$0xf] %vm271_vm0, %v4955_v0 }
  0x3d   :  { %416 = vst.msk [vmem:[#allocation2 + $0x194] sm:$0xf] %vm271_vm0, %v4955_v0 }
  0x3e   :  { %417 = vst.msk [vmem:[#allocation2 + $0x198] sm:$0xf] %vm271_vm0, %v4955_v0 }
  0x3f   :  { %418 = vst.msk [vmem:[#allocation2 + $0x19c] sm:$0xf] %vm271_vm0, %v4955_v0 }
  0x40   :  { %423 = vst.msk [vmem:[#allocation2 + $0x1a8] sm:$0xf] %vm271_vm0, %v4955_v0 }
  0x41   :  { %424 = vst.msk [vmem:[#allocation2 + $0x1ac] sm:$0xf] %vm271_vm0, %v4955_v0 }
  0x42   :  { %425 = vst.msk [vmem:[#allocation2 + $0x1b0] sm:$0xf] %vm271_vm0, %v4955_v0 }
  0x43   :  { %430 = vst.msk [vmem:[#allocation2 + $0x1bc] sm:$0xf] %vm271_vm0, %v4955_v0 }
  0x44   :  { %431 = vst.msk [vmem:[#allocation2 + $0x1c0] sm:$0xf] %vm271_vm0, %v4955_v0 }
  0x45   :  { %432 = vst.msk [vmem:[#allocation2 + $0x1c4] sm:$0xf] %vm271_vm0, %v4955_v0 }
  0x46   :  { %437 = vst.msk [vmem:[#allocation2 + $0x1d0] sm:$0xf] %vm271_vm0, %v4955_v0 }
  0x47   :  { %438 = vst.msk [vmem:[#allocation2 + $0x1d4] sm:$0xf] %vm271_vm0, %v4955_v0 }
  0x48   :  { %439 = vst.msk [vmem:[#allocation2 + $0x1d8] sm:$0xf] %vm271_vm0, %v4955_v0 }
  0x49   :  { %444 = vst.msk [vmem:[#allocation2 + $0x1e4] sm:$0xf] %vm271_vm0, %v4955_v0 }
  0x4a   :  { %445 = vst.msk [vmem:[#allocation2 + $0x1e8] sm:$0xf] %vm271_vm0, %v4955_v0 }
  0x4b   :  { %446 = vst.msk [vmem:[#allocation2 + $0x1ec] sm:$0xf] %vm271_vm0, %v4955_v0 }
  0x4c   :  { %451 = vst.msk [vmem:[#allocation2 + $0x1f8] sm:$0xf] %vm271_vm0, %v4955_v0 }
  0x4d   :  { %452 = vst.msk [vmem:[#allocation2 + $0x1fc] sm:$0xf] %vm271_vm0, %v4955_v0 }
  0x4e   :  { %453 = vst.msk [vmem:[#allocation2 + $0x200] sm:$0xf] %vm271_vm0, %v4955_v0 }
  0x4f   :  { %458 = vst.msk [vmem:[#allocation2 + $0x20c] sm:$0xf] %vm271_vm0, %v4955_v0 }
  0x50   :  { %459 = vst.msk [vmem:[#allocation2 + $0x210] sm:$0xf] %vm271_vm0, %v4955_v0 }
  0x51   :  { %460 = vst.msk [vmem:[#allocation2 + $0x214] sm:$0xf] %vm271_vm0, %v4955_v0 }
  0x52   :  { %465 = vst.msk [vmem:[#allocation2 + $0x220] sm:$0xf] %vm271_vm0, %v4955_v0 }
  0x53   :  { %466 = vst.msk [vmem:[#allocation2 + $0x224] sm:$0xf] %vm271_vm0, %v4955_v0 }
  0x54   :  { %467 = vst.msk [vmem:[#allocation2 + $0x228] sm:$0xf] %vm271_vm0, %v4955_v0 }
  0x55   :  { %472 = vst.msk [vmem:[#allocation2 + $0x234] sm:$0xf] %vm271_vm0, %v4955_v0 }
  0x56   :  { %473 = vst.msk [vmem:[#allocation2 + $0x238] sm:$0xf] %vm271_vm0, %v4955_v0 }
  0x57   :  { %474 = vst.msk [vmem:[#allocation2 + $0x23c] sm:$0xf] %vm271_vm0, %v4955_v0 }
  0x58   :  { %479 = vst.msk [vmem:[#allocation2 + $0x248] sm:$0xf] %vm271_vm0, %v4955_v0 }
  0x59   :  { %480 = vst.msk [vmem:[#allocation2 + $0x24c] sm:$0xf] %vm271_vm0, %v4955_v0 }
  0x5a   :  { %481 = vst.msk [vmem:[#allocation2 + $0x250] sm:$0xf] %vm271_vm0, %v4955_v0 }
  0x5b   :  { %486 = vst.msk [vmem:[#allocation2 + $0x25c] sm:$0xf] %vm271_vm0, %v4955_v0 }
  0x5c   :  { %487 = vst.msk [vmem:[#allocation2 + $0x260] sm:$0xf] %vm271_vm0, %v4955_v0 }
  0x5d   :  { %488 = vst.msk [vmem:[#allocation2 + $0x264] sm:$0xf] %vm271_vm0, %v4955_v0 }
  0x5e   :  { %493 = vst.msk [vmem:[#allocation2 + $0x270] sm:$0xf] %vm271_vm0, %v4955_v0 }
  0x5f   :  { %494 = vst.msk [vmem:[#allocation2 + $0x274] sm:$0xf] %vm271_vm0, %v4955_v0 }
  0x60   :  { %495 = vst.msk [vmem:[#allocation2 + $0x278] sm:$0xf] %vm271_vm0, %v4955_v0 }
  0x61   :  { %500 = vst.msk [vmem:[#allocation2 + $0x284] sm:$0xf] %vm271_vm0, %v4955_v0 }
  0x62   :  { %501 = vst.msk [vmem:[#allocation2 + $0x288] sm:$0xf] %vm271_vm0, %v4955_v0 }
  0x63   :  { %502 = vst.msk [vmem:[#allocation2 + $0x28c] sm:$0xf] %vm271_vm0, %v4955_v0 }
  0x64   :  { %507 = vst.msk [vmem:[#allocation2 + $0x298] sm:$0xf] %vm271_vm0, %v4955_v0 }
  0x65   :  { %508 = vst.msk [vmem:[#allocation2 + $0x29c] sm:$0xf] %vm271_vm0, %v4955_v0 }
  0x66   :  { %509 = vst.msk [vmem:[#allocation2 + $0x2a0] sm:$0xf] %vm271_vm0, %v4955_v0 }
  0x67   :  { %514 = vst.msk [vmem:[#allocation2 + $0x2ac] sm:$0xf] %vm271_vm0, %v4955_v0 }
  0x68   :  { %515 = vst.msk [vmem:[#allocation2 + $0x2b0] sm:$0xf] %vm271_vm0, %v4955_v0 }
  0x69   :  { %516 = vst.msk [vmem:[#allocation2 + $0x2b4] sm:$0xf] %vm271_vm0, %v4955_v0 }
  0x6a   :  { %521 = vst.msk [vmem:[#allocation2 + $0x2c0] sm:$0xf] %vm271_vm0, %v4955_v0 }
  0x6b   :  { %522 = vst.msk [vmem:[#allocation2 + $0x2c4] sm:$0xf] %vm271_vm0, %v4955_v0 }
  0x6c   :  { %523 = vst.msk [vmem:[#allocation2 + $0x2c8] sm:$0xf] %vm271_vm0, %v4955_v0  ;;  %v221_v0 = vpack.c.bf16 %v157_v50, %v157_v50  ;;  %v4893_v50 = vld [vmem:[%s8791_s0 + $0x98] sm:$0xff]  }
  0x6d   :  { %534 = vst.msk [vmem:[#allocation2 + $0x58] sm:$0xf] %vm271_vm0, %v213_v20  ;;  %v161_v20 = vmax.f32 %v4785_v1, 0.0  ;;  %v4894_v1 = vld [vmem:[%s8791_s0 + $0xa0] sm:$0xff]  }
  0x6e   :  { %535 = vst.msk [vmem:[#allocation2 + $0x5c] sm:$0xf] %vm271_vm0, %v214_v23  ;;  %v4798_v23 = vunpack.c.h.bf16 %v4886_v7  ;;  %v4896_v7 = vld [vmem:[%s8791_s0 + $0xb0] sm:$0xff]   ;;  %v4829_v13 = vunpack.c.l.bf16 %v4894_v1 }
  0x6f   :  { %530 = vst.msk [vmem:[#allocation2 + $0x30] sm:$0xf] %vm271_vm0, %v209_v27 }
  0x70   :  { %531 = vst.msk [vmem:[#allocation2 + $0x34] sm:$0xf] %vm271_vm0, %v210_v31  ;;  %v4814_v31 = vunpack.c.h.bf16 %v4890_v18  ;;  %v5271_v41 = vmax.f32 %v4798_v23, 0.0  ;;  %v4830_v18 = vunpack.c.h.bf16 %v4894_v1 }
  0x71   :  { %528 = vst.msk [vmem:[#allocation2 + $0x1c] sm:$0xf] %vm271_vm0, %v207_v35  ;;  %v169_v35 = vmax.f32 %v4801_v16, 0.0  ;;  %v4895_v16 = vld [vmem:[%s8791_s0 + $0xa8] sm:$0xff]  }
  0x72   :  { %529 = vst.msk [vmem:[#allocation2 + $0x20] sm:$0xf] %vm271_vm0, %v208_v38  ;;  %v225_v38 = vpack.c.bf16 %v161_v20, %v161_v20  ;;  %v232_v57 = vpack.c.bf16 %v5271_v41, %v5271_v41  ;;  %v4838_v20 = vunpack.c.h.bf16 %v4896_v7  ;;  %v4834_v29 = vunpack.c.h.bf16 %v4895_v16 }
  0x73   :  { %536 = vst.msk [vmem:[#allocation2 + $0x6c] sm:$0xf] %vm271_vm0, %v215_v42  ;;  %v5274_v42 = vmax.f32 %v4805_v25, 0.0  ;;  %v233_v52 = vpack.c.bf16 %v169_v35, %v169_v35 }
  0x74   :  { %537 = vst.msk [vmem:[#allocation2 + $0x70] sm:$0xf] %vm271_vm0, %v216_v46 }
  0x75   :  { %v4706_v63 = vld [vmem:[#allocation2 + $0x58] sm:$0xff]  ;;  %532 = vst.msk [vmem:[#allocation2 + $0x44] sm:$0xf] %vm271_vm0, %v211_v49  ;;  %v5282_v49 = vmax.f32 %v4814_v31, 0.0  ;;  %v235_v61 = vpack.c.bf16 %v5274_v42, %v5274_v42  ;;  %v180_v31 = vmax.f32 %v4822_v12, 0.0 }
  0x76   :  { %533 = vst.msk [vmem:[#allocation2 + $0x48] sm:$0xf] %vm271_vm0, %v212_v51  ;;  %2301 = vrot.lane.b32.xlu2 %v4706_v63, %s4956_s12  ;;  %v230_v51 = vpack.c.bf16 %v166_v34, %v166_v34  ;;  %v5288_v54 = vld [vmem:[#allocation2 + $0x30] sm:$0xf]  ;;  %v5306_v63 = vmax.f32 %v4818_v45, 0.0 }
  0x77   :  { %v4704_v8 = vld [vmem:[#allocation2 + $0x30] sm:$0xff]  ;;  %538 = vst.msk [vmem:[#allocation2 + $0x80] sm:$0xf] %vm271_vm0, %v217_v56  ;;  %v231_v56 = vpack.c.bf16 %v167_v40, %v167_v40  ;;  %v8820_v59 = vshrl.u32 %v5288_v54, 16  ;;  %v5359_v34 = vld [vmem:[#allocation2 + $0x38] sm:$0x1]  ;;  %v4841_v40 = vunpack.c.l.bf16 %v5349_v26 }
  0x78   :  { %539 = vst.msk [vmem:[#allocation2 + $0x84] sm:$0xf] %vm271_vm0, %v218_v60  ;;  %2297 = vrot.lane.b32.xlu1 %v4704_v8, %s4956_s12  ;;  %v5290_v55 = vld [vmem:[#allocation2 + $0x34] sm:$0xf]  ;;  %v8803_v60 = vshll.u32 %v5288_v54, 16  ;;  %v240_v8 = vpack.c.bf16 %v5282_v49, %v5282_v49  ;;  %v242_v23 = vpack.c.bf16 %v5306_v63, %v5306_v63 }
  0x79   :  { %v4703_v19 = vld [vmem:[#allocation2 + $0x1c] sm:$0xff]  ;;  %542 = vst.msk [vmem:[#allocation2 + $0xa8] sm:$0xf] %vm271_vm0, %v221_v0  ;;  %v4825_v0 = vunpack.c.l.bf16 %v4893_v50  ;;  %v8804_v6 = vshll.u32 %v5290_v55, 16  ;;  %v1473_v14 = vrot.slane %v8820_v59, 4 }
  0x7a   :  { %543 = vst.msk [vmem:[#allocation2 + $0xac] sm:$0xf] %vm271_vm0, %v222_v4  ;;  %2295 = vrot.lane.b32.xlu0 %v4703_v19, %s4956_s12  ;;  %v239_v4 = vpack.c.bf16 %v5280_v48, %v5280_v48  ;;  %v1474_v15 = vrot.slane %v8803_v60, 5  ;;  %v4837_v19 = vunpack.c.l.bf16 %v4896_v7 }
  0x7b   :  { %v4707_v27 = vld [vmem:[#allocation2 + $0x6c] sm:$0xff]  ;;  %540 = vst.msk [vmem:[#allocation2 + $0x94] sm:$0xf] %vm271_vm0, %v219_v5  ;;  %v8821_v5 = vshrl.u32 %v5290_v55, 16  ;;  %v181_v17 = vmax.f32 %v4825_v0, 0.0 }
  0x7c   :  { %541 = vst.msk [vmem:[#allocation2 + $0x98] sm:$0xf] %vm271_vm0, %v220_v9  ;;  %v4826_v9 = vunpack.c.h.bf16 %v4893_v50  ;;  %v1475_v35 = vor.u32 %v1474_v15, %v1473_v14  ;;  %v4842_v50 = vunpack.c.h.bf16 %v5349_v26 }
  0x7d   :  { %v4705_v37 = vld [vmem:[#allocation2 + $0x44] sm:$0xff]  ;;  %544 = vst.msk [vmem:[#allocation2 + $0xbc] sm:$0xf] %vm271_vm0, %v223_v10  ;;  %v4821_v10 = vunpack.c.l.bf16 %v4892_v58  ;;  %v1479_v25 = vrot.slane %v8821_v5, 4  ;;  %v245_v41 = vpack.c.bf16 %v181_v17, %v181_v17  ;;  %v5442_v17 = vld [vmem:[#allocation2 + $0x4c] sm:$0x1] }
  0x7e   :  { %545 = vst.msk [vmem:[#allocation2 + $0xc0] sm:$0xf] %vm271_vm0, %v224_v24  ;;  %2303 = vrot.lane.b32.xlu2 %v4707_v27, %s4956_s12  ;;  %v5342_v24 = vrot.slane %v8804_v6, 5  ;;  %v182_v27 = vmax.f32 %v4826_v9, 0.0  ;;  %v5384_v49 = vrot.slane %v1475_v35, 4  ;;  %v190_v14 = vmax.f32 %v4842_v50, 0.0 }
  0x7f   :  { %v4708_v46 = vld [vmem:[#allocation2 + $0x80] sm:$0xff]  ;;  %548 = vst.msk [vmem:[#allocation2 + $0xe4] sm:$0xf] %vm271_vm0, %v227_v28  ;;  %v4833_v28 = vunpack.c.l.bf16 %v4895_v16  ;;  %v179_v30 = vmax.f32 %v4821_v10, 0.0 }
  0x80   :  { %549 = vst.msk [vmem:[#allocation2 + $0xe8] sm:$0xf] %vm271_vm0, %v228_v33  ;;  %2299 = vrot.lane.b32.xlu1 %v4705_v37, %s4956_s12  ;;  %v5357_v33 = vmax.f32 %v4829_v13, 0.0  ;;  %v5362_v37 = vmax.f32 %v4830_v18, 0.0  ;;  %v1480_v43 = vor.u32 %v1479_v25, %v5342_v24  ;;  %v246_v44 = vpack.c.bf16 %v182_v27, %v182_v27  ;;  %v5426_v10 = vld [vmem:[#allocation2 + $0x44] sm:$0xf] }
  0x81   :  { %546 = vst.msk [vmem:[#allocation2 + $0xd0] sm:$0xf] %vm271_vm0, %v225_v38  ;;  %v4710_v2 = vld [vmem:[#allocation2 + $0xa8] sm:$0xff]  ;;  %v5364_v38 = vmax.f32 %v4837_v19, 0.0  ;;  %v5379_v45 = vmax.f32 %v4833_v28, 0.0  ;;  %v243_v48 = vpack.c.bf16 %v179_v30, %v179_v30  ;;  %v1478_v12 = vsel %vm5403_vm6, %v5384_v49, %v5342_v24  ;;  %v4901_v28 = vld [vmem:[%s8791_s0 + $0xd8] sm:$0xff]  }
  0x82   :  { %547 = vst.msk [vmem:[#allocation2 + $0xd4] sm:$0xf] %vm271_vm0, %v226_v39  ;;  %2305 = vrot.lane.b32.xlu0 %v4708_v46, %s4956_s12  ;;  %v5366_v39 = vmax.f32 %v4838_v20, 0.0  ;;  %v5381_v46 = vmax.f32 %v4834_v29, 0.0  ;;  %v248_v63 = vpack.c.bf16 %v5362_v37, %v5362_v37  ;;  %v5413_v0 = vrot.slane %v1480_v43, 4  ;;  %v4903_v29 = vld [vmem:[%s8791_s0 + $0xe8] sm:$0xff]  }
  0x83   :  { %550 = vst.msk [vmem:[#allocation2 + $0xf8] sm:$0xf] %vm271_vm0, %v229_v47  ;;  %v4709_v11 = vld [vmem:[#allocation2 + $0x94] sm:$0xff]  ;;  %v251_v1 = vpack.c.bf16 %v5364_v38, %v5364_v38  ;;  %v8802_v15 = vshrl.u32 %v5426_v10, 16  ;;  %v8800_v18 = vshll.u32 %v5426_v10, 16  ;;  %v4865_v43 = vunpack.c.l.bf16 %v4903_v29 }
  0x84   :  { %551 = vst.msk [vmem:[#allocation2 + $0xfc] sm:$0xf] %vm271_vm0, %v230_v51  ;;  %v4899_v51 = vld [vmem:[%s8791_s0 + $0xc8] sm:$0xff]   ;;  %v250_v13 = vpack.c.bf16 %v5381_v46, %v5381_v46 }
  0x85   :  { %554 = vst.msk [vmem:[#allocation2 + $0x120] sm:$0xf] %vm271_vm0, %v233_v52  ;;  %v4711_v21 = vld [vmem:[#allocation2 + $0xbc] sm:$0xff]  ;;  %v4849_v7 = vunpack.c.l.bf16 %v4899_v51  ;;  %v1487_v27 = vrot.slane %v8802_v15, 4  ;;  %v612_v15 = vld [vmem:[#allocation2 + $0x68] sm:$0xf] }
  0x86   :  { %555 = vst.msk [vmem:[#allocation2 + $0x124] sm:$0xf] %vm271_vm0, %v234_v53  ;;  %2309 = vrot.lane.b32.xlu2 %v4710_v2, %s4956_s12  ;;  %v5393_v52 = vld [vmem:[%s8791_s0 + $0xc0] sm:$0xff]   ;;  %v244_v53 = vpack.c.bf16 %v180_v31, %v180_v31  ;;  %v252_v2 = vpack.c.bf16 %v5366_v39, %v5366_v39 }
  0x87   :  { %552 = vst.msk [vmem:[#allocation2 + $0x10c] sm:$0xf] %vm271_vm0, %v231_v56  ;;  %v4713_v36 = vld [vmem:[#allocation2 + $0xe4] sm:$0xff]  ;;  %v247_v56 = vpack.c.bf16 %v5357_v33, %v5357_v33  ;;  %v4845_v9 = vunpack.c.l.bf16 %v5393_v52  ;;  %v193_v30 = vmax.f32 %v4849_v7, 0.0  ;;  %v1488_v33 = vrot.slane %v8800_v18, 5  ;;  %v4720_v7 = vld [vmem:[#allocation2 + $0x170] sm:$0xff] }
  0x88   :  { %553 = vst.msk [vmem:[#allocation2 + $0x110] sm:$0xf] %vm271_vm0, %v232_v57  ;;  %2307 = vrot.lane.b32.xlu1 %v4709_v11, %s4956_s12  ;;  %v294_v57 = vsel %vm5373_vm3, 0, %v5359_v34  ;;  %v5428_v11 = vld [vmem:[#allocation2 + $0x48] sm:$0xf] }
  0x89   :  { %556 = vst.msk [vmem:[#allocation2 + $0x134] sm:$0xf] %vm271_vm0, %v235_v61  ;;  %v4712_v47 = vld [vmem:[#allocation2 + $0xd0] sm:$0xff]  ;;  %v5407_v61 = vmax.f32 %v4841_v40, 0.0  ;;  %v8801_v19 = vshrl.u32 %v5428_v11, 16  ;;  %v8799_v20 = vshll.u32 %v5428_v11, 16  ;;  %v1489_v39 = vor.u32 %v1488_v33, %v1487_v27 }
  0x8a   :  { %557 = vst.msk [vmem:[#allocation2 + $0x138] sm:$0xf] %vm271_vm0, %v236_v3  ;;  %2311 = vrot.lane.b32.xlu0 %v4711_v21, %s4956_s12  ;;  %v4900_v3 = vld [vmem:[%s8791_s0 + $0xd0] sm:$0xff]   ;;  %v4902_v21 = vld [vmem:[%s8791_s0 + $0xe0] sm:$0xff]   ;;  %v191_v32 = vmax.f32 %v4845_v9, 0.0  ;;  %v4857_v40 = vunpack.c.l.bf16 %v4901_v28  ;;  %v257_v50 = vpack.c.bf16 %v193_v30, %v193_v30 }
  0x8b   :  { %560 = vst.msk [vmem:[#allocation2 + $0x184] sm:$0xf] %vm271_vm0, %v239_v4  ;;  %v4714_v62 = vld [vmem:[#allocation2 + $0xf8] sm:$0xff]  ;;  %v249_v4 = vpack.c.bf16 %v5379_v45, %v5379_v45  ;;  %v253_v16 = vpack.c.bf16 %v5407_v61, %v5407_v61  ;;  %v4853_v25 = vunpack.c.l.bf16 %v4900_v3  ;;  %v4854_v26 = vunpack.c.h.bf16 %v4900_v3 }
  0x8c   :  { %561 = vst.msk [vmem:[#allocation2 + $0x188] sm:$0xf] %vm271_vm0, %v240_v8  ;;  %v4850_v8 = vunpack.c.h.bf16 %v4899_v51  ;;  %v5466_v35 = vrot.slane %v8799_v20, 5  ;;  %v4861_v37 = vunpack.c.l.bf16 %v4902_v21  ;;  %v4862_v38 = vunpack.c.h.bf16 %v4902_v21 }
  0x8d   :  { %562 = vst.msk [vmem:[#allocation2 + $0x198] sm:$0xf] %vm271_vm0, %v241_v22  ;;  %v4716_v22 = vld [vmem:[#allocation2 + $0x120] sm:$0xff]  ;;  %v254_v45 = vpack.c.bf16 %v190_v14, %v190_v14  ;;  %v4904_v14 = vld [vmem:[%s8791_s0 + $0xf0] sm:$0xff]   ;;  %v2361_v21 = vunpack.c.l.b16 %v1478_v12 }
  0x8e   :  { %563 = vst.msk [vmem:[#allocation2 + $0x19c] sm:$0xf] %vm271_vm0, %v242_v23  ;;  %2315 = vrot.lane.b32.xlu2 %v4713_v36, %s4956_s12  ;;  %v4846_v23 = vunpack.c.h.bf16 %v5393_v52  ;;  %v194_v31 = vmax.f32 %v4850_v8, 0.0  ;;  %v1493_v36 = vrot.slane %v8801_v19, 4  ;;  %v195_v52 = vmax.f32 %v4853_v25, 0.0 }
  0x8f   :  { %566 = vst.msk [vmem:[#allocation2 + $0x1c0] sm:$0xf] %vm271_vm0, %v245_v41  ;;  %v4715_v34 = vld [vmem:[#allocation2 + $0x10c] sm:$0xff]  ;;  %v4858_v41 = vunpack.c.h.bf16 %v4901_v28  ;;  %v5506_v25 = vld [vmem:[#allocation2 + $0x8] sm:$0xf] }
  0x90   :  { %567 = vst.msk [vmem:[#allocation2 + $0x1c4] sm:$0xf] %vm271_vm0, %v246_v44  ;;  %2313 = vrot.lane.b32.xlu1 %v4712_v47, %s4956_s12  ;;  %v192_v46 = vmax.f32 %v4846_v23, 0.0  ;;  %v301_v47 = vsel %vm5373_vm3, 0, %v5442_v17  ;;  %v258_v51 = vpack.c.bf16 %v194_v31, %v194_v31  ;;  %v1494_v61 = vor.u32 %v1493_v36, %v5466_v35 }
  0x91   :  { %564 = vst.msk [vmem:[#allocation2 + $0x1ac] sm:$0xf] %vm271_vm0, %v243_v48  ;;  %v4717_v44 = vld [vmem:[#allocation2 + $0x134] sm:$0xff]  ;;  %v4866_v48 = vunpack.c.h.bf16 %v4903_v29  ;;  %v5487_v3 = vmax.f32 %v4858_v41, 0.0  ;;  %v5511_v29 = vld [vmem:[#allocation2 + $0xc] sm:$0xf]  ;;  %v4869_v31 = vunpack.c.l.bf16 %v4904_v14 }
  0x92   :  { %565 = vst.msk [vmem:[#allocation2 + $0x1b0] sm:$0xf] %vm271_vm0, %v244_v53  ;;  %2317 = vrot.lane.b32.xlu0 %v4714_v62, %s4956_s12  ;;  %v196_v53 = vmax.f32 %v4854_v26, 0.0  ;;  %v199_v62 = vmax.f32 %v4861_v37, 0.0  ;;  %v256_v8 = vpack.c.bf16 %v192_v46, %v192_v46  ;;  %v744_v30 = vshrl.u32 %v5506_v25, 16 }
  0x93   :  { %568 = vst.msk [vmem:[#allocation2 + $0x1d4] sm:$0xf] %vm271_vm0, %v247_v56  ;;  %v4721_v56 = vld [vmem:[#allocation2 + $0x184] sm:$0xff]  ;;  %v5493_v9 = vmax.f32 %v4866_v48, 0.0  ;;  %v5515_v24 = vrot.slane %v1494_v61, 4  ;;  %v747_v12 = vshll.u32 %v5506_v25, 16  ;;  %v4870_v37 = vunpack.c.h.bf16 %v4904_v14 }
  0x94   :  { %569 = vst.msk [vmem:[#allocation2 + $0x1d8] sm:$0xf] %vm271_vm0, %v248_v63  ;;  %v5480_v63 = vmax.f32 %v4862_v38, 0.0  ;;  %v260_v23 = vpack.c.bf16 %v196_v53, %v196_v53  ;;  %v263_v27 = vpack.c.bf16 %v199_v62, %v199_v62  ;;  %v1445_v36 = vrot.slane %v744_v30, 4  ;;  %v5543_v48 = vld [vmem:[#allocation2 + $0x1c] sm:$0xf] }
  0x95   :  { %295 = vst [vmem:[#allocation2 + $0x38] sm:$0x1] %v294_v57  ;;  %v255_v57 = vpack.c.bf16 %v191_v32, %v191_v32  ;;  %v4722_v32 = vld [vmem:[#allocation2 + $0x198] sm:$0xff]  ;;  %v1446_v41 = vrot.slane %v747_v12, 5  ;;  %v266_v46 = vpack.c.bf16 %v5493_v9, %v5493_v9  ;;  %v8817_v53 = vshrl.u32 %v5543_v48, 16 }
  0x96   :  { %572 = vst.msk [vmem:[#allocation2 + $0x1fc] sm:$0xf] %vm271_vm0, %v251_v1  ;;  %2321 = vrot.lane.b32.xlu2 %v4716_v22, %s4956_s12  ;;  %v5483_v1 = vrot.slane %v1489_v39, 4  ;;  %v259_v22 = vpack.c.bf16 %v195_v52, %v195_v52  ;;  %v264_v28 = vpack.c.bf16 %v5480_v63, %v5480_v63  ;;  %v753_v39 = vshrl.u32 %v5511_v29, 16  ;;  %v286_v61 = vld [vmem:[#allocation2 + $0x24] sm:$0x1] }
  0x97   :  { %573 = vst.msk [vmem:[#allocation2 + $0x200] sm:$0xf] %vm271_vm0, %v252_v2  ;;  %v5485_v2 = vmax.f32 %v4857_v40, 0.0  ;;  %v756_v40 = vshll.u32 %v5511_v29, 16  ;;  %v1447_v52 = vor.u32 %v1446_v41, %v1445_v36  ;;  %v8815_v62 = vshll.u32 %v5543_v48, 16 }
  0x98   :  { %570 = vst.msk [vmem:[#allocation2 + $0x1e8] sm:$0xf] %vm271_vm0, %v249_v4  ;;  %2319 = vrot.lane.b32.xlu1 %v4715_v34, %s4956_s12  ;;  %v5489_v4 = vmax.f32 %v4865_v43, 0.0  ;;  %v262_v34 = vpack.c.bf16 %v5487_v3, %v5487_v3  ;;  %v4724_v43 = vld [vmem:[#allocation2 + $0x1c0] sm:$0xff] }
  0x99   :  { %571 = vst.msk [vmem:[#allocation2 + $0x1ec] sm:$0xf] %vm271_vm0, %v250_v13  ;;  %v5495_v13 = vld [vmem:[#allocation2 + $0x10] sm:$0x1]  ;;  %v261_v49 = vpack.c.bf16 %v5485_v2, %v5485_v2  ;;  %v1449_v3 = vrot.slane %v756_v40, 5  ;;  %v1448_v9 = vrot.slane %v1447_v52, 4 }
  0x9a   :  { %574 = vst.msk [vmem:[#allocation2 + $0x210] sm:$0xf] %vm271_vm0, %v253_v16  ;;  %2323 = vrot.lane.b32.xlu0 %v4717_v44, %s4956_s12  ;;  %v280_v38 = vsel %vm5373_vm3, 0, %v5495_v13  ;;  %v4723_v17 = vld [vmem:[#allocation2 + $0x1ac] sm:$0xff]  ;;  %v1460_v13 = vrot.slane %v8815_v62, 5 }
  0x9b   :  { %575 = vst.msk [vmem:[#allocation2 + $0x214] sm:$0xf] %vm271_vm0, %v254_v45  ;;  %v265_v45 = vpack.c.bf16 %v5489_v4, %v5489_v4  ;;  %v1451_v4 = vrot.slane %v753_v39, 4  ;;  %v1450_v41 = vsel %vm5403_vm6, %v1448_v9, %v1449_v3  ;;  %v5616_v9 = vld [vmem:[#allocation2 + $0x80] sm:$0xf] }
  0x9c   :  { %v603_v16 = vld [vmem:[#allocation2 + $0x38] sm:$0x1]  ;;  %578 = vst.msk [vmem:[#allocation2 + $0x238] sm:$0xf] %vm271_vm0, %v257_v50  ;;  %v5545_v50 = vld [vmem:[#allocation2 + $0x20] sm:$0xf] }
  0x9d   :  { %v1483_v26 = vshll.u32 %v603_v16, 16  ;;  %579 = vst.msk [vmem:[#allocation2 + $0x23c] sm:$0xf] %vm271_vm0, %v258_v51  ;;  %v8818_v63 = vshrl.u32 %v5545_v50, 16  ;;  %v8816_v2 = vshll.u32 %v5545_v50, 16 }
  0x9e   :  { %576 = vst.msk [vmem:[#allocation2 + $0x224] sm:$0xf] %vm271_vm0, %v255_v57  ;;  %2327 = vrot.lane.b32.xlu2 %v4721_v56, %s4956_s12  ;;  %v5552_v56 = vld [vmem:[#allocation2 + $0x58] sm:$0xf]  ;;  %v204_v57 = vmax.f32 %v4870_v37, 0.0 }
  0x9f   :  { %v1485_v33 = vrot.slane %v1483_v26, 5  ;;  %577 = vst.msk [vmem:[#allocation2 + $0x228] sm:$0xf] %vm271_vm0, %v256_v8  ;;  %v307_v8 = vld [vmem:[#allocation2 + $0x60] sm:$0x1]  ;;  %v1463_v14 = vrot.slane %v8816_v2, 5 }
  0xa0   :  { %580 = vst.msk [vmem:[#allocation2 + $0x24c] sm:$0xf] %vm271_vm0, %v259_v22  ;;  %2325 = vrot.lane.b32.xlu1 %v4720_v7, %s4956_s12  ;;  %v1459_v7 = vrot.slane %v8817_v53, 4  ;;  %v832_v16 = vshrl.u32 %v5552_v56, 16  ;;  %v1465_v22 = vrot.slane %v8818_v63, 4  ;;  %v835_v26 = vshll.u32 %v5552_v56, 16 }
  0xa1   :  { %v1486_v44 = vsel %vm5403_vm6, %v5413_v0, %v1485_v33  ;;  %581 = vst.msk [vmem:[#allocation2 + $0x250] sm:$0xf] %vm271_vm0, %v260_v23  ;;  %v203_v0 = vmax.f32 %v4869_v31, 0.0  ;;  %v5579_v23 = vld [vmem:[#allocation2 + $0x5c] sm:$0xf] }
  0xa2   :  { %v2362_v51 = vunpack.c.l.b16 %v1486_v44  ;;  %302 = vst [vmem:[#allocation2 + $0x4c] sm:$0x1] %v301_v47  ;;  %2329 = vrot.lane.b32.xlu0 %v4722_v32, %s4956_s12  ;;  %v1461_v31 = vor.u32 %v1460_v13, %v1459_v7  ;;  %v841_v32 = vshrl.u32 %v5579_v23, 16  ;;  %v321_v33 = vld [vmem:[#allocation2 + $0x88] sm:$0x1]  ;;  %v844_v36 = vshll.u32 %v5579_v23, 16 }
  0xa3   :  { %584 = vst.msk [vmem:[#allocation2 + $0x274] sm:$0xf] %vm271_vm0, %v263_v27  ;;  %v4725_v27 = vld [vmem:[#allocation2 + $0x1d4] sm:$0xff]  ;;  %v1501_v37 = vrot.slane %v832_v16, 4 }
  0xa4   :  { %v5559_v47 = vpack.c.b16 %v2362_v51, %v2361_v21  ;;  %585 = vst.msk [vmem:[#allocation2 + $0x278] sm:$0xf] %vm271_vm0, %v264_v28  ;;  %v267_v21 = vpack.c.bf16 %v203_v0, %v203_v0  ;;  %v1492_v28 = vsel %vm5403_vm6, %v5483_v1, %v5466_v35  ;;  %v1502_v35 = vrot.slane %v835_v26, 5 }
  0xa5   :  { %582 = vst.msk [vmem:[#allocation2 + $0x260] sm:$0xf] %vm271_vm0, %v261_v49  ;;  %v268_v49 = vpack.c.bf16 %v204_v57, %v204_v57  ;;  %v1462_v44 = vrot.slane %v1461_v31, 4  ;;  %v1466_v51 = vor.u32 %v1465_v22, %v1463_v14  ;;  %v5605_v52 = vrot.slane %v844_v36, 5 }
  0xa6   :  { %4670 = vmatmul.msk.bf16.vlgmr.msra.gmra.mxu1 %vm2881_vm7, %v5559_v47  ;;  %583 = vst.msk [vmem:[#allocation2 + $0x264] sm:$0xf] %vm271_vm0, %v262_v34  ;;  %2333 = vrot.lane.b32.xlu2 %v4724_v43, %s4956_s12  ;;  %v287_v34 = vsel %vm5373_vm3, 0, %v286_v61  ;;  %v1452_v43 = vor.u32 %v1451_v4, %v1449_v3  ;;  %v1507_v0 = vrot.slane %v841_v32, 4  ;;  %v1503_v61 = vor.u32 %v1502_v35, %v1501_v37  ;;  %v314_v3 = vld [vmem:[#allocation2 + $0x74] sm:$0x1] }
  0xa7   :  { %586 = vst.msk [vmem:[#allocation2 + $0x288] sm:$0xf] %vm271_vm0, %v265_v45  ;;  %v308_v45 = vsel %vm5373_vm3, 0, %v307_v8  ;;  %v1464_v57 = vsel %vm5403_vm6, %v1462_v44, %v1463_v14  ;;  %v4726_v4 = vld [vmem:[#allocation2 + $0x1e8] sm:$0xff]  ;;  %v2363_v13 = vunpack.c.l.b16 %v1492_v28  ;;  %v5618_v22 = vunpack.c.l.b16 %v1450_v41  ;;  %v4728_v37 = vld [vmem:[#allocation2 + $0x210] sm:$0xff] }
  0xa8   :  { %587 = vst.msk [vmem:[#allocation2 + $0x28c] sm:$0xf] %vm271_vm0, %v266_v46  ;;  %2331 = vrot.lane.b32.xlu1 %v4723_v17, %s4956_s12  ;;  %v322_v17 = vsel %vm5373_vm3, 0, %v321_v33  ;;  %v1508_v8 = vor.u32 %v1507_v0, %v5605_v52  ;;  %v8798_v14 = vshrl.u32 %v5616_v9, 16  ;;  %v5626_v31 = vrot.slane %v1466_v51, 4  ;;  %v4729_v18 = vld [vmem:[#allocation2 + $0x224] sm:$0xff] }
  0xa9   :  { %v607_v1 = vld [vmem:[#allocation2 + $0x4c] sm:$0x1]  ;;  %281 = vst [vmem:[#allocation2 + $0x10] sm:$0x1] %v280_v38  ;;  %v4727_v38 = vld [vmem:[#allocation2 + $0x1fc] sm:$0xff]  ;;  %v5628_v33 = vunpack.c.l.b16 %v1464_v57  ;;  %v315_v0 = vsel %vm5373_vm3, 0, %v314_v3 }
  0xaa   :  { %v1497_v46 = vshll.u32 %v607_v1, 16  ;;  %588 = vst.msk [vmem:[#allocation2 + $0x29c] sm:$0xf] %vm271_vm0, %v267_v21  ;;  %2335 = vrot.lane.b32.xlu0 %v4725_v27, %s4956_s12  ;;  %v1453_v21 = vrot.slane %v1452_v43, 4  ;;  %v5620_v27 = vld [vmem:[#allocation2 + $0x84] sm:$0xf] }
  0xab   :  { %589 = vst.msk [vmem:[#allocation2 + $0x2a0] sm:$0xf] %vm271_vm0, %v268_v49  ;;  %v5631_v28 = vld [vmem:[#allocation2 + $0x6c] sm:$0xf]  ;;  %v1504_v1 = vrot.slane %v1503_v61, 4  ;;  %v8797_v41 = vshrl.u32 %v5620_v27, 16 }
  0xac   :  { %v1499_v7 = vrot.slane %v1497_v46, 5  ;;  %288 = vst [vmem:[#allocation2 + $0x24] sm:$0x1] %v287_v34  ;;  %v8795_v34 = vshll.u32 %v5616_v9, 16  ;;  %v8796_v43 = vshll.u32 %v5620_v27, 16  ;;  %v1529_v46 = vrot.slane %v8798_v14, 4 }
  0xad   :  { %309 = vst [vmem:[#allocation2 + $0x60] sm:$0x1] %v308_v45  ;;  %v5636_v44 = vld [vmem:[#allocation2 + $0x70] sm:$0xf]  ;;  %v5638_v45 = vrot.slane %v1508_v8, 4  ;;  %v1535_v61 = vrot.slane %v8797_v41, 4 }
  0xae   :  { %v1500_v49 = vsel %vm5403_vm6, %v5515_v24, %v1499_v7  ;;  %323 = vst [vmem:[#allocation2 + $0x88] sm:$0x1] %v322_v17  ;;  %2339 = vrot.lane.b32.xlu2 %v4727_v38, %s4956_s12  ;;  %v1530_v51 = vrot.slane %v8795_v34, 5  ;;  %v1533_v57 = vrot.slane %v8796_v43, 5  ;;  %v854_v17 = vshrl.u32 %v5631_v28, 16  ;;  %v4730_v7 = vld [vmem:[#allocation2 + $0x238] sm:$0xff] }
  0xaf   :  { %v2364_v35 = vunpack.c.l.b16 %v1500_v49  ;;  %316 = vst [vmem:[#allocation2 + $0x74] sm:$0x1] %v315_v0  ;;  %v857_v34 = vshll.u32 %v5631_v28, 16  ;;  %v863_v3 = vshrl.u32 %v5636_v44, 16  ;;  %v1506_v43 = vsel %vm5403_vm6, %v1504_v1, %v5605_v52  ;;  %v608_v41 = vld [vmem:[#allocation2 + $0x54] sm:$0xf] }
  0xb0   :  { %v595_v24 = vld [vmem:[#allocation2 + $0x10] sm:$0x1]  ;;  %2337 = vrot.lane.b32.xlu1 %v4726_v4, %s4956_s12  ;;  %v1531_v49 = vor.u32 %v1530_v51, %v1529_v46  ;;  %v843_v0 = vrot.slane %v841_v32, 7  ;;  %v1536_v14 = vor.u32 %v1535_v61, %v1533_v57  ;;  %v827_v46 = vshrl.u32 %v608_v41, 16 }
  0xb1   :  { %v1455_v38 = vshll.u32 %v595_v24, 16  ;;  %v5652_v8 = vpack.c.b16 %v2364_v35, %v2363_v13  ;;  %v834_v51 = vrot.slane %v832_v16, 7  ;;  %v866_v19 = vshll.u32 %v5636_v44, 16  ;;  %v4731_v23 = vld [vmem:[#allocation2 + $0x24c] sm:$0xff] }
  0xb2   :  { %2341 = vrot.lane.b32.xlu0 %v4728_v37, %s4956_s12  ;;  %v1532_v20 = vrot.slane %v1531_v49, 4  ;;  %v846_v52 = vor.u32 %v844_v36, %v843_v0  ;;  %v4458_v61 = vrot.slane %v827_v46, 11 }
  0xb3   :  { %v1457_v4 = vrot.slane %v1455_v38, 5  ;;  %v599_v24 = vld [vmem:[#allocation2 + $0x24] sm:$0x1]  ;;  %v837_v16 = vor.u32 %v835_v26, %v834_v51  ;;  %v839_v49 = vrot.slane %v834_v51, 4  ;;  %v2365_v26 = vunpack.c.l.b16 %v1506_v43 }
  0xb4   :  { %v1469_v13 = vshll.u32 %v599_v24, 16  ;;  %v611_v35 = vld [vmem:[#allocation2 + $0x60] sm:$0x1] }
  0xb5   :  { %v1458_v37 = vsel %vm5403_vm6, %v1453_v21, %v1457_v4  ;;  %v1511_v38 = vshll.u32 %v611_v35, 16  ;;  %v619_v1 = vld [vmem:[#allocation2 + $0x88] sm:$0x1]  ;;  %v1534_v4 = vsel %vm5403_vm6, %v1532_v20, %v1533_v57  ;;  %v838_v0 = vsel %vm5677_vm9, %v4458_v61, %v837_v16  ;;  %v5708_v61 = vld [vmem:[#allocation2 + $0x98] sm:$0xf] }
  0xb6   :  { %4671 = vmatmul.msk.bf16.gmra.mxu1 %vm2881_vm7, %v5652_v8  ;;  %v5671_v32 = vunpack.c.l.b16 %v1458_v37  ;;  %v1471_v41 = vrot.slane %v1469_v13, 5  ;;  %2345 = vrot.lane.b32.xlu2 %v4730_v7, %s4956_s12  ;;  %v1539_v24 = vshll.u32 %v619_v1, 16  ;;  %v1537_v13 = vrot.slane %v1536_v14, 4  ;;  %v615_v46 = vld [vmem:[#allocation2 + $0x74] sm:$0x1]  ;;  %8935 = vst [vmem:[#allocation3_spill] sm:$0xff] %v5708_v61 }
  0xb7   :  { %v1513_v36 = vrot.slane %v1511_v38, 5  ;;  %v847_v20 = vsel %vm5677_vm9, %v839_v49, %v846_v52  ;;  %v2045_v57 = vunpack.c.l.b16 %v838_v0  ;;  %v2369_v51 = vunpack.c.l.b16 %v1534_v4  ;;  %v328_v37 = vld [vmem:[#allocation2 + $0x9c] sm:$0x1]  ;;  %v4733_v38 = vld [vmem:[#allocation2 + $0x274] sm:$0xff]  ;;  %v4732_v4 = vld [vmem:[#allocation2 + $0x260] sm:$0xff] }
  0xb8   :  { %v1472_v56 = vsel %vm5403_vm6, %v5626_v31, %v1471_v41  ;;  %2343 = vrot.lane.b32.xlu1 %v4729_v18, %s4956_s12  ;;  %v2421_v7 = vpack.c.b16 %v5671_v32, %v5618_v22  ;;  %v2046_v31 = vunpack.c.l.b16 %v847_v20  ;;  %v1541_v43 = vrot.slane %v1539_v24, 5  ;;  %v5699_v18 = vld [vmem:[#allocation2 + $0x94] sm:$0xf] }
  0xb9   :  { %v1514_v35 = vsel %vm5403_vm6, %v5638_v45, %v1513_v36  ;;  %v1515_v14 = vrot.slane %v854_v17, 4  ;;  %v2360_v1 = vunpack.c.l.b16 %v1472_v56  ;;  %v1516_v45 = vrot.slane %v857_v34, 5 }
  0xba   :  { %2347 = vrot.lane.b32.xlu0 %v4731_v23, %s4956_s12  ;;  %v1519_v52 = vrot.slane %v866_v19, 5  ;;  %v1521_v41 = vrot.slane %v863_v3, 4  ;;  %v2366_v16 = vunpack.c.l.b16 %v1514_v35  ;;  %v5710_v36 = vpack.c.b16 %v2046_v31, %v2045_v57 }
  0xbb   :  { %v1542_v49 = vsel %vm5403_vm6, %v1537_v13, %v1541_v43  ;;  %v1525_v23 = vshll.u32 %v615_v46, 16  ;;  %v1517_v56 = vor.u32 %v1516_v45, %v1515_v14  ;;  %v329_v20 = vsel %vm5373_vm3, 0, %v328_v37  ;;  %v4734_v13 = vld [vmem:[#allocation2 + $0x288] sm:$0xff] }
  0xbc   :  { %v2370_v24 = vunpack.c.l.b16 %v1542_v49  ;;  %v1522_v0 = vor.u32 %v1521_v41, %v1519_v52  ;;  %330 = vst [vmem:[#allocation2 + $0x9c] sm:$0x1] %v329_v20  ;;  %v8808_v6 = vshrl.u32 %v5699_v18, 16  ;;  %v8806_v35 = vshll.u32 %v5699_v18, 16 }
  0xbd   :  { %v1527_v60 = vrot.slane %v1525_v23, 5  ;;  %v8807_v57 = vshrl.u32 %v5708_v61, 16  ;;  %v5721_v46 = vpack.c.b16 %v2360_v1, %v5628_v33  ;;  %v1518_v31 = vrot.slane %v1517_v56, 4  ;;  %v342_v56 = vld [vmem:[#allocation2 + $0xc4] sm:$0x1] }
  0xbe   :  { %2351 = vrot.lane.b32.xlu2 %v4733_v38, %s4956_s12  ;;  %v1523_v43 = vrot.slane %v1522_v0, 4  ;;  %v8805_v14 = vshll.u32 %v5708_v61, 16  ;;  %v1543_v37 = vrot.slane %v8808_v6, 4  ;;  %v1544_v45 = vrot.slane %v8806_v35, 5  ;;  %v5739_v0 = vld [vmem:[#allocation2 + $0xbc] sm:$0xf] }
  0xbf   :  { %v1549_v41 = vrot.slane %v8807_v57, 4  ;;  %v849_v49 = vshrl.u32 %v612_v15, 16  ;;  %v5731_v38 = vpack.c.b16 %v2366_v16, %v2365_v26  ;;  %v1520_v33 = vsel %vm5403_vm6, %v1518_v31, %v1519_v52  ;;  %v5797_v57 = vld [vmem:[#allocation2 + $0xd0] sm:$0xf]  ;;  %v5799_v6 = vld [vmem:[#allocation2 + $0xd4] sm:$0xf] }
  0xc0   :  { %2349 = vrot.lane.b32.xlu1 %v4732_v4, %s4956_s12  ;;  %v1547_v1 = vrot.slane %v8805_v14, 5  ;;  %v856_v23 = vrot.slane %v854_v17, 7  ;;  %v5741_v20 = vpack.c.b16 %v2370_v24, %v2369_v51  ;;  %v1528_v15 = vsel %vm5403_vm6, %v1523_v43, %v1527_v60  ;;  %v5750_v14 = vld [vmem:[#allocation2 + $0xc0] sm:$0xf]  ;;  %v335_v43 = vld [vmem:[#allocation2 + $0xb0] sm:$0x1] }
  0xc1   :  { %v1545_v4 = vor.u32 %v1544_v45, %v1543_v37  ;;  %v4459_v26 = vrot.slane %v849_v49, 11  ;;  %v865_v17 = vrot.slane %v863_v3, 7  ;;  %v2367_v35 = vunpack.c.l.b16 %v1520_v33  ;;  %v4735_v37 = vld [vmem:[#allocation2 + $0x29c] sm:$0xff]  ;;  %v600_v61 = vld [vmem:[#allocation2 + $0x2c] sm:$0xf] }
  0xc2   :  { %8936 = vst [vmem:[#allocation4_spill] sm:$0xff] %v5741_v20  ;;  %2353 = vrot.lane.b32.xlu0 %v4734_v13, %s4956_s12  ;;  %v1550_v16 = vor.u32 %v1549_v41, %v1547_v1  ;;  %v859_v52 = vor.u32 %v857_v34, %v856_v23  ;;  %v861_v31 = vrot.slane %v856_v23, 4  ;;  %v343_v24 = vsel %vm5373_vm3, 0, %v342_v56  ;;  %v5763_v56 = vld [vmem:[#allocation2 + $0xa8] sm:$0xf] }
  0xc3   :  { %v1546_v51 = vrot.slane %v1545_v4, 4  ;;  %v8812_v60 = vshrl.u32 %v5739_v0, 16  ;;  %v2368_v13 = vunpack.c.l.b16 %v1528_v15  ;;  %v623_v45 = vld [vmem:[#allocation2 + $0x9c] sm:$0x1]  ;;  %v868_v28 = vor.u32 %v866_v19, %v865_v17  ;;  %344 = vst [vmem:[#allocation2 + $0xc4] sm:$0x1] %v343_v24 }
  0xc4   :  { %v860_v34 = vsel %vm5677_vm9, %v4459_v26, %v859_v52  ;;  %v8810_v3 = vshll.u32 %v5739_v0, 16  ;;  %v1551_v41 = vrot.slane %v1550_v16, 4  ;;  %v1553_v49 = vshll.u32 %v623_v45, 16  ;;  %v5776_v26 = vld [vmem:[#allocation2 + $0xac] sm:$0xf] }
  0xc5   :  { %v2047_v33 = vunpack.c.l.b16 %v860_v34  ;;  %v8811_v23 = vshrl.u32 %v5750_v14, 16  ;;  %v1548_v19 = vsel %vm5403_vm6, %v1546_v51, %v1547_v1  ;;  %v869_v44 = vsel %vm5677_vm9, %v861_v31, %v868_v28  ;;  %v349_v51 = vld [vmem:[#allocation2 + $0xd8] sm:$0x1] }
  0xc6   :  { %4672 = vmatmul.msk.bf16.gmra.mxu1 %vm2881_vm7, %v5731_v38  ;;  %2453 = vrot.lane.b32.xlu2 %v2421_v7, %s4957_s23  ;;  %v8809_v15 = vshll.u32 %v5750_v14, 16  ;;  %v1571_v4 = vrot.slane %v8812_v60, 4  ;;  %v1555_v16 = vrot.slane %v1553_v49, 5  ;;  %v2048_v52 = vunpack.c.l.b16 %v869_v44 }
  0xc7   :  { %v1572_v17 = vrot.slane %v8810_v3, 5  ;;  %v1577_v22 = vrot.slane %v8811_v23, 4  ;;  %v336_v7 = vsel %vm5373_vm3, 0, %v335_v43  ;;  %v920_v1 = vshrl.u32 %v5763_v56, 16 }
  0xc8   :  { %2355 = vrot.lane.b32.xlu1 %v4735_v37, %s4956_s12  ;;  %v1575_v32 = vrot.slane %v8809_v15, 5  ;;  %v923_v31 = vshll.u32 %v5763_v56, 16  ;;  %v1556_v24 = vsel %vm5403_vm6, %v1551_v41, %v1555_v16  ;;  %v5791_v45 = vpack.c.b16 %v2048_v52, %v2047_v33  ;;  %337 = vst [vmem:[#allocation2 + $0xb0] sm:$0x1] %v336_v7  ;;  %s4958_s12 = smov 64  }
  0xc9   :  { %v1573_v34 = vor.u32 %v1572_v17, %v1571_v4  ;;  %v929_v37 = vshrl.u32 %v5776_v26, 16  ;;  %v2371_v28 = vunpack.c.l.b16 %v1548_v19  ;;  %v932_v43 = vshll.u32 %v5776_v26, 16 }
  0xca   :  { %2455 = vrot.lane.b32.xlu0 %v5721_v46, %s4957_s23  ;;  %v1578_v49 = vor.u32 %v1577_v22, %v1575_v32  ;;  %v1557_v44 = vrot.slane %v920_v1, 4  ;;  %v631_v15 = vld [vmem:[#allocation2 + $0xc4] sm:$0x1]  ;;  %v1558_v33 = vrot.slane %v923_v31, 5  ;;  %v350_v16 = vsel %vm5373_vm3, 0, %v349_v51 }
  0xcb   :  { %v1574_v41 = vrot.slane %v1573_v34, 4  ;;  %v1563_v4 = vrot.slane %v929_v37, 4  ;;  %v2372_v52 = vunpack.c.l.b16 %v1556_v24  ;;  %v1581_v19 = vshll.u32 %v631_v15, 16  ;;  %351 = vst [vmem:[#allocation2 + $0xd8] sm:$0x1] %v350_v16 }
  0xcc   :  { %v1579_v17 = vrot.slane %v1578_v49, 4  ;;  %v1561_v22 = vrot.slane %v932_v43, 5  ;;  %v5805_v26 = vpack.c.b16 %v2368_v13, %v2367_v35  ;;  %v1559_v7 = vor.u32 %v1558_v33, %v1557_v44  ;;  %v624_v34 = vld [vmem:[#allocation2 + $0xa4] sm:$0xf] }
  0xcd   :  { %v8813_v3 = vshrl.u32 %v5797_v57, 16  ;;  %v8814_v23 = vshll.u32 %v5797_v57, 16  ;;  %v1576_v60 = vsel %vm5403_vm6, %v1574_v41, %v1575_v32  ;;  %v1583_v51 = vrot.slane %v1581_v19, 5 }
  0xce   :  { %2459 = vrot.lane.b32.xlu2 %v5652_v8, %s4957_s23  ;;  %v1564_v24 = vor.u32 %v1563_v4, %v1561_v22  ;;  %v8819_v15 = vshrl.u32 %v5799_v6, 16  ;;  %v1560_v49 = vrot.slane %v1559_v7, 4  ;;  %v8826_v35 = vshll.u32 %v5799_v6, 16 }
  0xcf   :  { %v1585_v13 = vrot.slane %v8813_v3, 4  ;;  %v1586_v44 = vrot.slane %v8814_v23, 5  ;;  %v5823_v16 = vpack.c.b16 %v2372_v52, %v2371_v28  ;;  %v1584_v32 = vsel %vm5403_vm6, %v1579_v17, %v1583_v51  ;;  %v627_v41 = vld [vmem:[#allocation2 + $0xb0] sm:$0x1] }
  0xd0   :  { %2457 = vrot.lane.b32.xlu1 %v5559_v47, %s4957_s23  ;;  %v5821_v33 = vpop.permute.xlu2 %2301  ;;  %v1591_v4 = vrot.slane %v8819_v15, 4  ;;  %v915_v19 = vshrl.u32 %v624_v34, 16  ;;  %v2375_v7 = vunpack.c.l.b16 %v1576_v60  ;;  %v1562_v3 = vsel %vm5403_vm6, %v1560_v49, %v1561_v22 }
  0xd1   :  { %8937 = vst [vmem:[#allocation5_spill] sm:$0xff] %v5821_v33  ;;  %v1565_v23 = vrot.slane %v1564_v24, 4  ;;  %v1567_v62 = vshll.u32 %v627_v41, 16  ;;  %v2376_v2 = vunpack.c.l.b16 %v1584_v32  ;;  %v2373_v28 = vunpack.c.l.b16 %v1562_v3 }
  0xd2   :  { %2461 = vrot.lane.b32.xlu0 %v5731_v38, %s4957_s23  ;;  %v1587_v52 = vor.u32 %v1586_v44, %v1585_v13  ;;  %v1589_v17 = vrot.slane %v8826_v35, 5  ;;  %v635_v53 = vld [vmem:[#allocation2 + $0xd8] sm:$0x1]  ;;  %v4462_v63 = vrot.slane %v915_v19, 11  ;;  %v922_v15 = vrot.slane %v920_v1, 7 }
  0xd3   :  { %v1569_v51 = vrot.slane %v1567_v62, 5  ;;  %v931_v34 = vrot.slane %v929_v37, 7  ;;  %v1595_v5 = vshll.u32 %v635_v53, 16  ;;  %v755_v22 = vrot.slane %v753_v39, 7  ;;  %v592_v13 = vld [vmem:[#allocation2 + $0x4] sm:$0xf] }
  0xd4   :  { %v1588_v60 = vrot.slane %v1587_v52, 4  ;;  %v1592_v59 = vor.u32 %v1591_v4, %v1589_v17  ;;  %v925_v24 = vor.u32 %v923_v31, %v922_v15  ;;  %v927_v62 = vrot.slane %v922_v15, 4  ;;  %v363_v31 = vld [vmem:[#allocation2 + $0x100] sm:$0x1]  ;;  %v5867_v52 = vld [vmem:[#allocation2 + $0xfc] sm:$0xf] }
  0xd5   :  { %v1570_v3 = vsel %vm5403_vm6, %v1565_v23, %v1569_v51  ;;  %v934_v49 = vor.u32 %v932_v43, %v931_v34  ;;  %v1597_v39 = vrot.slane %v1595_v5, 5  ;;  %v758_v56 = vor.u32 %v756_v40, %v755_v22  ;;  %v5853_v43 = vld [vmem:[#allocation2 + $0xf8] sm:$0xf]  ;;  %v5877_v34 = vld [vmem:[#allocation2 + $0xe4] sm:$0xf] }
  0xd6   :  { %4673 = vmatmul.msk.bf16.gmra.mxu1 %vm2881_vm7, %v5805_v26  ;;  %2465 = vrot.lane.b32.xlu2 %v5741_v20, %s4957_s23  ;;  %v2374_v1 = vunpack.c.l.b16 %v1570_v3  ;;  %v1590_v53 = vsel %vm5403_vm6, %v1588_v60, %v1589_v17  ;;  %v1593_v37 = vrot.slane %v1592_v59, 4  ;;  %v926_v32 = vsel %vm5677_vm9, %v4462_v63, %v925_v24  ;;  %v356_v17 = vld [vmem:[#allocation2 + $0xec] sm:$0x1] }
  0xd7   :  { %v2377_v44 = vunpack.c.l.b16 %v1590_v53  ;;  %v935_v23 = vsel %vm5677_vm9, %v927_v62, %v934_v49  ;;  %v5859_v59 = vpack.c.b16 %v2376_v2, %v2375_v7  ;;  %v2053_v63 = vunpack.c.l.b16 %v926_v32  ;;  %v5889_v53 = vld [vmem:[#allocation2 + $0xe8] sm:$0xf] }
  0xd8   :  { %2463 = vrot.lane.b32.xlu1 %v5805_v26, %s4957_s23  ;;  %v5857_v15 = vpop.permute.xlu2 %2303  ;;  %v1598_v5 = vsel %vm5403_vm6, %v1593_v37, %v1597_v39  ;;  %v2054_v41 = vunpack.c.l.b16 %v935_v23  ;;  %v5863_v4 = vpack.c.b16 %v2374_v1, %v2373_v28  ;;  %v739_v29 = vshrl.u32 %v592_v13, 16  ;;  %v370_v13 = vld [vmem:[#allocation2 + $0x114] sm:$0x1] }
  0xd9   :  { %8938 = vst [vmem:[#allocation6_spill] sm:$0xff] %v5857_v15  ;;  %v2378_v19 = vunpack.c.l.b16 %v1598_v5  ;;  %v746_v40 = vrot.slane %v744_v30, 7  ;;  %v364_v7 = vsel %vm5373_vm3, 0, %v363_v31  ;;  %v8825_v51 = vshrl.u32 %v5853_v43, 16 }
  0xda   :  { %2467 = vrot.lane.b32.xlu0 %v5823_v16, %s4957_s23  ;;  %v5871_v2 = vpack.c.b16 %v2054_v41, %v2053_v63  ;;  %v8823_v28 = vshll.u32 %v5853_v43, 16  ;;  %v4454_v30 = vrot.slane %v739_v29, 11  ;;  %365 = vst [vmem:[#allocation2 + $0x100] sm:$0x1] %v364_v7  ;;  %v8824_v24 = vshrl.u32 %v5867_v52, 16 }
  0xdb   :  { %v5879_v60 = vpack.c.b16 %v2378_v19, %v2377_v44  ;;  %v749_v22 = vor.u32 %v747_v12, %v746_v40  ;;  %v751_v3 = vrot.slane %v746_v40, 4  ;;  %v8822_v62 = vshll.u32 %v5867_v52, 16  ;;  %v5907_v19 = vld [vmem:[#allocation2 + $0x10c] sm:$0xf] }
  0xdc   :  { %8939 = vst [vmem:[#allocation7_spill] sm:$0xff] %v5871_v2  ;;  %v1613_v49 = vrot.slane %v8825_v51, 4  ;;  %v1614_v1 = vrot.slane %v8823_v28, 5  ;;  %v357_v12 = vsel %vm5373_vm3, 0, %v356_v17  ;;  %v986_v39 = vshrl.u32 %v5877_v34, 16 }
  0xdd   :  { %v750_v37 = vsel %vm5677_vm9, %v4454_v30, %v749_v22  ;;  %v759_v25 = vsel %vm5677_vm9, %v751_v3, %v758_v56  ;;  %v1617_v31 = vrot.slane %v8822_v62, 5  ;;  %358 = vst [vmem:[#allocation2 + $0xec] sm:$0x1] %v357_v12  ;;  %v1619_v5 = vrot.slane %v8824_v24, 4 }
  0xde   :  { %2471 = vrot.lane.b32.xlu2 %v5859_v59, %s4957_s23  ;;  %v2037_v44 = vunpack.c.l.b16 %v750_v37  ;;  %v2038_v32 = vunpack.c.l.b16 %v759_v25  ;;  %v1615_v23 = vor.u32 %v1614_v1, %v1613_v49  ;;  %v989_v56 = vshll.u32 %v5877_v34, 16  ;;  %v5919_v49 = vld [vmem:[#allocation2 + $0x110] sm:$0xf]  ;;  %v5923_v1 = vpop.permute.xlu0 %2293 }
  0xdf   :  { %v995_v63 = vshrl.u32 %v5889_v53, 16  ;;  %v8827_v41 = vshll.u32 %v5889_v53, 16  ;;  %v1599_v7 = vrot.slane %v986_v39, 4  ;;  %v371_v30 = vsel %vm5373_vm3, 0, %v370_v13 }
  0xe0   :  { %2469 = vrot.lane.b32.xlu1 %v5863_v4, %s4957_s23  ;;  %v5911_v29 = vpop.permute.xlu2 %2309  ;;  %v5913_v40 = vpack.c.b16 %v2038_v32, %v2037_v44  ;;  %v1616_v17 = vrot.slane %v1615_v23, 4  ;;  %v1620_v22 = vor.u32 %v1619_v5, %v1617_v31  ;;  %v1600_v34 = vrot.slane %v989_v56, 5  ;;  %372 = vst [vmem:[#allocation2 + $0x114] sm:$0x1] %v371_v30  ;;  %v636_v44 = vld [vmem:[#allocation2 + $0xe0] sm:$0xf] }
  0xe1   :  { %8940 = vst [vmem:[#allocation8_spill] sm:$0xff] %v5911_v29  ;;  %v1603_v3 = vrot.slane %v8827_v41, 5  ;;  %v643_v37 = vld [vmem:[#allocation2 + $0x100] sm:$0x1]  ;;  %v1605_v12 = vrot.slane %v995_v63, 4  ;;  %v8828_v13 = vshrl.u32 %v5907_v19, 16 }
  0xe2   :  { %2473 = vrot.lane.b32.xlu0 %v5879_v60, %s4957_s23  ;;  %v1618_v25 = vsel %vm5403_vm6, %v1616_v17, %v1617_v31  ;;  %v1621_v32 = vrot.slane %v1620_v22, 4  ;;  %v1623_v23 = vshll.u32 %v643_v37, 16  ;;  %v1601_v62 = vor.u32 %v1600_v34, %v1599_v7 }
  0xe3   :  { %v2381_v5 = vunpack.c.l.b16 %v1618_v25  ;;  %v1606_v30 = vor.u32 %v1605_v12, %v1603_v3  ;;  %v8829_v28 = vshll.u32 %v5907_v19, 16  ;;  %v8835_v24 = vshrl.u32 %v5919_v49, 16 }
  0xe4   :  { %v8832_v51 = vshll.u32 %v5919_v49, 16  ;;  %v1625_v35 = vrot.slane %v1623_v23, 5  ;;  %v639_v41 = vld [vmem:[#allocation2 + $0xec] sm:$0x1]  ;;  %v1602_v29 = vrot.slane %v1601_v62, 4  ;;  %v1627_v31 = vrot.slane %v8828_v13, 4 }
  0xe5   :  { %v981_v17 = vshrl.u32 %v636_v44, 16  ;;  %v1607_v22 = vrot.slane %v1606_v30, 4  ;;  %v1609_v37 = vshll.u32 %v639_v41, 16  ;;  %v1628_v7 = vrot.slane %v8829_v28, 5 }
  0xe6   :  { %4674 = vmatmul.msk.bf16.gmra.mxu1 %vm2881_vm7, %v5741_v20  ;;  %v1631_v34 = vrot.slane %v8832_v51, 5  ;;  %v1626_v25 = vsel %vm5403_vm6, %v1621_v32, %v1625_v35  ;;  %v1604_v62 = vsel %vm5403_vm6, %v1602_v29, %v1603_v3  ;;  %v1633_v12 = vrot.slane %v8835_v24, 4 }
  0xe7   :  { %v4465_v44 = vrot.slane %v981_v17, 11  ;;  %v2382_v23 = vunpack.c.l.b16 %v1626_v25  ;;  %v1611_v13 = vrot.slane %v1609_v37, 5  ;;  %v2379_v30 = vunpack.c.l.b16 %v1604_v62  ;;  %v647_v41 = vld [vmem:[#allocation2 + $0x114] sm:$0x1] }
  0xe8   :  { %v1629_v15 = vor.u32 %v1628_v7, %v1627_v31  ;;  %v1634_v33 = vor.u32 %v1633_v12, %v1631_v34  ;;  %v1637_v28 = vshll.u32 %v647_v41, 16  ;;  %v988_v2 = vrot.slane %v986_v39, 7  ;;  %v5945_v51 = vpop.permute.xlu2 %2315  ;;  %v596_v12 = vld [vmem:[#allocation2 + $0x18] sm:$0xf] }
  0xe9   :  { %v997_v20 = vrot.slane %v995_v63, 7  ;;  %8941 = vst [vmem:[#allocation9_spill] sm:$0xff] %v5945_v51  ;;  %v5947_v35 = vpack.c.b16 %v2382_v23, %v2381_v5  ;;  %v1612_v29 = vsel %vm5403_vm6, %v1607_v22, %v1611_v13  ;;  %v8943_v5 = vshll.u32 %v5889_v53, 16  ;;  %v648_v22 = vld [vmem:[#allocation2 + $0x11c] sm:$0xf] }
  0xea   :  { %v1630_v3 = vrot.slane %v1629_v15, 4  ;;  %v5951_v32 = vpop.permute.xlu1 %2297  ;;  %v2380_v17 = vunpack.c.l.b16 %v1612_v29  ;;  %v1635_v37 = vrot.slane %v1634_v33, 4  ;;  %v1639_v25 = vrot.slane %v1637_v28, 5 }
  0xeb   :  { %8942 = vst [vmem:[#allocation10_spill] sm:$0xff] %v5947_v35  ;;  %v991_v62 = vor.u32 %v989_v56, %v988_v2  ;;  %2477 = vrot.lane.b32.xlu2 %v5947_v35, %s4957_s23  ;;  %v993_v63 = vrot.slane %v988_v2, 4  ;;  %v1000_v31 = vor.u32 %v8943_v5, %v997_v20  ;;  %v783_v7 = vshrl.u32 %v600_v61, 16 }
  0xec   :  { %v1632_v39 = vsel %vm5403_vm6, %v1630_v3, %v1631_v34  ;;  %v5959_v13 = vpop.permute.xlu0 %2295  ;;  %v5961_v15 = vpack.c.b16 %v2380_v17, %v2379_v30  ;;  %v1640_v33 = vsel %vm5403_vm6, %v1635_v37, %v1639_v25  ;;  %v8945_v61 = vshrl.u32 %v5290_v55, 16 }
  0xed   :  { %v2383_v28 = vunpack.c.l.b16 %v1632_v39  ;;  %v992_v56 = vsel %vm5677_vm9, %v4465_v44, %v991_v62  ;;  %v2384_v23 = vunpack.c.l.b16 %v1640_v33  ;;  %v1001_v2 = vsel %vm5677_vm9, %v993_v63, %v1000_v31  ;;  %v5981_v62 = vld [vmem:[#allocation2 + $0x120] sm:$0xf] }
  0xee   :  { %8944 = vst [vmem:[#allocation11_spill] sm:$0xff] %v5961_v15  ;;  %v2059_v53 = vunpack.c.l.b16 %v992_v56  ;;  %v799_v20 = vrot.slane %v8945_v61, 7  ;;  %2475 = vrot.lane.b32.xlu1 %v5961_v15, %s4957_s23  ;;  %v2060_v34 = vunpack.c.l.b16 %v1001_v2  ;;  %v8946_v30 = vshrl.u32 %v5288_v54, 16 }
  0xef   :  { %v761_v29 = vshrl.u32 %v596_v12, 16  ;;  %v8947_v3 = vshrl.u32 %v5545_v50, 16  ;;  %v5977_v17 = vpack.c.b16 %v2384_v23, %v2383_v28  ;;  %v8949_v37 = vshrl.u32 %v5543_v48, 16 }
  0xf0   :  { %v790_v41 = vrot.slane %v8946_v30, 7  ;;  %v1047_v39 = vshrl.u32 %v648_v22, 16  ;;  %v5983_v63 = vpack.c.b16 %v2060_v34, %v2059_v53  ;;  %v4456_v31 = vrot.slane %v783_v7, 11  ;;  %v5995_v34 = vld [vmem:[#allocation2 + $0x124] sm:$0xf]  ;;  %v4925_v7 = vld [vmem:[#allocation2 + $0x1c] sm:$0xff] }
  0xf1   :  { %v777_v44 = vrot.slane %v8947_v3, 7  ;;  %8948 = vst [vmem:[#allocation12_spill] sm:$0xff] %v5977_v17  ;;  %v768_v25 = vrot.slane %v8949_v37, 7  ;;  %v4455_v5 = vrot.slane %v761_v29, 11  ;;  %2479 = vrot.lane.b32.xlu0 %v5977_v17, %s4957_s23  ;;  %v8950_v12 = vshll.u32 %v5545_v50, 16  ;;  %v5998_v3 = vpop.permute.xlu2 %2321 }
  0xf2   :  { %v8951_v56 = vshll.u32 %v5543_v48, 16  ;;  %v8952_v2 = vshll.u32 %v5290_v55, 16  ;;  %v8953_v30 = vshll.u32 %v5288_v54, 16  ;;  %v795_v53 = vrot.slane %v790_v41, 4  ;;  %8954 = vst [vmem:[#allocation13_spill] sm:$0xff] %v5998_v3  ;;  %v6005_v54 = vpop.permute.xlu1 %2299 }
  0xf3   :  { %v780_v33 = vor.u32 %v8950_v12, %v777_v44  ;;  %v773_v23 = vrot.slane %v768_v25, 4  ;;  %v8839_v29 = vshrl.u32 %v5981_v62, 16  ;;  %2597 = vrot.lane.b32.xlu2 %v4925_v7, %s4958_s12  ;;  %v4468_v55 = vrot.slane %v1047_v39, 11 }
  0xf4   :  { %v771_v28 = vor.u32 %v8951_v56, %v768_v25  ;;  %v802_v61 = vor.u32 %v8952_v2, %v799_v20  ;;  %v793_v22 = vor.u32 %v8953_v30, %v790_v41  ;;  %v8837_v37 = vshll.u32 %v5981_v62, 16  ;;  %v604_v25 = vld [vmem:[#allocation2 + $0x40] sm:$0xf]  ;;  %v6010_v12 = vpop.permute.xlu0 %2305 }
  0xf5   :  { %v781_v48 = vsel %vm5677_vm9, %v773_v23, %v780_v33  ;;  %v1054_v44 = vrot.slane %v8839_v29, 7  ;;  %8955 = vst [vmem:[#allocation14_spill] sm:$0xff] %v6010_v12  ;;  %v8838_v30 = vshll.u32 %v5995_v34, 16  ;;  %v8983_v3 = vshll.u32 %v5995_v34, 16 }
  0xf6   :  { %v772_v50 = vsel %vm5677_vm9, %v4455_v5, %v771_v28  ;;  %v2040_v41 = vunpack.c.l.b16 %v781_v48  ;;  %4675 = vmatmul.msk.bf16.gmra.mxu1 %vm2881_vm7, %v5823_v16  ;;  %v8836_v5 = vshrl.u32 %v5995_v34, 16  ;;  %v794_v39 = vsel %vm5677_vm9, %v4456_v31, %v793_v22 }
  0xf7   :  { %v2039_v20 = vunpack.c.l.b16 %v772_v50  ;;  %v803_v33 = vsel %vm5677_vm9, %v795_v53, %v802_v61  ;;  %v1057_v28 = vor.u32 %v8837_v37, %v1054_v44  ;;  %v1059_v23 = vrot.slane %v1054_v44, 4 }
  0xf8   :  { %v1063_v2 = vrot.slane %v8836_v5, 7  ;;  %v805_v50 = vshrl.u32 %v604_v25, 16  ;;  %v8956_v61 = vshrl.u32 %v5426_v10, 16  ;;  %v8957_v53 = vshrl.u32 %v5428_v11, 16 }
  0xf9   :  { %v6019_v56 = vpack.c.b16 %v2040_v41, %v2039_v20  ;;  %v1058_v31 = vsel %vm5677_vm9, %v4468_v55, %v1057_v28  ;;  %2667 = vrot.lane.b32.xlu0 %v5721_v46, %s4960_s25  ;;  %v2041_v20 = vunpack.c.l.b16 %v794_v39  ;;  %v2042_v41 = vunpack.c.l.b16 %v803_v33  ;;  %v4926_v28 = vld [vmem:[#allocation2 + $0x30] sm:$0xff] }
  0xfa   :  { %v812_v22 = vrot.slane %v8956_v61, 7  ;;  %v821_v48 = vrot.slane %v8957_v53, 7  ;;  %v1066_v7 = vor.u32 %v8838_v30, %v1063_v2  ;;  %v2065_v44 = vunpack.c.l.b16 %v1058_v31  ;;  %v6045_v2 = vpop.permute.xlu2 %2327  ;;  %v6047_v39 = vpop.permute.xlu1 %2307  ;;  %v628_v31 = vld [vmem:[#allocation2 + $0xb8] sm:$0xf] }
  0xfb   :  { %2523 = vrot.lane.b32.xlu1 %v6019_v56, %s4959_s24  ;;  %v4457_v55 = vrot.slane %v805_v50, 11  ;;  %2811 = vrot.lane.b32.xlu2 %v4926_v28, %s4961_s26  ;;  %v8958_v53 = vshll.u32 %v5426_v10, 16  ;;  %v8959_v46 = vshll.u32 %v5428_v11, 16  ;;  %8960 = vst [vmem:[#allocation15_spill] sm:$0xff] %v6047_v39  ;;  %v6049_v33 = vpack.c.b16 %v2042_v41, %v2041_v20 }
  0xfc   :  { %v1067_v25 = vsel %vm5677_vm9, %v1059_v23, %v1066_v7  ;;  %v817_v5 = vrot.slane %v812_v22, 4  ;;  %v6053_v50 = vpop.permute.xlu0 %2311  ;;  %v937_v11 = vshrl.u32 %v628_v31, 16  ;;  %v8963_v20 = vshrl.u32 %v5739_v0, 16 }
  0xfd   :  { %v2066_v61 = vunpack.c.l.b16 %v1067_v25  ;;  %v815_v24 = vor.u32 %v8958_v53, %v812_v22  ;;  %v824_v37 = vor.u32 %v8959_v46, %v821_v48  ;;  %8962 = vst [vmem:[#allocation17_spill] sm:$0xff] %v6053_v50 }
  0xff   :  { %v6051_v23 = vpack.c.b16 %v2066_v61, %v2065_v44  ;;  %v816_v7 = vsel %vm5677_vm9, %v4457_v55, %v815_v24  ;;  %v825_v10 = vsel %vm5677_vm9, %v817_v5, %v824_v37  ;;  %v4463_v24 = vrot.slane %v937_v11, 11 }
 0x100   :  { %v2043_v22 = vunpack.c.l.b16 %v816_v7  ;;  %v2044_v48 = vunpack.c.l.b16 %v825_v10  ;;  %v944_v37 = vrot.slane %v8963_v20, 7  ;;  %v8964_v5 = vshrl.u32 %v5750_v14, 16  ;;  %v632_v7 = vld [vmem:[#allocation2 + $0xcc] sm:$0xf] }
 0x101   :  { %8961 = vst [vmem:[#allocation16_spill] sm:$0xff] %v6051_v23  ;;  %2525 = vrot.lane.b32.xlu0 %v6049_v33, %s4959_s24  ;;  %v8966_v55 = vshll.u32 %v5739_v0, 16 }
 0x102   :  { %v953_v41 = vrot.slane %v8964_v5, 7  ;;  %v6071_v44 = vpop.permute.xlu2 %2333  ;;  %v6073_v25 = vpack.c.b16 %v2044_v48, %v2043_v22  ;;  %v949_v53 = vrot.slane %v944_v37, 4  ;;  %v6077_v46 = vpop.permute.xlu1 %2313  ;;  %v640_v48 = vld [vmem:[#allocation2 + $0xf4] sm:$0xf] }
 0x103   :  { %2737 = vrot.lane.b32.xlu1 %v6049_v33, %s4962_s27  ;;  %2669 = vrot.lane.b32.xlu2 %v5559_v47, %s4960_s25  ;;  %8965 = vst [vmem:[#allocation18_spill] sm:$0xff] %v6071_v44  ;;  %v947_v61 = vor.u32 %v8966_v55, %v944_v37  ;;  %v8968_v47 = vshll.u32 %v5750_v14, 16  ;;  %v959_v37 = vshrl.u32 %v632_v7, 16  ;;  %v8970_v14 = vshrl.u32 %v5797_v57, 16  ;;  %v405_v44 = vld [vmem:[#allocation2 + $0x178] sm:$0x1] }
 0x104   :  { %8967 = vst [vmem:[#allocation19_spill] sm:$0xff] %v6077_v46  ;;  %v6082_v10 = vpop.permute.xlu0 %2317 }
 0x105   :  { %v956_v31 = vor.u32 %v8968_v47, %v953_v41  ;;  %8969 = vst [vmem:[#allocation20_spill] sm:$0xff] %v6082_v10  ;;  %v948_v11 = vsel %vm5677_vm9, %v4463_v24, %v947_v61  ;;  %v966_v5 = vrot.slane %v8970_v14, 7  ;;  %v4464_v47 = vrot.slane %v959_v37, 11  ;;  %v4927_v37 = vld [vmem:[#allocation2 + $0x44] sm:$0xff] }
 0x106   :  { %4676 = vmatmul.msk.bf16.gmra.mxu1 %vm2881_vm7, %v5863_v4  ;;  %v2055_v22 = vunpack.c.l.b16 %v948_v11  ;;  %v1003_v24 = vshrl.u32 %v640_v48, 16  ;;  %v8972_v61 = vshll.u32 %v5797_v57, 16  ;;  %v377_v11 = vld [vmem:[#allocation2 + $0x128] sm:$0x1] }
 0x107   :  { %v957_v0 = vsel %vm5677_vm9, %v949_v53, %v956_v31  ;;  %v971_v29 = vrot.slane %v966_v5, 4  ;;  %v8973_v53 = vshll.u32 %v5799_v6, 16 }
 0x108   :  { %v2056_v20 = vunpack.c.l.b16 %v957_v0  ;;  %v969_v30 = vor.u32 %v8972_v61, %v966_v5  ;;  %v4466_v14 = vrot.slane %v1003_v24, 11  ;;  %v8979_v61 = vshrl.u32 %v5981_v62, 16 }
 0x109   :  { %2739 = vrot.lane.b32.xlu0 %v6073_v25, %s4962_s27 }
 0x10a   :  { %v6094_v55 = vpack.c.b16 %v2056_v20, %v2055_v22  ;;  %v970_v7 = vsel %vm5677_vm9, %v4464_v47, %v969_v30  ;;  %v8974_v22 = vshrl.u32 %v5853_v43, 16  ;;  %v6107_v57 = vpop.permute.xlu2 %2339  ;;  %v378_v30 = vsel %vm5373_vm3, 0, %v377_v11 }
 0x10b   :  { %2599 = vrot.lane.b32.xlu1 %v4926_v28, %s4958_s12  ;;  %v8971_v28 = vshrl.u32 %v5799_v6, 16  ;;  %8975 = vst [vmem:[#allocation21_spill] sm:$0xff] %v6107_v57  ;;  %v2057_v48 = vunpack.c.l.b16 %v970_v7  ;;  %v8976_v6 = vshrl.u32 %v5867_v52, 16 }
 0x10c   :  { %v1010_v20 = vrot.slane %v8974_v22, 7  ;;  %379 = vst [vmem:[#allocation2 + $0x128] sm:$0x1] %v378_v30  ;;  %v8982_v22 = vshll.u32 %v5981_v62, 16 }
 0x10d   :  { %v975_v41 = vrot.slane %v8971_v28, 7  ;;  %v1019_v28 = vrot.slane %v8976_v6, 7 }
 0x10e   :  { %v1015_v24 = vrot.slane %v1010_v20, 4  ;;  %v1642_v6 = vrot.slane %v8982_v22, 5  ;;  %v8987_v22 = vshrl.u32 %v5919_v49, 16 }
 0x10f   :  { %v978_v31 = vor.u32 %v8973_v53, %v975_v41  ;;  %v8978_v41 = vshll.u32 %v5853_v43, 16  ;;  %v1641_v53 = vrot.slane %v8979_v61, 4 }
 0x111   :  { %v979_v0 = vsel %vm5677_vm9, %v971_v29, %v978_v31  ;;  %2527 = vrot.lane.b32.xlu0 %v6073_v25, %s4959_s24  ;;  %v6115_v29 = vpop.permute.xlu1 %2319  ;;  %v1013_v47 = vor.u32 %v8978_v41, %v1010_v20  ;;  %v6121_v31 = vpop.permute.xlu0 %2323  ;;  %v8984_v20 = vshrl.u32 %v5995_v34, 16  ;;  %v8986_v34 = vshrl.u32 %v5907_v19, 16 }
 0x112   :  { %v2058_v5 = vunpack.c.l.b16 %v979_v0  ;;  %8977 = vst [vmem:[#allocation22_spill] sm:$0xff] %v6115_v29  ;;  %v8981_v0 = vshll.u32 %v5867_v52, 16  ;;  %v1645_v29 = vrot.slane %v8983_v3, 5 }
 0x113   :  { %2813 = vrot.lane.b32.xlu1 %v4927_v37, %s4961_s26  ;;  %8980 = vst [vmem:[#allocation23_spill] sm:$0xff] %v6121_v31  ;;  %v1014_v43 = vsel %vm5677_vm9, %v4466_v14, %v1013_v47  ;;  %v1647_v30 = vrot.slane %v8984_v20, 4  ;;  %v651_v14 = vld [vmem:[#allocation2 + $0x128] sm:$0x1]  ;;  %v1032_v47 = vrot.slane %v8986_v34, 7  ;;  %v1041_v20 = vrot.slane %v8987_v22, 7 }
 0x114   :  { %v6123_v7 = vpack.c.b16 %v2058_v5, %v2057_v48  ;;  %v1022_v11 = vor.u32 %v8981_v0, %v1019_v28  ;;  %v2061_v52 = vunpack.c.l.b16 %v1014_v43  ;;  %v1643_v5 = vor.u32 %v1642_v6, %v1641_v53  ;;  %v644_v28 = vld [vmem:[#allocation2 + $0x108] sm:$0xf]  ;;  %v6150_v6 = vpop.permute.xlu2 %2345 }
 0x115   :  { %v1648_v41 = vor.u32 %v1647_v30, %v1645_v29  ;;  %v1025_v3 = vshrl.u32 %v644_v28, 16  ;;  %8988 = vst [vmem:[#allocation25_spill] sm:$0xff] %v6150_v6  ;;  %v8990_v28 = vshll.u32 %v5919_v49, 16 }
 0x116   :  { %4677 = vmatmul.msk.bf16.gmra.mxu1 %vm2881_vm7, %v5859_v59  ;;  %v1023_v48 = vsel %vm5677_vm9, %v1015_v24, %v1022_v11  ;;  %v1644_v61 = vrot.slane %v1643_v5, 4  ;;  %v1651_v11 = vshll.u32 %v651_v14, 16  ;;  %v1037_v5 = vrot.slane %v1032_v47, 4 }
 0x117   :  { %v2062_v62 = vunpack.c.l.b16 %v1023_v48  ;;  %v1649_v53 = vrot.slane %v1648_v41, 4  ;;  %v4467_v43 = vrot.slane %v1025_v3, 11 }
 0x118   :  { %v1646_v24 = vsel %vm5403_vm6, %v1644_v61, %v1645_v29 }
 0x119   :  { %v6139_v0 = vpack.c.b16 %v2062_v62, %v2061_v52  ;;  %2741 = vrot.lane.b32.xlu0 %v5710_v36, %s4962_s27  ;;  %v6154_v48 = vpop.permute.xlu1 %2325  ;;  %v1653_v52 = vrot.slane %v1651_v11, 5  ;;  %v1044_v62 = vor.u32 %v8990_v28, %v1041_v20  ;;  %v6158_v34 = vpop.permute.xlu0 %2329  ;;  %v2385_v22 = vunpack.c.l.b16 %v1646_v24  ;;  %v4928_v11 = vld [vmem:[#allocation2 + $0x58] sm:$0xff]  ;;  %v664_v20 = vld [vmem:[#allocation2 + $0x16c] sm:$0xf]  ;;  %v6172_v24 = vld [vmem:[#allocation2 + $0x170] sm:$0xf] }
 0x11a   :  { %8991 = vst [vmem:[#allocation26_spill] sm:$0xff] %v6158_v34 }
 0x11b   :  { %8985 = vst [vmem:[#allocation24_spill] sm:$0xff] %v6139_v0  ;;  %2601 = vrot.lane.b32.xlu1 %v4927_v37, %s4958_s12  ;;  %v8989_v37 = vshll.u32 %v5907_v19, 16  ;;  %v1654_v41 = vsel %vm5403_vm6, %v1649_v53, %v1653_v52  ;;  %v1045_v19 = vsel %vm5677_vm9, %v1037_v5, %v1044_v62  ;;  %v8840_v52 = vshll.u32 %v6172_v24, 16 }
 0x11c   :  { %v2386_v3 = vunpack.c.l.b16 %v1654_v41  ;;  %v2064_v14 = vunpack.c.l.b16 %v1045_v19  ;;  %v6176_v53 = vpop.permute.xlu2 %2351 }
 0x11d   :  { %v1035_v30 = vor.u32 %v8989_v37, %v1032_v47  ;;  %8994 = vst [vmem:[#allocation29_spill] sm:$0xff] %v6176_v53  ;;  %v1091_v37 = vshrl.u32 %v664_v20, 16 }
 0x11e   :  { %v6167_v49 = vpack.c.b16 %v2386_v3, %v2385_v22  ;;  %v6200_v3 = vld [vmem:[#allocation2 + $0x184] sm:$0xf] }
 0x11f   :  { %v1036_v29 = vsel %vm5677_vm9, %v4467_v43, %v1035_v30  ;;  %v6180_v43 = vld [vmem:[#allocation2 + $0x174] sm:$0xf]  ;;  %v8841_v30 = vshrl.u32 %v6172_v24, 16  ;;  %v4470_v62 = vrot.slane %v1091_v37, 11 }
 0x120   :  { %v2063_v61 = vunpack.c.l.b16 %v1036_v29  ;;  %8992 = vst [vmem:[#allocation27_spill] sm:$0xff] %v6167_v49  ;;  %2481 = vrot.lane.b32.xlu2 %v6167_v49, %s4957_s23  ;;  %v8842_v29 = vshrl.u32 %v6180_v43, 16  ;;  %v8843_v41 = vshll.u32 %v6180_v43, 16 }
 0x121   :  { %2603 = vrot.lane.b32.xlu0 %v4928_v11, %s4958_s12  ;;  %v6184_v5 = vpop.permute.xlu1 %2331  ;;  %v6186_v28 = vpop.permute.xlu0 %2335  ;;  %v1098_v22 = vrot.slane %v8841_v30, 7  ;;  %v8845_v30 = vshrl.u32 %v6200_v3, 16 }
 0x122   :  { %v6169_v47 = vpack.c.b16 %v2064_v14, %v2063_v61  ;;  %8995 = vst [vmem:[#allocation30_spill] sm:$0xff] %v6184_v5  ;;  %v6196_v61 = vld [vmem:[#allocation2 + $0x6c] sm:$0xff]  ;;  %v6202_v14 = vld [vmem:[#allocation2 + $0x188] sm:$0xf]  ;;  %v1107_v20 = vrot.slane %v8842_v29, 7 }
 0x123   :  { %2815 = vrot.lane.b32.xlu1 %v4928_v11, %s4961_s26  ;;  %8996 = vst [vmem:[#allocation31_spill] sm:$0xff] %v6186_v28  ;;  %v1101_v19 = vor.u32 %v8840_v52, %v1098_v22  ;;  %v1103_v11 = vrot.slane %v1098_v22, 4  ;;  %v668_v52 = vld [vmem:[#allocation2 + $0x180] sm:$0xf]  ;;  %v8844_v53 = vshrl.u32 %v6202_v14, 16 }
 0x124   :  { %8993 = vst [vmem:[#allocation28_spill] sm:$0xff] %v6169_v47  ;;  %v1110_v37 = vor.u32 %v8843_v41, %v1107_v20  ;;  %v6216_v6 = vpop.permute.xlu2 %2453  ;;  %v1120_v20 = vrot.slane %v8845_v30, 7 }
 0x125   :  { %v1129_v41 = vrot.slane %v8844_v53, 7 }
 0x126   :  { %4678 = vmatmul.msk.bf16.gmra.mxu1 %vm2881_vm7, %v5879_v60  ;;  %v1111_v22 = vsel %vm5677_vm9, %v1103_v11, %v1110_v37  ;;  %v4930_v11 = vld [vmem:[#allocation2 + $0x184] sm:$0xff]  ;;  %v6231_v37 = vld [vmem:[#allocation2 + $0x198] sm:$0xf]  ;;  %v1125_v30 = vrot.slane %v1120_v20, 4 }
 0x127   :  { %v2070_v29 = vunpack.c.l.b16 %v1111_v22 }
 0x128   :  { %2671 = vrot.lane.b32.xlu2 %v5652_v8, %s4960_s25  ;;  %v1113_v8 = vshrl.u32 %v668_v52, 16  ;;  %v6233_v52 = vld [vmem:[#allocation2 + $0x19c] sm:$0xf] }
 0x129   :  { %2817 = vrot.lane.b32.xlu0 %v6196_v61, %s4961_s26  ;;  %v6218_v10 = vpop.permute.xlu1 %2337 }
 0x12a   :  { %8997 = vst [vmem:[#allocation32_spill] sm:$0xff] %v6218_v10  ;;  %v4471_v22 = vrot.slane %v1113_v8, 11 }
 0x12b   :  { %2673 = vrot.lane.b32.xlu1 %v5731_v38, %s4960_s25  ;;  %v1102_v38 = vsel %vm5677_vm9, %v4470_v62, %v1101_v19  ;;  %v8847_v62 = vshll.u32 %v6200_v3, 16  ;;  %v6221_v19 = vpop.permute.xlu0 %2341 }
 0x12c   :  { %v2069_v31 = vunpack.c.l.b16 %v1102_v38  ;;  %8998 = vst [vmem:[#allocation33_spill] sm:$0xff] %v6221_v19  ;;  %v8846_v38 = vshll.u32 %v6202_v14, 16  ;;  %v8850_v19 = vshrl.u32 %v6233_v52, 16  ;;  %v6245_v57 = vpop.permute.xlu2 %2459 }
 0x12d   :  { %v1123_v53 = vor.u32 %v8847_v62, %v1120_v20  ;;  %v6253_v20 = vld [vmem:[#allocation2 + $0x198] sm:$0xff] }
 0x12e   :  { %v6228_v51 = vpack.c.b16 %v2070_v29, %v2069_v31  ;;  %v1132_v31 = vor.u32 %v8846_v38, %v1129_v41  ;;  %v672_v29 = vld [vmem:[#allocation2 + $0x194] sm:$0xf]  ;;  %v8852_v38 = vshll.u32 %v6231_v37, 16  ;;  %v1151_v62 = vrot.slane %v8850_v19, 7 }
 0x12f   :  { %v1124_v46 = vsel %vm5677_vm9, %v4471_v22, %v1123_v53  ;;  %v1135_v10 = vshrl.u32 %v672_v29, 16  ;;  %v8851_v53 = vshll.u32 %v6233_v52, 16 }
 0x130   :  { %2529 = vrot.lane.b32.xlu2 %v5710_v36, %s4959_s24  ;;  %v1133_v8 = vsel %vm5677_vm9, %v1125_v30, %v1132_v31  ;;  %v2071_v30 = vunpack.c.l.b16 %v1124_v46 }
 0x131   :  { %2629 = vrot.lane.b32.xlu0 %v4930_v11, %s4958_s12  ;;  %v8848_v11 = vshrl.u32 %v6231_v37, 16  ;;  %v6251_v50 = vpop.permute.xlu1 %2343  ;;  %v2072_v31 = vunpack.c.l.b16 %v1133_v8  ;;  %v4472_v29 = vrot.slane %v1135_v10, 11 }
 0x132   :  { %8999 = vst [vmem:[#allocation34_spill] sm:$0xff] %v6251_v50 }
 0x133   :  { %v1142_v41 = vrot.slane %v8848_v11, 7  ;;  %v6263_v22 = vpop.permute.xlu0 %2347  ;;  %v1154_v11 = vor.u32 %v8851_v53, %v1151_v62  ;;  %v6271_v23 = vpack.c.b16 %v2072_v31, %v2071_v30  ;;  %v406_v62 = vsel %vm5373_vm3, 0, %v405_v44 }
 0x134   :  { %9000 = vst [vmem:[#allocation35_spill] sm:$0xff] %v6263_v22  ;;  %v6279_v10 = vpop.permute.xlu2 %2465  ;;  %v9005_v30 = vshll.u32 %v6172_v24, 16  ;;  %v9007_v44 = vshrl.u32 %v6180_v43, 16 }
 0x135   :  { %v1145_v50 = vor.u32 %v8852_v38, %v1142_v41  ;;  %v1147_v28 = vrot.slane %v1142_v41, 4  ;;  %9001 = vst [vmem:[#allocation36_spill] sm:$0xff] %v6279_v10 }
 0x136   :  { %4679 = vmatmul.msk.bf16.gmra.mxu1 %vm2881_vm7, %v5961_v15  ;;  %407 = vst [vmem:[#allocation2 + $0x178] sm:$0x1] %v406_v62  ;;  %v1670_v31 = vrot.slane %v9005_v30, 5  ;;  %v1675_v38 = vrot.slane %v9007_v44, 4  ;;  %v9010_v44 = vshrl.u32 %v6200_v3, 16 }
 0x137   :  { %v1146_v19 = vsel %vm5677_vm9, %v4472_v29, %v1145_v50  ;;  %v1155_v46 = vsel %vm5677_vm9, %v1147_v28, %v1154_v11  ;;  %v9004_v28 = vshrl.u32 %v6172_v24, 16  ;;  %v9006_v29 = vshll.u32 %v6180_v43, 16 }
 0x138   :  { %2743 = vrot.lane.b32.xlu2 %v5791_v45, %s4962_s27  ;;  %v2074_v50 = vunpack.c.l.b16 %v1155_v46 }
 0x139   :  { %2843 = vrot.lane.b32.xlu0 %v6253_v20, %s4961_s26  ;;  %v6285_v8 = vpop.permute.xlu1 %2349  ;;  %v1669_v11 = vrot.slane %v9004_v28, 4  ;;  %v1673_v53 = vrot.slane %v9006_v29, 5 }
 0x13a   :  { %9002 = vst [vmem:[#allocation37_spill] sm:$0xff] %v6285_v8 }
 0x13b   :  { %v6287_v41 = vpop.permute.xlu0 %2353  ;;  %v1671_v62 = vor.u32 %v1670_v31, %v1669_v11  ;;  %v1676_v8 = vor.u32 %v1675_v38, %v1673_v53  ;;  %v412_v11 = vld [vmem:[#allocation2 + $0x18c] sm:$0x1] }
 0x13c   :  { %9003 = vst [vmem:[#allocation38_spill] sm:$0xff] %v6287_v41  ;;  %v413_v31 = vsel %vm5373_vm3, 0, %v412_v11 }
 0x13d   :  { %v1672_v22 = vrot.slane %v1671_v62, 4  ;;  %v667_v47 = vld [vmem:[#allocation2 + $0x178] sm:$0x1]  ;;  %v1677_v28 = vrot.slane %v1676_v8, 4  ;;  %414 = vst [vmem:[#allocation2 + $0x18c] sm:$0x1] %v413_v31 }
 0x13e   :  { %v1679_v30 = vshll.u32 %v667_v47, 16  ;;  %v1683_v62 = vrot.slane %v9010_v44, 4  ;;  %v9012_v47 = vshll.u32 %v6202_v14, 16  ;;  %v4745_v44 = vld [vmem:[%s8792_s1 + $0x38] sm:$0xff] }
 0x13f   :  { %v1674_v24 = vsel %vm5403_vm6, %v1672_v22, %v1673_v53  ;;  %v9011_v53 = vshll.u32 %v6200_v3, 16  ;;  %3568 = vmatpush.bf16.msra.mxu0 %v4745_v44  ;;  %4906 = vmatpush.bf16.msra.mxu2 %v4745_v44 }
 0x140   :  { %2555 = vrot.lane.b32.xlu2 %v6271_v23, %s4959_s24  ;;  %v1681_v38 = vrot.slane %v1679_v30, 5  ;;  %v1687_v8 = vrot.slane %v9012_v47, 5  ;;  %v616_v47 = vld [vmem:[#allocation2 + $0x7c] sm:$0xf] }
 0x141   :  { %2675 = vrot.lane.b32.xlu0 %v5805_v26, %s4960_s25  ;;  %v2073_v26 = vunpack.c.l.b16 %v1146_v19  ;;  %v6303_v19 = vpop.permute.xlu2 %2471  ;;  %v6305_v46 = vpop.permute.xlu1 %2355  ;;  %v1684_v22 = vrot.slane %v9011_v53, 5  ;;  %v6341_v53 = vld [vmem:[#allocation2 + $0x80] sm:$0xff] }
 0x142   :  { %9008 = vst [vmem:[#allocation39_spill] sm:$0xff] %v6303_v19 }
 0x143   :  { %v6299_v41 = vpack.c.b16 %v2074_v50, %v2073_v26  ;;  %9009 = vst [vmem:[#allocation40_spill] sm:$0xff] %v6305_v46  ;;  %v6309_v43 = vpop.permute.xlu0 %2455  ;;  %v2389_v26 = vunpack.c.l.b16 %v1674_v24  ;;  %v1682_v50 = vsel %vm5403_vm6, %v1677_v28, %v1681_v38  ;;  %v1685_v30 = vor.u32 %v1684_v22, %v1683_v62 }
 0x144   :  { %v2390_v29 = vunpack.c.l.b16 %v1682_v50  ;;  %v9013_v24 = vshrl.u32 %v6202_v14, 16 }
 0x145   :  { %v1686_v3 = vrot.slane %v1685_v30, 4 }
 0x146   :  { %4680 = vmatmul.msk.bf16.gmra.mxu1 %vm2881_vm7, %v5947_v35  ;;  %v2437_v46 = vpack.c.b16 %v2390_v29, %v2389_v26  ;;  %v1689_v19 = vrot.slane %v9013_v24, 4  ;;  %v671_v26 = vld [vmem:[#allocation2 + $0x18c] sm:$0x1] }
 0x147   :  { %v1688_v14 = vsel %vm5403_vm6, %v1686_v3, %v1687_v8  ;;  %v1693_v29 = vshll.u32 %v671_v26, 16  ;;  %v871_v3 = vshrl.u32 %v616_v47, 16 }
 0x148   :  { %2769 = vrot.lane.b32.xlu2 %v6299_v41, %s4962_s27  ;;  %2485 = vrot.lane.b32.xlu1 %v2437_v46, %s4957_s23  ;;  %v1690_v38 = vor.u32 %v1689_v19, %v1687_v8  ;;  %v2391_v46 = vunpack.c.l.b16 %v1688_v14  ;;  %v419_v14 = vld [vmem:[#allocation2 + $0x1a0] sm:$0x1] }
 0x149   :  { %v6325_v28 = vpop.permute.xlu1 %2457  ;;  %v6332_v50 = vpop.permute.xlu2 %2477  ;;  %v1695_v62 = vrot.slane %v1693_v29, 5 }
 0x14a   :  { %9014 = vst [vmem:[#allocation41_spill] sm:$0xff] %v6332_v50  ;;  %v1691_v31 = vrot.slane %v1690_v38, 4  ;;  %v9017_v38 = vshrl.u32 %v5616_v9, 16 }
 0x14b   :  { %v6327_v11 = vpop.permute.xlu0 %2461 }
 0x14c   :  { %v1696_v8 = vsel %vm5403_vm6, %v1691_v31, %v1695_v62  ;;  %v878_v26 = vrot.slane %v9017_v38, 7  ;;  %v4744_v31 = vld [vmem:[%s8792_s1 + $0x30] sm:$0xff]  ;;  %v4460_v62 = vrot.slane %v871_v3, 11  ;;  %v9024_v3 = vshrl.u32 %v6231_v37, 16 }
 0x14d   :  { %v2392_v30 = vunpack.c.l.b16 %v1696_v8  ;;  %3569 = vmatpush.bf16.msra.mxu0 %v4744_v31  ;;  %4907 = vmatpush.bf16.msra.mxu2 %v4744_v31 }
 0x14e   :  { %v883_v8 = vrot.slane %v878_v26, 4 }
 0x14f   :  { %v2438_v29 = vpack.c.b16 %v2392_v30, %v2391_v46  ;;  %v9020_v46 = vshll.u32 %v5616_v9, 16  ;;  %v420_v30 = vsel %vm5373_vm3, 0, %v419_v14 }
 0x150   :  { %2605 = vrot.lane.b32.xlu2 %v6196_v61, %s4958_s12  ;;  %v6336_v61 = vpop.f32.mrf.mxu1  ;;  %421 = vst [vmem:[#allocation2 + $0x1a0] sm:$0x1] %v420_v30  ;;  %v678_v30 = vld [vmem:[#allocation2 + $0x1b0] sm:$0xf] }
 0x151   :  { %9015 = vst [vmem:[#allocation42_spill] sm:$0xff] %v6336_v61  ;;  %v6345_v19 = vpop.permute.xlu1 %2463  ;;  %v6351_v24 = vpop.permute.xlu2 %2597  ;;  %v9018_v61 = vshrl.u32 %v5620_v27, 16  ;;  %2699 = vrot.lane.b32.xlu1 %v2438_v29, %s4960_s25  ;;  %2487 = vrot.lane.b32.xlu0 %v2438_v29, %s4957_s23  ;;  %v881_v47 = vor.u32 %v9020_v46, %v878_v26  ;;  %v4743_v29 = vld [vmem:[%s8792_s1 + $0x28] sm:$0xff]  ;;  %v1697_v26 = vrot.slane %v9024_v3, 4  ;;  %v9025_v46 = vshll.u32 %v6231_v37, 16 }
 0x152   :  { %3570 = vmatpush.bf16.msra.mxu0 %v4743_v29  ;;  %4908 = vmatpush.bf16.msra.mxu2 %v4743_v29  ;;  %v1171_v3 = vshrl.u32 %v678_v30, 16 }
 0x153   :  { %v6347_v22 = vpop.permute.xlu0 %2467  ;;  %v887_v50 = vrot.slane %v9018_v61, 7  ;;  %v1698_v14 = vrot.slane %v9025_v46, 5 }
 0x154   :  { %9016 = vst [vmem:[#allocation43_spill] sm:$0xff] %v6347_v22  ;;  %v677_v22 = vld [vmem:[#allocation2 + $0x1ac] sm:$0xf] }
 0x155   :  { %v1699_v39 = vor.u32 %v1698_v14, %v1697_v26 }
 0x156   :  { %4681 = vmatmul.msk.bf16.gmra.mxu1 %vm2881_vm7, %v5977_v17  ;;  %v9027_v17 = vshrl.u32 %v6233_v52, 16 }
 0x157   :  { %v675_v26 = vld [vmem:[#allocation2 + $0x1a0] sm:$0x1] }
 0x158   :  { %2819 = vrot.lane.b32.xlu2 %v6341_v53, %s4961_s26  ;;  %v6368_v61 = vpop.f32.mrf.mxu1  ;;  %v1707_v5 = vshll.u32 %v675_v26, 16 }
 0x159   :  { %v6364_v44 = vpop.permute.xlu1 %2469  ;;  %9021 = vst [vmem:[#allocation45_spill] sm:$0xff] %v6368_v61  ;;  %v9026_v61 = vshll.u32 %v6233_v52, 16  ;;  %v6395_v31 = vpop.permute.xlu2 %2811  ;;  %2531 = vrot.lane.b32.xlu1 %v5791_v45, %s4959_s24  ;;  %v2884_v52 = vsel %vm2881_vm7, %v5913_v40, %v5923_v1  ;;  %v4741_v40 = vld [vmem:[%s8792_s1 + $0x18] sm:$0xff]  ;;  %v1174_v1 = vshll.u32 %v678_v30, 16  ;;  %v1173_v30 = vrot.slane %v1171_v3, 7 }
 0x15a   :  { %9019 = vst [vmem:[#allocation44_spill] sm:$0xff] %v6364_v44  ;;  %v1703_v44 = vrot.slane %v9027_v17, 4  ;;  %v1162_v17 = vshrl.u32 %v677_v22, 16 }
 0x15b   :  { %v6372_v38 = vpop.permute.xlu0 %2473  ;;  %v1715_v12 = vrot.slane %v1174_v1, 5 }
 0x15c   :  { %9022 = vst [vmem:[#allocation46_spill] sm:$0xff] %v6372_v38  ;;  %v1701_v38 = vrot.slane %v9026_v61, 5  ;;  %v1164_v35 = vrot.slane %v1162_v17, 7  ;;  %v1711_v0 = vrot.slane %v1162_v17, 4 }
 0x15e   :  { %v1704_v61 = vor.u32 %v1703_v44, %v1701_v38  ;;  %v6407_v44 = vld [vmem:[#allocation2 + $0x1ac] sm:$0xff] }
 0x160   :  { %2631 = vrot.lane.b32.xlu2 %v6253_v20, %s4958_s12  ;;  %v9023_v20 = vshll.u32 %v5620_v27, 16 }
 0x162   :  { %v890_v9 = vor.u32 %v9023_v20, %v887_v50  ;;  %v882_v50 = vsel %vm5677_vm9, %v4460_v62, %v881_v47  ;;  %v1700_v20 = vrot.slane %v1699_v39, 4  ;;  %v6405_v62 = vld [vmem:[#allocation2 + $0x90] sm:$0xf]  ;;  %v676_v39 = vld [vmem:[#allocation2 + $0x1a8] sm:$0xf]  ;;  %v6411_v47 = vpop.permute.xlu1 %2475 }
 0x163   :  { %9028 = vst [vmem:[#allocation47_spill] sm:$0xff] %v6411_v47  ;;  %v6413_v46 = vpop.permute.xlu0 %2479  ;;  %v1157_v47 = vshrl.u32 %v676_v39, 16  ;;  %v9031_v39 = vld [vmem:[#allocation3_spill] sm:$0xff] }
 0x164   :  { %v891_v37 = vsel %vm5677_vm9, %v883_v8, %v890_v9  ;;  %v2049_v8 = vunpack.c.l.b16 %v882_v50  ;;  %v1165_v9 = vshll.u32 %v677_v22, 16  ;;  %9029 = vst [vmem:[#allocation48_spill] sm:$0xff] %v6413_v46  ;;  %v1702_v14 = vsel %vm5403_vm6, %v1700_v20, %v1701_v38 }
 0x165   :  { %v2050_v29 = vunpack.c.l.b16 %v891_v37  ;;  %v893_v50 = vshrl.u32 %v6405_v62, 16  ;;  %v9030_v22 = vshrl.u32 %v5699_v18, 16  ;;  %v1709_v46 = vrot.slane %v1707_v5, 5 }
 0x166   :  { %4682 = vmatmul.msk.bf16.gmra.mxu1 %vm2881_vm7, %v6167_v49  ;;  %v426_v49 = vld [vmem:[#allocation2 + $0x1b4] sm:$0x1]  ;;  %v1712_v10 = vrot.slane %v1165_v9, 5  ;;  %v2393_v34 = vunpack.c.l.b16 %v1702_v14  ;;  %v1717_v20 = vrot.slane %v1171_v3, 4  ;;  %v9032_v26 = vshrl.u32 %v9031_v39, 16  ;;  %v9033_v14 = vld [vmem:[#allocation4_spill] sm:$0xff] }
 0x167   :  { %v427_v27 = vsel %vm5373_vm3, 0, %v426_v49  ;;  %v4742_v49 = vld [vmem:[%s8792_s1 + $0x20] sm:$0xff]  ;;  %v6423_v37 = vrot.slane %v9030_v22, 7  ;;  %v6425_v15 = vpack.c.b16 %v2050_v29, %v2049_v8  ;;  %v4473_v17 = vrot.slane %v1157_v47, 11  ;;  %v4740_v29 = vld [vmem:[%s8792_s1 + $0x10] sm:$0xff] }
 0x168   :  { %428 = vst [vmem:[#allocation2 + $0x1b4] sm:$0x1] %v427_v27  ;;  %2845 = vrot.lane.b32.xlu2 %v6407_v44, %s4961_s26  ;;  %3571 = vmatpush.bf16.msra.mxu0 %v4742_v49  ;;  %v1705_v27 = vrot.slane %v1704_v61, 4  ;;  %v909_v5 = vrot.slane %v9032_v26, 7  ;;  %v1167_v3 = vor.u32 %v1165_v9, %v1164_v35  ;;  %v1169_v47 = vrot.slane %v1164_v35, 4  ;;  %v4739_v9 = vld [vmem:[%s8792_s1 + $0x8] sm:$0xff] }
 0x169   :  { %4909 = vmatpush.bf16.msra.mxu2 %v4742_v49  ;;  %v1713_v49 = vor.u32 %v1712_v10, %v1711_v0  ;;  %2745 = vrot.lane.b32.xlu1 %v6425_v15, %s4962_s27  ;;  %v6438_v0 = vpop.permute.xlu2 %2669  ;;  %v1176_v22 = vor.u32 %v1174_v1, %v1173_v30  ;;  %v6450_v35 = vld [vmem:[#allocation2 + $0x1c0] sm:$0xf]  ;;  %v6457_v30 = vld [vmem:[#allocation2 + $0x1c4] sm:$0xf] }
 0x16a   :  { %v1710_v61 = vsel %vm5403_vm6, %v1705_v27, %v1709_v46 }
 0x16b   :  { %v2394_v8 = vunpack.c.l.b16 %v1710_v61  ;;  %v1714_v46 = vrot.slane %v1713_v49, 4  ;;  %v2668_v26 = vpop.permute.xlu0 %2667 }
 0x16c   :  { %3572 = vmatpush.bf16.msra.mxu0 %v4741_v40 }
 0x16d   :  { %4910 = vmatpush.bf16.msra.mxu2 %v4741_v40  ;;  %v2524_v10 = vpop.permute.xlu1 %2523  ;;  %v1718_v40 = vor.u32 %v1717_v20, %v1715_v12  ;;  %v6442_v61 = vpack.c.b16 %v2394_v8, %v2393_v34  ;;  %v1716_v20 = vsel %vm5403_vm6, %v1714_v46, %v1715_v12  ;;  %v4461_v34 = vrot.slane %v893_v50, 11  ;;  %v680_v8 = vld [vmem:[#allocation2 + $0x1bc] sm:$0xf] }
 0x16e   :  { %v905_v12 = vrot.slane %v6423_v37, 4  ;;  %v9035_v50 = vshll.u32 %v9031_v39, 16  ;;  %v4738_v39 = vld [vmem:[%s8792_s1] sm:$0xff] }
 0x16f   :  { %v679_v38 = vld [vmem:[#allocation2 + $0x1b4] sm:$0x1]  ;;  %v1719_v49 = vrot.slane %v1718_v40, 4  ;;  %2701 = vrot.lane.b32.xlu0 %v6442_v61, %s4960_s25  ;;  %v1168_v40 = vsel %vm5677_vm9, %v4473_v17, %v1167_v3 }
 0x170   :  { %v1721_v62 = vshll.u32 %v679_v38, 16  ;;  %2677 = vrot.lane.b32.xlu2 %v9033_v14, %s4960_s25  ;;  %v2980_v38 = vsel %vm2978_vm10, %v2884_v52, %v6216_v6  ;;  %3573 = vmatpush.bf16.msra.mxu0 %v4740_v29  ;;  %v2395_v6 = vunpack.c.l.b16 %v1716_v20  ;;  %v9034_v52 = vshll.u32 %v5699_v18, 16 }
 0x171   :  { %v3045_v14 = vsel %vm3043_vm11, %v2980_v38, %v2524_v10  ;;  %4911 = vmatpush.bf16.msra.mxu2 %v4740_v29  ;;  %v912_v46 = vor.u32 %v9035_v50, %v909_v5  ;;  %v8864_v18 = vshrl.u32 %v6450_v35, 16  ;;  %2557 = vrot.lane.b32.xlu1 %v6299_v41, %s4959_s24  ;;  %v1179_v5 = vshrl.u32 %v680_v8, 16 }
 0x172   :  { %v1723_v27 = vrot.slane %v1721_v62, 5  ;;  %v903_v1 = vor.u32 %v9034_v52, %v6423_v37  ;;  %v3110_v29 = vsel %vm3108_vm12, %v3045_v14, %v6351_v24  ;;  %v8859_v37 = vshrl.u32 %v6457_v30, 16  ;;  %v6493_v52 = vld [vmem:[#allocation2 + $0x134] sm:$0xf] }
 0x173   :  { %v3175_v17 = vsel %vm3173_vm13, %v3110_v29, %v2668_v26  ;;  %v2526_v20 = vpop.permute.xlu0 %2525  ;;  %v913_v26 = vsel %vm5677_vm9, %v905_v12, %v912_v46  ;;  %v1186_v29 = vrot.slane %v8864_v18, 7  ;;  %v6505_v12 = vld [vmem:[#allocation2 + $0x138] sm:$0xf] }
 0x174   :  { %v1724_v62 = vsel %vm5403_vm6, %v1719_v49, %v1723_v27  ;;  %3574 = vmatpush.bf16.msra.mxu0 %v4739_v9  ;;  %v1177_v27 = vsel %vm5677_vm9, %v1169_v47, %v1176_v22  ;;  %v384_v47 = vld [vmem:[#allocation2 + $0x13c] sm:$0x1]  ;;  %v2075_v22 = vunpack.c.l.b16 %v1168_v40  ;;  %v2052_v46 = vunpack.c.l.b16 %v913_v26 }
 0x175   :  { %v2396_v10 = vunpack.c.l.b16 %v1724_v62  ;;  %4912 = vmatpush.bf16.msra.mxu2 %v4739_v9  ;;  %v2738_v3 = vpop.permute.xlu1 %2737  ;;  %v2076_v38 = vunpack.c.l.b16 %v1177_v27  ;;  %v6482_v9 = vpop.f32.mrf.mxu1  ;;  %v385_v49 = vsel %vm5373_vm3, 0, %v384_v47  ;;  %v4474_v40 = vrot.slane %v1179_v5, 11  ;;  %v4889_v5 = vld [vmem:[%s8791_s0 + $0x78] sm:$0xff]  }
 0x176   :  { %9036 = vst [vmem:[#allocation3_spill] sm:$0xff] %v6482_v9  ;;  %v3240_v14 = vsel %vm3238_vm14, %v3175_v17, %v2738_v3  ;;  %v8863_v17 = vshll.u32 %v6493_v52, 16  ;;  %v8866_v3 = vshrl.u32 %v6505_v12, 16  ;;  %v8865_v47 = vshll.u32 %v6505_v12, 16 }
 0x177   :  { %v6474_v24 = vpack.c.b16 %v2396_v10, %v2395_v6  ;;  %v904_v6 = vsel %vm5677_vm9, %v4461_v34, %v903_v1  ;;  %v3305_v8 = vsel %vm3303_vm15, %v3240_v14, %v6395_v31  ;;  %386 = vst [vmem:[#allocation2 + $0x13c] sm:$0x1] %v385_v49  ;;  %v8861_v10 = vshll.u32 %v6450_v35, 16  ;;  %2533 = vrot.lane.b32.xlu0 %v6425_v15, %s4959_s24 }
 0x178   :  { %2489 = vrot.lane.b32.xlu2 %v6442_v61, %s4957_s23  ;;  %3575 = vmatpush.bf16.msra.mxu0 %v4738_v39  ;;  %v1195_v34 = vrot.slane %v8859_v37, 7  ;;  %v8860_v1 = vshll.u32 %v6457_v30, 16  ;;  %v2887_v31 = vsel %vm2881_vm7, %v6019_v56, %v5959_v13  ;;  %v2051_v50 = vunpack.c.l.b16 %v904_v6 }
 0x179   :  { %4687 = vmatmul.msk.bf16.vlgmr.msra.gmra.mxu3 %vm2881_vm7, %v6474_v24  ;;  %4913 = vmatpush.bf16.msra.mxu2 %v4738_v39  ;;  %v6512_v27 = vpack.c.b16 %v2076_v38, %v2075_v22  ;;  %v8862_v39 = vshrl.u32 %v6493_v52, 16  ;;  %v1189_v14 = vor.u32 %v8861_v10, %v1186_v29  ;;  %v1191_v49 = vrot.slane %v1186_v29, 4  ;;  %v6541_v29 = vld [vmem:[#allocation2 + $0x1d4] sm:$0xf] }
 0x17a   :  { %v6495_v62 = vpop.permute.xlu2 %2481  ;;  %v1198_v13 = vor.u32 %v8860_v1, %v1195_v34  ;;  %v2982_v56 = vsel %vm2978_vm10, %v2887_v31, %v6309_v43  ;;  %v1656_v6 = vrot.slane %v8863_v17, 5  ;;  %v1659_v43 = vrot.slane %v8865_v47, 5 }
 0x17b   :  { %9037 = vst [vmem:[#allocation4_spill] sm:$0xff] %v6495_v62  ;;  %3576 = vmatmul.bf16.vlgmr.msra.gmra.mxu0 %v3305_v8  ;;  %2771 = vrot.lane.b32.xlu1 %v6512_v27, %s4962_s27  ;;  %v1655_v38 = vrot.slane %v8862_v39, 4  ;;  %v1661_v26 = vrot.slane %v8866_v3, 4  ;;  %v6539_v8 = vpack.c.b16 %v2052_v46, %v2051_v50  ;;  %v3047_v34 = vsel %vm3043_vm11, %v2982_v56, %v2526_v20  ;;  %v2740_v31 = vpop.permute.xlu0 %2739  ;;  %v6551_v46 = vld [vmem:[#allocation2 + $0x1d8] sm:$0xf] }
 0x17c   :  { %v4809_v1 = vunpack.c.l.bf16 %v4889_v5  ;;  %v4810_v10 = vunpack.c.h.bf16 %v4889_v5  ;;  %v1190_v3 = vsel %vm5677_vm9, %v4474_v40, %v1189_v14  ;;  %v1199_v50 = vsel %vm5677_vm9, %v1191_v49, %v1198_v13 }
 0x17d   :  { %v2600_v22 = vpop.permute.xlu1 %2599  ;;  %v1657_v18 = vor.u32 %v1656_v6, %v1655_v38  ;;  %v1662_v9 = vor.u32 %v1661_v26, %v1659_v43  ;;  %v6553_v20 = vpop.f32.mrf.mxu1  ;;  %v433_v26 = vld [vmem:[#allocation2 + $0x1c8] sm:$0x1] }
 0x17e   :  { %v655_v37 = vld [vmem:[#allocation2 + $0x13c] sm:$0x1]  ;;  %v3112_v17 = vsel %vm3108_vm12, %v3047_v34, %v2600_v22  ;;  %9038 = vst [vmem:[#allocation49_spill] sm:$0xff] %v6553_v20  ;;  %v173_v56 = vmax.f32 %v4809_v1, 0.0  ;;  %v174_v5 = vmax.f32 %v4810_v10, 0.0  ;;  %v8870_v22 = vshrl.u32 %v6541_v29, 16 }
 0x17f   :  { %v1665_v47 = vshll.u32 %v655_v37, 16  ;;  %2747 = vrot.lane.b32.xlu0 %v6539_v8, %s4962_s27  ;;  %v1658_v38 = vrot.slane %v1657_v18, 4  ;;  %v1663_v6 = vrot.slane %v1662_v9, 4  ;;  %v684_v34 = vld [vmem:[#allocation2 + $0x1d0] sm:$0xf]  ;;  %v3177_v40 = vsel %vm3173_vm13, %v3112_v17, %v6438_v0 }
 0x180   :  { %2703 = vrot.lane.b32.xlu2 %v6474_v24, %s4960_s25  ;;  %v434_v14 = vsel %vm5373_vm3, 0, %v433_v26  ;;  %v237_v49 = vpack.c.bf16 %v173_v56, %v173_v56  ;;  %v238_v13 = vpack.c.bf16 %v174_v5, %v174_v5  ;;  %v2077_v18 = vunpack.c.l.b16 %v1190_v3  ;;  %v391_v5 = vld [vmem:[#allocation2 + $0x150] sm:$0x1] }
 0x181   :  { %v1667_v37 = vrot.slane %v1665_v47, 5  ;;  %v1660_v20 = vsel %vm5403_vm6, %v1658_v38, %v1659_v43  ;;  %435 = vst [vmem:[#allocation2 + $0x1c8] sm:$0x1] %v434_v14  ;;  %v8867_v9 = vshrl.u32 %v6551_v46, 16  ;;  %v2078_v17 = vunpack.c.l.b16 %v1199_v50 }
 0x182   :  { %v6544_v39 = vpop.permute.xlu2 %2671  ;;  %v2387_v1 = vunpack.c.l.b16 %v1660_v20  ;;  %558 = vst.msk [vmem:[#allocation2 + $0x148] sm:$0xf] %vm271_vm0, %v237_v49  ;;  %v1201_v47 = vshrl.u32 %v684_v34, 16  ;;  %v6572_v56 = vrot.slane %v8870_v22, 7  ;;  %v3242_v3 = vsel %vm3238_vm14, %v3177_v40, %v2740_v31 }
 0x183   :  { %v1668_v10 = vsel %vm5403_vm6, %v1663_v6, %v1667_v37  ;;  %2607 = vrot.lane.b32.xlu1 %v6341_v53, %s4958_s12  ;;  %559 = vst.msk [vmem:[#allocation2 + $0x14c] sm:$0xf] %vm271_vm0, %v238_v13  ;;  %v8869_v53 = vshll.u32 %v6541_v29, 16  ;;  %v392_v38 = vsel %vm5373_vm3, 0, %v391_v5  ;;  %v2528_v37 = vpop.permute.xlu0 %2527  ;;  %v1217_v31 = vrot.slane %v8867_v9, 7 }
 0x184   :  { %v2388_v0 = vunpack.c.l.b16 %v1668_v10  ;;  %393 = vst [vmem:[#allocation2 + $0x150] sm:$0x1] %v392_v38  ;;  %v8868_v26 = vshll.u32 %v6551_v46, 16  ;;  %v9040_v34 = vshrl.u32 %v6450_v35, 16  ;;  %v9041_v14 = vshll.u32 %v6450_v35, 16 }
 0x185   :  { %v2814_v43 = vpop.permute.xlu1 %2813  ;;  %v9042_v13 = vshll.u32 %v6457_v30, 16  ;;  %v4475_v5 = vrot.slane %v1201_v47, 11  ;;  %v6609_v38 = vpop.f32.mrf.mxu1 }
 0x186   :  { %v6579_v20 = vpack.c.b16 %v2388_v0, %v2387_v1  ;;  %v3308_v50 = vsel %vm3303_vm15, %v3242_v3, %v2814_v43  ;;  %v1725_v40 = vrot.slane %v9040_v34, 4  ;;  %v1726_v49 = vrot.slane %v9041_v14, 5  ;;  %9044 = vst [vmem:[#allocation51_spill] sm:$0xff] %v6609_v38 }
 0x187   :  { %2559 = vrot.lane.b32.xlu0 %v6512_v27, %s4959_s24  ;;  %v1729_v10 = vrot.slane %v9042_v13, 5  ;;  %v9043_v1 = vshrl.u32 %v6457_v30, 16  ;;  %v2890_v3 = vsel %vm2881_vm7, %v6049_v33, %v5951_v32  ;;  %v6604_v43 = vpack.c.b16 %v2078_v17, %v2077_v18  ;;  %v4934_v18 = vld [vmem:[#allocation2 + $0x94] sm:$0xff] }
 0x188   :  { %2535 = vrot.lane.b32.xlu2 %v6539_v8, %s4959_s24  ;;  %9039 = vst [vmem:[#allocation50_spill] sm:$0xff] %v6579_v20  ;;  %4683 = vmatmul.msk.bf16.gmra.mxu1 %vm2881_vm7, %v6579_v20  ;;  %v683_v35 = vld [vmem:[#allocation2 + $0x1c8] sm:$0x1]  ;;  %v1213_v34 = vrot.slane %v6572_v56, 4  ;;  %v1727_v14 = vor.u32 %v1726_v49, %v1725_v40  ;;  %v1220_v32 = vor.u32 %v8868_v26, %v1217_v31  ;;  %v9045_v40 = vld [vmem:[#allocation7_spill] sm:$0xff] }
 0x189   :  { %v1731_v0 = vrot.slane %v9043_v1, 4  ;;  %v1735_v30 = vshll.u32 %v683_v35, 16  ;;  %v6612_v1 = vld [vmem:[#allocation2 + $0x148] sm:$0xf]  ;;  %v2984_v33 = vsel %vm2978_vm10, %v2890_v3, %v6325_v28 }
 0x18a   :  { %v6584_v6 = vpop.permute.xlu2 %2529  ;;  %v6619_v17 = vld [vmem:[#allocation2 + $0x14c] sm:$0xf]  ;;  %v8871_v47 = vshrl.u32 %v6612_v1, 16  ;;  %v3049_v28 = vsel %vm3043_vm11, %v2984_v33, %v2528_v37 }
 0x18b   :  { %3581 = vmatmul.bf16.gmra.mxu0 %v3308_v50  ;;  %v1211_v50 = vor.u32 %v8869_v53, %v6572_v56  ;;  %v1732_v13 = vor.u32 %v1731_v0, %v1729_v10  ;;  %2821 = vrot.lane.b32.xlu1 %v4934_v18, %s4961_s26  ;;  %v8872_v56 = vshll.u32 %v6612_v1, 16  ;;  %v1728_v0 = vrot.slane %v1727_v14, 4  ;;  %v659_v3 = vld [vmem:[#allocation2 + $0x150] sm:$0x1] }
 0x18c   :  { %v1737_v9 = vrot.slane %v1735_v30, 5  ;;  %v8880_v31 = vshrl.u32 %v6619_v17, 16  ;;  %v8879_v26 = vshll.u32 %v6619_v17, 16  ;;  %v1937_v53 = vrot.slane %v8871_v47, 4 }
 0x18d   :  { %v2602_v49 = vpop.permute.xlu1 %2601  ;;  %v1733_v35 = vrot.slane %v1732_v13, 4  ;;  %v1938_v22 = vrot.slane %v8872_v56, 5  ;;  %v1730_v14 = vsel %vm5403_vm6, %v1728_v0, %v1729_v10  ;;  %v2742_v56 = vpop.permute.xlu0 %2741  ;;  %v1212_v10 = vsel %vm5677_vm9, %v4475_v5, %v1211_v50 }
 0x18e   :  { %v3114_v62 = vsel %vm3108_vm12, %v3049_v28, %v2602_v49  ;;  %v1943_v37 = vrot.slane %v8880_v31, 4  ;;  %v2397_v30 = vunpack.c.l.b16 %v1730_v14  ;;  %v1941_v20 = vrot.slane %v8879_v26, 5 }
 0x18f   :  { %v1738_v13 = vsel %vm5403_vm6, %v1733_v35, %v1737_v9  ;;  %2773 = vrot.lane.b32.xlu0 %v6604_v43, %s4962_s27  ;;  %v1939_v47 = vor.u32 %v1938_v22, %v1937_v53  ;;  %v1947_v49 = vshll.u32 %v659_v3, 16  ;;  %v3179_v9 = vsel %vm3173_vm13, %v3114_v62, %v6544_v39  ;;  %v6653_v22 = vpop.f32.mrf.mxu1 }
 0x190   :  { %2749 = vrot.lane.b32.xlu2 %v9045_v40, %s4962_s27  ;;  %v2398_v33 = vunpack.c.l.b16 %v1738_v13  ;;  %v1221_v28 = vsel %vm5677_vm9, %v1213_v34, %v1220_v32  ;;  %v1944_v14 = vor.u32 %v1943_v37, %v1941_v20  ;;  %v2079_v62 = vunpack.c.l.b16 %v1212_v10  ;;  %v398_v34 = vld [vmem:[#allocation2 + $0x164] sm:$0x1]  ;;  %v6678_v10 = vld [vmem:[#allocation2 + $0x160] sm:$0xf] }
 0x191   :  { %v1940_v35 = vrot.slane %v1939_v47, 4  ;;  %v1949_v13 = vrot.slane %v1947_v49, 5  ;;  %v3244_v39 = vsel %vm3238_vm14, %v3179_v9, %v2742_v56  ;;  %v2080_v32 = vunpack.c.l.b16 %v1221_v28  ;;  %v6676_v49 = vld [vmem:[#allocation2 + $0x15c] sm:$0xf] }
 0x192   :  { %v6632_v38 = vpop.permute.xlu2 %2743  ;;  %v6649_v0 = vpack.c.b16 %v2398_v33, %v2397_v30  ;;  %v1945_v50 = vrot.slane %v1944_v14, 4  ;;  %v440_v9 = vld [vmem:[#allocation2 + $0x1dc] sm:$0x1]  ;;  %v8878_v28 = vshrl.u32 %v6676_v49, 16  ;;  %v8875_v14 = vshll.u32 %v6676_v49, 16 }
 0x193   :  { %2633 = vrot.lane.b32.xlu1 %v6407_v44, %s4958_s12  ;;  %v1942_v53 = vsel %vm5403_vm6, %v1940_v35, %v1941_v20  ;;  %v399_v44 = vsel %vm5373_vm3, 0, %v398_v34  ;;  %v6672_v56 = vpack.c.b16 %v2080_v32, %v2079_v62  ;;  %v4935_v62 = vld [vmem:[#allocation2 + $0x1c0] sm:$0xff]  ;;  %v9046_v26 = vshrl.u32 %v6541_v29, 16 }
 0x194   :  { %4688 = vmatmul.msk.bf16.gmra.mxu3 %vm2881_vm7, %v6649_v0  ;;  %v2661_v47 = vunpack.c.l.b16 %v1942_v53  ;;  %v1950_v37 = vsel %vm5403_vm6, %v1945_v50, %v1949_v13  ;;  %400 = vst [vmem:[#allocation2 + $0x164] sm:$0x1] %v399_v44  ;;  %v8877_v13 = vshrl.u32 %v6678_v10, 16  ;;  %v2893_v53 = vsel %vm2881_vm7, %v6073_v25, %v6005_v54 }
 0x195   :  { %v2816_v5 = vpop.permute.xlu1 %2815  ;;  %v2662_v30 = vunpack.c.l.b16 %v1950_v37  ;;  %v2604_v35 = vpop.permute.xlu0 %2603  ;;  %v2010_v50 = vrot.slane %v8875_v14, 5  ;;  %v2986_v34 = vsel %vm2978_vm10, %v2893_v53, %v6245_v57  ;;  %v1739_v31 = vrot.slane %v9046_v26, 4 }
 0x196   :  { %v3311_v3 = vsel %vm3303_vm15, %v3244_v39, %v2816_v5  ;;  %v441_v39 = vsel %vm5373_vm3, 0, %v440_v9  ;;  %v2009_v5 = vrot.slane %v8878_v28, 4  ;;  %v2015_v25 = vrot.slane %v8877_v13, 4 }
 0x197   :  { %2609 = vrot.lane.b32.xlu0 %v4934_v18, %s4958_s12  ;;  %v6674_v33 = vpack.c.b16 %v2662_v30, %v2661_v47  ;;  %v8876_v18 = vshll.u32 %v6678_v10, 16  ;;  %442 = vst [vmem:[#allocation2 + $0x1dc] sm:$0x1] %v441_v39  ;;  %v6704_v32 = vpop.f32.mrf.mxu1  ;;  %v3051_v44 = vsel %vm3043_vm11, %v2986_v34, %v6584_v6  ;;  %v9047_v6 = vshll.u32 %v6541_v29, 16 }
 0x198   :  { %2561 = vrot.lane.b32.xlu2 %v6604_v43, %s4959_s24  ;;  %v2011_v30 = vor.u32 %v2010_v50, %v2009_v5  ;;  %v3116_v39 = vsel %vm3108_vm12, %v3051_v44, %v2604_v35  ;;  %v9048_v5 = vshll.u32 %v6551_v46, 16 }
 0x199   :  { %4684 = vmatmul.msk.bf16.gmra.mxu1 %vm2881_vm7, %v6674_v33  ;;  %v2013_v54 = vrot.slane %v8876_v18, 5  ;;  %v4936_v18 = vld [vmem:[#allocation2 + $0xa8] sm:$0xff]  ;;  %v1740_v34 = vrot.slane %v9047_v6, 5 }
 0x19a   :  { %v6667_v20 = vpop.permute.xlu2 %2555  ;;  %v2012_v57 = vrot.slane %v2011_v30, 4  ;;  %v1743_v50 = vrot.slane %v9048_v5, 5 }
 0x19b   :  { %3586 = vmatmul.bf16.gmra.mxu0 %v3311_v3  ;;  %2847 = vrot.lane.b32.xlu1 %v4935_v62, %s4961_s26  ;;  %v663_v3 = vld [vmem:[#allocation2 + $0x164] sm:$0x1]  ;;  %v2016_v9 = vor.u32 %v2015_v25, %v2013_v54  ;;  %v9049_v25 = vshrl.u32 %v6551_v46, 16  ;;  %v1741_v29 = vor.u32 %v1740_v34, %v1739_v31 }
 0x19c   :  { %v2019_v14 = vshll.u32 %v663_v3, 16  ;;  %v2014_v35 = vsel %vm5403_vm6, %v2012_v57, %v2013_v54 }
 0x19d   :  { %v2674_v47 = vpop.permute.xlu1 %2673  ;;  %v2017_v53 = vrot.slane %v2016_v9, 4  ;;  %v1745_v3 = vrot.slane %v9049_v25, 4  ;;  %v2818_v9 = vpop.permute.xlu0 %2817  ;;  %v1742_v6 = vrot.slane %v1741_v29, 4  ;;  %v4938_v25 = vld [vmem:[#allocation2 + $0x1d4] sm:$0xff] }
 0x19e   :  { %v3181_v13 = vsel %vm3173_vm13, %v3116_v39, %v2674_v47  ;;  %v2021_v28 = vrot.slane %v2019_v14, 5  ;;  %v2875_v14 = vunpack.c.l.b16 %v2014_v35  ;;  %v687_v44 = vld [vmem:[#allocation2 + $0x1dc] sm:$0x1]  ;;  %v447_v35 = vld [vmem:[#allocation2 + $0x1f0] sm:$0x1] }
 0x19f   :  { %2823 = vrot.lane.b32.xlu0 %v4936_v18, %s4961_s26  ;;  %v1746_v30 = vor.u32 %v1745_v3, %v1743_v50  ;;  %v3246_v46 = vsel %vm3238_vm14, %v3181_v13, %v6632_v38  ;;  %v1749_v39 = vshll.u32 %v687_v44, 16  ;;  %v690_v44 = vld [vmem:[#allocation2 + $0x1ec] sm:$0xf] }
 0x1a0   :  { %2775 = vrot.lane.b32.xlu2 %v6672_v56, %s4962_s27  ;;  %v2022_v47 = vsel %vm5403_vm6, %v2017_v53, %v2021_v28  ;;  %v6732_v53 = vpop.f32.mrf.mxu1  ;;  %v3314_v31 = vsel %vm3303_vm15, %v3246_v46, %v2818_v9  ;;  %v688_v9 = vld [vmem:[#allocation2 + $0x1e4] sm:$0xf] }
 0x1a1   :  { %v2876_v26 = vunpack.c.l.b16 %v2022_v47  ;;  %v1747_v54 = vrot.slane %v1746_v30, 4  ;;  %v1751_v28 = vrot.slane %v1749_v39, 5  ;;  %9050 = vst [vmem:[#allocation7_spill] sm:$0xff] %v6732_v53  ;;  %v6771_v30 = vld [vmem:[#allocation2 + $0x1e8] sm:$0xff]  ;;  %v1237_v39 = vshrl.u32 %v690_v44, 16 }
 0x1a2   :  { %v6708_v37 = vpop.permute.xlu2 %2769 }
 0x1a3   :  { %2679 = vrot.lane.b32.xlu1 %v5823_v16, %s4960_s25  ;;  %v2879_v16 = vpack.c.b16 %v2876_v26, %v2875_v14  ;;  %v1752_v38 = vsel %vm5403_vm6, %v1747_v54, %v1751_v28  ;;  %v448_v14 = vsel %vm5373_vm3, 0, %v447_v35  ;;  %v689_v26 = vld [vmem:[#allocation2 + $0x1e8] sm:$0xf] }
 0x1a4   :  { %v2400_v34 = vunpack.c.l.b16 %v1752_v38  ;;  %449 = vst [vmem:[#allocation2 + $0x1f0] sm:$0x1] %v448_v14  ;;  %v1231_v46 = vshll.u32 %v689_v26, 16 }
 0x1a5   :  { %v2630_v47 = vpop.permute.xlu0 %2629 }
 0x1a7   :  { %2635 = vrot.lane.b32.xlu0 %v4935_v62, %s4958_s12  ;;  %v6745_v62 = vld [vmem:[#allocation2 + $0xbc] sm:$0xff] }
 0x1a8   :  { %2611 = vrot.lane.b32.xlu2 %v4936_v18, %s4958_s12  ;;  %v1744_v18 = vsel %vm5403_vm6, %v1742_v6, %v1743_v50  ;;  %v6754_v3 = vpop.f32.mrf.mxu1  ;;  %v1240_v6 = vshll.u32 %v690_v44, 16 }
 0x1a9   :  { %v2399_v13 = vunpack.c.l.b16 %v1744_v18  ;;  %4685 = vmatmul.msk.bf16.gmra.mxu1 %vm2881_vm7, %v2879_v16  ;;  %9051 = vst [vmem:[#allocation52_spill] sm:$0xff] %v6754_v3  ;;  %v1754_v16 = vrot.slane %v1231_v46, 5  ;;  %v1759_v18 = vrot.slane %v1237_v39, 4 }
 0x1aa   :  { %v6730_v57 = vpop.permute.xlu2 %2605 }
 0x1ab   :  { %3591 = vmatmul.bf16.gmra.mxu0 %v3314_v31  ;;  %2491 = vrot.lane.b32.xlu1 %v6474_v24, %s4957_s23  ;;  %v6743_v5 = vpack.c.b16 %v2400_v34, %v2399_v13  ;;  %v1757_v31 = vrot.slane %v1240_v6, 5  ;;  %v691_v13 = vld [vmem:[#allocation2 + $0x1f0] sm:$0x1]  ;;  %v1239_v34 = vrot.slane %v1237_v39, 7 }
 0x1ac   :  { %v1763_v14 = vshll.u32 %v691_v13, 16 }
 0x1ad   :  { %4689 = vmatmul.msk.bf16.gmra.mxu3 %vm2881_vm7, %v6743_v5  ;;  %v1760_v35 = vor.u32 %v1759_v18, %v1757_v31  ;;  %v2844_v44 = vpop.permute.xlu0 %2843 }
 0x1ae   :  { %v1765_v3 = vrot.slane %v1763_v14, 5 }
 0x1af   :  { %2849 = vrot.lane.b32.xlu0 %v4938_v25, %s4961_s26 }
 0x1b0   :  { %2825 = vrot.lane.b32.xlu2 %v6745_v62, %s4961_s26  ;;  %v6765_v29 = vpop.f32.mrf.mxu1 }
 0x1b1   :  { %9052 = vst [vmem:[#allocation53_spill] sm:$0xff] %v6765_v29  ;;  %v1761_v29 = vrot.slane %v1760_v35, 4 }
 0x1b2   :  { %v6751_v50 = vpop.permute.xlu2 %2819 }
 0x1b3   :  { %2705 = vrot.lane.b32.xlu1 %v6649_v0, %s4960_s25  ;;  %v1766_v53 = vsel %vm5403_vm6, %v1761_v29, %v1765_v3 }
 0x1b4   :  { %v2402_v35 = vunpack.c.l.b16 %v1766_v53  ;;  %v693_v53 = vld [vmem:[#allocation2 + $0x1fc] sm:$0xf] }
 0x1b7   :  { %2681 = vrot.lane.b32.xlu0 %v5863_v4, %s4960_s25  ;;  %v1228_v4 = vshrl.u32 %v689_v26, 16 }
 0x1b8   :  { %2637 = vrot.lane.b32.xlu2 %v4938_v25, %s4958_s12 }
 0x1b9   :  { %4686 = vmatmul.msk.bf16.gmra.mxu1 %vm2881_vm7, %v6442_v61  ;;  %v1753_v28 = vrot.slane %v1228_v4, 4  ;;  %v1223_v61 = vshrl.u32 %v688_v9, 16  ;;  %v1230_v38 = vrot.slane %v1228_v4, 7  ;;  %v2932_v4 = vsel %vm2881_vm7, %v6228_v51, %v6154_v48 }
 0x1ba   :  { %v6759_v24 = vpop.permute.xlu2 %2631  ;;  %v2486_v26 = vpop.permute.xlu1 %2485 }
 0x1bb   :  { %2537 = vrot.lane.b32.xlu1 %v9045_v40, %s4959_s24  ;;  %v1755_v25 = vor.u32 %v1754_v16, %v1753_v28  ;;  %v4476_v9 = vrot.slane %v1223_v61, 11  ;;  %v1233_v39 = vor.u32 %v1231_v46, %v1230_v38  ;;  %v1235_v28 = vrot.slane %v1230_v38, 4  ;;  %v2676_v38 = vpop.permute.xlu0 %2675 }
 0x1bc   :  { %v1242_v16 = vor.u32 %v1240_v6, %v1239_v34 }
 0x1bd   :  { %v1234_v48 = vsel %vm5677_vm9, %v4476_v9, %v1233_v39 }
 0x1be   :  { %v1243_v46 = vsel %vm5677_vm9, %v1235_v28, %v1242_v16  ;;  %v2081_v3 = vunpack.c.l.b16 %v1234_v48  ;;  %v1253_v16 = vshll.u32 %v693_v53, 16 }
 0x1bf   :  { %2493 = vrot.lane.b32.xlu0 %v6649_v0, %s4957_s23  ;;  %v1756_v0 = vrot.slane %v1755_v25, 4  ;;  %v2082_v29 = vunpack.c.l.b16 %v1243_v46 }
 0x1c0   :  { %2851 = vrot.lane.b32.xlu2 %v6771_v30, %s4961_s26 }
 0x1c1   :  { %v1758_v13 = vsel %vm5403_vm6, %v1756_v0, %v1757_v31  ;;  %v1250_v0 = vshrl.u32 %v693_v53, 16  ;;  %v6818_v9 = vpack.c.b16 %v2082_v29, %v2081_v3  ;;  %v454_v29 = vld [vmem:[#allocation2 + $0x204] sm:$0x1] }
 0x1c2   :  { %v6775_v54 = vpop.permute.xlu2 %2845  ;;  %v2401_v25 = vunpack.c.l.b16 %v1758_v13 }
 0x1c3   :  { %2751 = vrot.lane.b32.xlu1 %v6094_v55, %s4962_s27  ;;  %v2700_v61 = vpop.permute.xlu1 %2699  ;;  %v1252_v28 = vrot.slane %v1250_v0, 7 }
 0x1c4   :  { %v6795_v51 = vpack.c.b16 %v2402_v35, %v2401_v25 }
 0x1c5   :  { %v1255_v3 = vor.u32 %v1253_v16, %v1252_v28 }
 0x1c6   :  { %4690 = vmatmul.msk.bf16.gmra.mxu3 %vm2881_vm7, %v6795_v51 }
 0x1c7   :  { %2707 = vrot.lane.b32.xlu0 %v6743_v5, %s4960_s25 }
 0x1c8   :  { %2683 = vrot.lane.b32.xlu2 %v5859_v59, %s4960_s25  ;;  %v3012_v59 = vsel %vm2978_vm10, %v2932_v4, %v2486_v26  ;;  %v692_v4 = vld [vmem:[#allocation2 + $0x1f8] sm:$0xf] }
 0x1c9   :  { %v3077_v6 = vsel %vm3043_vm11, %v3012_v59, %v6667_v20  ;;  %v694_v20 = vld [vmem:[#allocation2 + $0x200] sm:$0xf]  ;;  %v1245_v39 = vshrl.u32 %v692_v4, 16 }
 0x1ca   :  { %v6786_v18 = vpop.permute.xlu2 %2677  ;;  %v3142_v31 = vsel %vm3108_vm12, %v3077_v6, %v2630_v47  ;;  %v1259_v47 = vshrl.u32 %v694_v20, 16  ;;  %v1262_v25 = vshll.u32 %v694_v20, 16  ;;  %v2488_v6 = vpop.permute.xlu0 %2487 }
 0x1cb   :  { %2563 = vrot.lane.b32.xlu1 %v6672_v56, %s4959_s24  ;;  %v3207_v34 = vsel %vm3173_vm13, %v3142_v31, %v2700_v61  ;;  %v2532_v59 = vpop.permute.xlu1 %2531  ;;  %v4477_v53 = vrot.slane %v1245_v39, 11  ;;  %v1257_v31 = vrot.slane %v1252_v28, 4  ;;  %v696_v28 = vld [vmem:[#allocation2 + $0x20c] sm:$0xf] }
 0x1cc   :  { %v3272_v26 = vsel %vm3238_vm14, %v3207_v34, %v6708_v37  ;;  %v9053_v37 = vld [vmem:[#allocation5_spill] sm:$0xff]  ;;  %v6836_v34 = vld [vmem:[#allocation2 + $0x210] sm:$0xf] }
 0x1cd   :  { %v2896_v13 = vsel %vm2881_vm7, %v5710_v36, %v9053_v37  ;;  %v455_v36 = vsel %vm5373_vm3, 0, %v454_v29  ;;  %v1256_v20 = vsel %vm5677_vm9, %v4477_v53, %v1255_v3  ;;  %v1773_v53 = vrot.slane %v1259_v47, 4 }
 0x1ce   :  { %v2988_v35 = vsel %vm2978_vm10, %v2896_v13, %v6327_v11  ;;  %456 = vst [vmem:[#allocation2 + $0x204] sm:$0x1] %v455_v36  ;;  %v2083_v13 = vunpack.c.l.b16 %v1256_v20  ;;  %v1267_v29 = vshrl.u32 %v696_v28, 16  ;;  %v2935_v28 = vsel %vm2881_vm7, %v6271_v23, %v6045_v2 }
 0x1cf   :  { %2539 = vrot.lane.b32.xlu0 %v6094_v55, %s4959_s24  ;;  %v3053_v46 = vsel %vm3043_vm11, %v2988_v35, %v2532_v59  ;;  %v1768_v35 = vrot.slane %v1253_v16, 5  ;;  %v4940_v16 = vld [vmem:[#allocation2 + $0xd0] sm:$0xff] }
 0x1d0   :  { %2495 = vrot.lane.b32.xlu2 %v6743_v5, %s4957_s23  ;;  %v3353_v5 = vsel %vm3303_vm15, %v3272_v26, %v2844_v44  ;;  %v1261_v44 = vrot.slane %v1259_v47, 7  ;;  %v3118_v11 = vsel %vm3108_vm12, %v3053_v46, %v6730_v57  ;;  %v6844_v26 = vld [vmem:[#allocation2 + $0x214] sm:$0xf]  ;;  %v1771_v46 = vrot.slane %v1262_v25, 5 }
 0x1d1   :  { %3656 = vmatmul.bf16.vlgmr.msra.gmra.mxu2 %v3353_v5  ;;  %v1272_v5 = vshrl.u32 %v6836_v34, 16  ;;  %v3183_v4 = vsel %vm3173_vm13, %v3118_v11, %v2676_v38  ;;  %v8881_v59 = vshrl.u32 %v6844_v26, 16  ;;  %v1767_v38 = vrot.slane %v1250_v0, 4 }
 0x1d2   :  { %v6811_v14 = vpop.permute.xlu2 %2489  ;;  %v1264_v61 = vor.u32 %v1262_v25, %v1261_v44  ;;  %v1284_v0 = vshll.u32 %v6844_v26, 16 }
 0x1d3   :  { %2777 = vrot.lane.b32.xlu1 %v6818_v9, %s4962_s27  ;;  %v1274_v36 = vrot.slane %v1272_v5, 7  ;;  %v1769_v20 = vor.u32 %v1768_v35, %v1767_v38 }
 0x1d4   :  { %v1265_v57 = vsel %vm5677_vm9, %v1257_v31, %v1264_v61  ;;  %v1275_v31 = vshll.u32 %v6836_v34, 16 }
 0x1d5   :  { %v2084_v3 = vunpack.c.l.b16 %v1265_v57  ;;  %v695_v11 = vld [vmem:[#allocation2 + $0x204] sm:$0x1]  ;;  %v1770_v47 = vrot.slane %v1769_v20, 4 }
 0x1d6   :  { %v1277_v38 = vor.u32 %v1275_v31, %v1274_v36 }
 0x1d7   :  { %2753 = vrot.lane.b32.xlu0 %v6123_v7, %s4962_s27  ;;  %v1772_v20 = vsel %vm5403_vm6, %v1770_v47, %v1771_v46 }
 0x1d8   :  { %2709 = vrot.lane.b32.xlu2 %v6795_v51, %s4960_s25  ;;  %v2403_v23 = vunpack.c.l.b16 %v1772_v20 }
 0x1da   :  { %v6829_v48 = vpop.permute.xlu2 %2703 }
 0x1db   :  { %2613 = vrot.lane.b32.xlu1 %v6745_v62, %s4958_s12  ;;  %v2746_v39 = vpop.permute.xlu1 %2745 }
 0x1dc   :  { %v3248_v37 = vsel %vm3238_vm14, %v3183_v4, %v2746_v39  ;;  %v1774_v4 = vor.u32 %v1773_v53, %v1771_v46  ;;  %v1283_v39 = vrot.slane %v8881_v59, 7  ;;  %v1279_v53 = vrot.slane %v1274_v36, 4 }
 0x1dd   :  { %v3317_v44 = vsel %vm3303_vm15, %v3248_v37, %v6751_v50  ;;  %v1777_v50 = vshll.u32 %v695_v11, 16  ;;  %v6872_v37 = vpack.c.b16 %v2084_v3, %v2083_v13  ;;  %v3014_v11 = vsel %vm2978_vm10, %v2935_v28, %v2488_v6 }
 0x1de   :  { %3596 = vmatmul.bf16.gmra.mxu0 %v3317_v44  ;;  %v1775_v25 = vrot.slane %v1774_v4, 4  ;;  %v4478_v44 = vrot.slane %v1267_v29, 11 }
 0x1df   :  { %2565 = vrot.lane.b32.xlu0 %v6818_v9, %s4959_s24  ;;  %v1779_v57 = vrot.slane %v1777_v50, 5  ;;  %v1286_v50 = vor.u32 %v1284_v0, %v1283_v39 }
 0x1e0   :  { %2541 = vrot.lane.b32.xlu2 %v6123_v7, %s4959_s24  ;;  %v1278_v46 = vsel %vm5677_vm9, %v4478_v44, %v1277_v38  ;;  %v461_v38 = vld [vmem:[#allocation2 + $0x218] sm:$0x1] }
 0x1e1   :  { %v2702_v61 = vpop.permute.xlu0 %2701  ;;  %v1780_v4 = vsel %vm5403_vm6, %v1775_v25, %v1779_v57  ;;  %v1287_v36 = vsel %vm5677_vm9, %v1279_v53, %v1286_v50  ;;  %v2085_v25 = vunpack.c.l.b16 %v1278_v46  ;;  %v4941_v53 = vld [vmem:[#allocation2 + $0x1fc] sm:$0xff]  ;;  %v1785_v46 = vrot.slane %v1284_v0, 5 }
 0x1e2   :  { %v6853_v62 = vpop.permute.xlu2 %2535  ;;  %v2404_v13 = vunpack.c.l.b16 %v1780_v4 }
 0x1e3   :  { %2827 = vrot.lane.b32.xlu1 %v4940_v16, %s4961_s26  ;;  %v2558_v35 = vpop.permute.xlu1 %2557 }
 0x1e4   :  { %v3079_v2 = vsel %vm3043_vm11, %v3014_v11, %v2558_v35  ;;  %v6886_v29 = vpack.c.b16 %v2404_v13, %v2403_v23  ;;  %v9054_v11 = vld [vmem:[#allocation6_spill] sm:$0xff] }
 0x1e5   :  { %v3144_v6 = vsel %vm3108_vm12, %v3079_v2, %v6759_v24  ;;  %v2086_v24 = vunpack.c.l.b16 %v1287_v36  ;;  %v2899_v20 = vsel %vm2881_vm7, %v5791_v45, %v9054_v11  ;;  %v4942_v23 = vld [vmem:[#allocation2 + $0xe4] sm:$0xff]  ;;  %v1781_v45 = vrot.slane %v1272_v5, 4 }
 0x1e6   :  { %4691 = vmatmul.msk.bf16.gmra.mxu3 %vm2881_vm7, %v6886_v29  ;;  %v3209_v39 = vsel %vm3173_vm13, %v3144_v6, %v2702_v61  ;;  %v462_v61 = vsel %vm5373_vm3, 0, %v461_v38  ;;  %v1782_v6 = vrot.slane %v1275_v31, 5 }
 0x1e7   :  { %2779 = vrot.lane.b32.xlu0 %v6872_v37, %s4962_s27  ;;  %v6907_v35 = vpack.c.b16 %v2086_v24, %v2085_v25  ;;  %463 = vst [vmem:[#allocation2 + $0x218] sm:$0x1] %v462_v61 }
 0x1e8   :  { %2755 = vrot.lane.b32.xlu2 %v5983_v63, %s4962_s27 }
 0x1e9   :  { %v2534_v3 = vpop.permute.xlu0 %2533 }
 0x1ea   :  { %v6877_v59 = vpop.permute.xlu2 %2749 }
 0x1eb   :  { %2639 = vrot.lane.b32.xlu1 %v6771_v30, %s4958_s12 }
 0x1ed   :  { %v2772_v47 = vpop.permute.xlu1 %2771 }
 0x1ee   :  { %v3274_v57 = vsel %vm3238_vm14, %v3209_v39, %v2772_v47  ;;  %v699_v39 = vld [vmem:[#allocation2 + $0x218] sm:$0x1]  ;;  %v1783_v47 = vor.u32 %v1782_v6, %v1781_v45  ;;  %v4944_v45 = vld [vmem:[#allocation2 + $0x210] sm:$0xff] }
 0x1ef   :  { %v3356_v44 = vsel %vm3303_vm15, %v3274_v57, %v6775_v54  ;;  %2615 = vrot.lane.b32.xlu0 %v4940_v16, %s4958_s12  ;;  %v2990_v54 = vsel %vm2978_vm10, %v2899_v20, %v6345_v19  ;;  %v9055_v19 = vshrl.u32 %v6844_v26, 16  ;;  %v1791_v24 = vshll.u32 %v699_v39, 16  ;;  %v9056_v20 = vld [vmem:[#allocation26_spill] sm:$0xff] }
 0x1f0   :  { %2567 = vrot.lane.b32.xlu2 %v6872_v37, %s4959_s24  ;;  %3661 = vmatmul.bf16.gmra.mxu2 %v3356_v44  ;;  %v3055_v4 = vsel %vm3043_vm11, %v2990_v54, %v2534_v3  ;;  %v1784_v31 = vrot.slane %v1783_v47, 4  ;;  %v2938_v54 = vsel %vm2881_vm7, %v6299_v41, %v9056_v20  ;;  %v9058_v47 = vld [vmem:[#allocation14_spill] sm:$0xff] }
 0x1f1   :  { %v2748_v30 = vpop.permute.xlu0 %2747  ;;  %v1787_v36 = vrot.slane %v9055_v19, 4  ;;  %v1793_v57 = vrot.slane %v1791_v24, 5  ;;  %v701_v24 = vld [vmem:[#allocation2 + $0x224] sm:$0xf] }
 0x1f2   :  { %v6902_v28 = vpop.permute.xlu2 %2561  ;;  %v1297_v20 = vshll.u32 %v701_v24, 16 }
 0x1f3   :  { %2853 = vrot.lane.b32.xlu1 %v4941_v53, %s4961_s26  ;;  %v1788_v25 = vor.u32 %v1787_v36, %v1785_v46  ;;  %v9057_v36 = vld [vmem:[#allocation11_spill] sm:$0xff] }
 0x1f5   :  { %v2608_v16 = vpop.permute.xlu1 %2607  ;;  %v1789_v0 = vrot.slane %v1788_v25, 4  ;;  %v2902_v25 = vsel %vm2881_vm7, %v6425_v15, %v9058_v47  ;;  %v9062_v47 = vld [vmem:[#allocation30_spill] sm:$0xff] }
 0x1f6   :  { %v3120_v2 = vsel %vm3108_vm12, %v3055_v4, %v2608_v16  ;;  %v6951_v16 = vld [vmem:[#allocation2 + $0xf8] sm:$0xff] }
 0x1f7   :  { %2829 = vrot.lane.b32.xlu0 %v4942_v23, %s4961_s26  ;;  %v3185_v3 = vsel %vm3173_vm13, %v3120_v2, %v6786_v18  ;;  %v1794_v18 = vsel %vm5403_vm6, %v1789_v0, %v1793_v57  ;;  %v6986_v57 = vld [vmem:[#allocation2 + $0x224] sm:$0xff] }
 0x1f8   :  { %2781 = vrot.lane.b32.xlu2 %v6907_v35, %s4962_s27  ;;  %v3250_v5 = vsel %vm3238_vm14, %v3185_v3, %v2748_v30  ;;  %v2406_v61 = vunpack.c.l.b16 %v1794_v18  ;;  %v468_v3 = vld [vmem:[#allocation2 + $0x22c] sm:$0x1] }
 0x1f9   :  { %v2560_v13 = vpop.permute.xlu0 %2559 }
 0x1fa   :  { %v6920_v50 = vpop.permute.xlu2 %2775 }
 0x1fb   :  { %2685 = vrot.lane.b32.xlu1 %v5879_v60, %s4960_s25  ;;  %v1786_v60 = vsel %vm5403_vm6, %v1784_v31, %v1785_v46 }
 0x1fc   :  { %v2405_v38 = vunpack.c.l.b16 %v1786_v60  ;;  %v1294_v60 = vshrl.u32 %v701_v24, 16 }
 0x1fd   :  { %v2822_v34 = vpop.permute.xlu1 %2821 }
 0x1fe   :  { %v3320_v26 = vsel %vm3303_vm15, %v3250_v5, %v2822_v34  ;;  %v6944_v11 = vpack.c.b16 %v2406_v61, %v2405_v38  ;;  %v702_v5 = vld [vmem:[#allocation2 + $0x228] sm:$0xf]  ;;  %v9059_v34 = vld [vmem:[#allocation36_spill] sm:$0xff] }
 0x1ff   :  { %3601 = vmatmul.bf16.gmra.mxu0 %v3320_v26  ;;  %2641 = vrot.lane.b32.xlu0 %v4941_v53, %s4958_s12  ;;  %v3016_v53 = vsel %vm2978_vm10, %v2938_v54, %v6811_v14  ;;  %v2992_v31 = vsel %vm2978_vm10, %v2902_v25, %v9059_v34  ;;  %v1303_v18 = vshrl.u32 %v702_v5, 16  ;;  %v1306_v54 = vshll.u32 %v702_v5, 16 }
 0x200   :  { %2617 = vrot.lane.b32.xlu2 %v4942_v23, %s4958_s12  ;;  %4692 = vmatmul.msk.bf16.gmra.mxu3 %vm2881_vm7, %v6944_v11  ;;  %v3081_v2 = vsel %vm3043_vm11, %v3016_v53, %v2560_v13  ;;  %v3057_v0 = vsel %vm3043_vm11, %v2992_v31, %v6853_v62  ;;  %v2941_v25 = vsel %vm2881_vm7, %v6512_v27, %v9062_v47 }
 0x201   :  { %v2774_v30 = vpop.permute.xlu0 %2773 }
 0x202   :  { %v6937_v44 = vpop.permute.xlu2 %2611 }
 0x203   :  { %2497 = vrot.lane.b32.xlu1 %v6795_v51, %s4957_s23 }
 0x205   :  { %v2634_v4 = vpop.permute.xlu1 %2633 }
 0x206   :  { %v3146_v51 = vsel %vm3108_vm12, %v3081_v2, %v2634_v4  ;;  %v1795_v4 = vrot.slane %v1294_v60, 4 }
 0x207   :  { %2855 = vrot.lane.b32.xlu0 %v4944_v45, %s4961_s26  ;;  %v3211_v6 = vsel %vm3173_vm13, %v3146_v51, %v6829_v48  ;;  %v469_v48 = vsel %vm5373_vm3, 0, %v468_v3  ;;  %v9060_v3 = vld [vmem:[#allocation24_spill] sm:$0xff] }
 0x208   :  { %2831 = vrot.lane.b32.xlu2 %v6951_v16, %s4961_s26  ;;  %v3276_v14 = vsel %vm3238_vm14, %v3211_v6, %v2774_v30  ;;  %470 = vst [vmem:[#allocation2 + $0x22c] sm:$0x1] %v469_v48  ;;  %v700_v30 = vld [vmem:[#allocation2 + $0x220] sm:$0xf]  ;;  %v1801_v6 = vrot.slane %v1303_v18, 4 }
 0x209   :  { %v2610_v41 = vpop.permute.xlu0 %2609 }
 0x20a   :  { %v6960_v23 = vpop.permute.xlu2 %2825  ;;  %v3122_v26 = vsel %vm3108_vm12, %v3057_v0, %v2610_v41  ;;  %v1799_v41 = vrot.slane %v1306_v54, 5 }
 0x20b   :  { %2711 = vrot.lane.b32.xlu1 %v6886_v29, %s4960_s25 }
 0x20c   :  { %v1802_v48 = vor.u32 %v1801_v6, %v1799_v41 }
 0x20d   :  { %v2848_v46 = vpop.permute.xlu1 %2847 }
 0x20e   :  { %v3359_v13 = vsel %vm3303_vm15, %v3276_v14, %v2848_v46  ;;  %v1289_v14 = vshrl.u32 %v700_v30, 16  ;;  %v1296_v46 = vrot.slane %v1294_v60, 7  ;;  %v1803_v34 = vrot.slane %v1802_v48, 4 }
 0x20f   :  { %3666 = vmatmul.bf16.gmra.mxu2 %v3359_v13  ;;  %2687 = vrot.lane.b32.xlu0 %v9057_v36, %s4960_s25  ;;  %v703_v51 = vld [vmem:[#allocation2 + $0x22c] sm:$0x1]  ;;  %v1305_v13 = vrot.slane %v1303_v18, 7 }
 0x210   :  { %2643 = vrot.lane.b32.xlu2 %v4944_v45, %s4958_s12  ;;  %v1796_v45 = vrot.slane %v1297_v20, 5  ;;  %v1805_v36 = vshll.u32 %v703_v51, 16  ;;  %v4479_v31 = vrot.slane %v1289_v14, 11  ;;  %v1299_v0 = vor.u32 %v1297_v20, %v1296_v46 }
 0x211   :  { %v2824_v39 = vpop.permute.xlu0 %2823 }
 0x212   :  { %v6971_v19 = vpop.permute.xlu2 %2637  ;;  %v1300_v20 = vsel %vm5677_vm9, %v4479_v31, %v1299_v0 }
 0x213   :  { %2543 = vrot.lane.b32.xlu1 %v5983_v63, %s4959_s24 }
 0x215   :  { %v2680_v15 = vpop.permute.xlu1 %2679 }
 0x216   :  { %v3187_v38 = vsel %vm3173_vm13, %v3122_v26, %v2680_v15  ;;  %v1301_v26 = vrot.slane %v1296_v46, 4  ;;  %v1308_v15 = vor.u32 %v1306_v54, %v1305_v13 }
 0x217   :  { %v3252_v62 = vsel %vm3238_vm14, %v3187_v38, %v6877_v59  ;;  %2499 = vrot.lane.b32.xlu0 %v6886_v29, %s4957_s23  ;;  %v1797_v59 = vor.u32 %v1796_v45, %v1795_v4  ;;  %v9061_v29 = vld [vmem:[#allocation10_spill] sm:$0xff]  ;;  %v2087_v45 = vunpack.c.l.b16 %v1300_v20 }
 0x218   :  { %2857 = vrot.lane.b32.xlu2 %v6986_v57, %s4961_s26  ;;  %v3323_v53 = vsel %vm3303_vm15, %v3252_v62, %v2824_v39  ;;  %v1807_v39 = vrot.slane %v1805_v36, 5  ;;  %v1309_v54 = vsel %vm5677_vm9, %v1301_v26, %v1308_v15  ;;  %v706_v36 = vld [vmem:[#allocation2 + $0x23c] sm:$0xf]  ;;  %v9064_v15 = vld [vmem:[#allocation43_spill] sm:$0xff] }
 0x219   :  { %3606 = vmatmul.bf16.gmra.mxu0 %v3323_v53  ;;  %v2636_v2 = vpop.permute.xlu0 %2635  ;;  %v1798_v5 = vrot.slane %v1797_v59, 4  ;;  %v1325_v47 = vshrl.u32 %v706_v36, 16  ;;  %v1328_v26 = vshll.u32 %v706_v36, 16 }
 0x21a   :  { %v6992_v61 = vpop.permute.xlu2 %2851  ;;  %v1808_v27 = vsel %vm5403_vm6, %v1803_v34, %v1807_v39 }
 0x21b   :  { %2757 = vrot.lane.b32.xlu1 %v9060_v3, %s4962_s27  ;;  %v1800_v38 = vsel %vm5403_vm6, %v1798_v5, %v1799_v41  ;;  %v2408_v53 = vunpack.c.l.b16 %v1808_v27  ;;  %v2088_v41 = vunpack.c.l.b16 %v1309_v54  ;;  %v1327_v0 = vrot.slane %v1325_v47, 7 }
 0x21c   :  { %v2407_v30 = vunpack.c.l.b16 %v1800_v38 }
 0x21d   :  { %v2492_v24 = vpop.permute.xlu1 %2491  ;;  %v7038_v48 = vpack.c.b16 %v2088_v41, %v2087_v45  ;;  %v1330_v45 = vor.u32 %v1328_v26, %v1327_v0  ;;  %v7056_v41 = vld [vmem:[#allocation2 + $0x24c] sm:$0xf] }
 0x21e   :  { %v3018_v18 = vsel %vm2978_vm10, %v2941_v25, %v2492_v24  ;;  %v7023_v51 = vpack.c.b16 %v2408_v53, %v2407_v30  ;;  %v9063_v25 = vld [vmem:[#allocation15_spill] sm:$0xff]  ;;  %v9065_v30 = vld [vmem:[#allocation28_spill] sm:$0xff] }
 0x21f   :  { %2713 = vrot.lane.b32.xlu0 %v6944_v11, %s4960_s25  ;;  %v3083_v4 = vsel %vm3043_vm11, %v3018_v18, %v6902_v28  ;;  %v705_v28 = vld [vmem:[#allocation2 + $0x238] sm:$0xf] }
 0x220   :  { %2689 = vrot.lane.b32.xlu2 %v9061_v29, %s4960_s25  ;;  %v3148_v6 = vsel %vm3108_vm12, %v3083_v4, %v2636_v2  ;;  %4693 = vmatmul.msk.bf16.gmra.mxu3 %vm2881_vm7, %v7023_v51  ;;  %v704_v29 = vld [vmem:[#allocation2 + $0x234] sm:$0xf]  ;;  %v1316_v39 = vshrl.u32 %v705_v28, 16  ;;  %v1319_v5 = vshll.u32 %v705_v28, 16 }
 0x221   :  { %v2850_v62 = vpop.permute.xlu0 %2849  ;;  %v1311_v24 = vshrl.u32 %v704_v29, 16 }
 0x222   :  { %v7006_v60 = vpop.permute.xlu2 %2683  ;;  %v1318_v31 = vrot.slane %v1316_v39, 7 }
 0x223   :  { %2569 = vrot.lane.b32.xlu1 %v6907_v35, %s4959_s24  ;;  %v4480_v53 = vrot.slane %v1311_v24, 11  ;;  %v1810_v24 = vrot.slane %v1319_v5, 5 }
 0x224   :  { %v1321_v54 = vor.u32 %v1319_v5, %v1318_v31  ;;  %v1323_v4 = vrot.slane %v1318_v31, 4  ;;  %v1815_v31 = vrot.slane %v1325_v47, 4  ;;  %v4946_v5 = vld [vmem:[#allocation2 + $0x10c] sm:$0xff]  ;;  %v9066_v47 = vld [vmem:[#allocation16_spill] sm:$0xff] }
 0x225   :  { %v2706_v14 = vpop.permute.xlu1 %2705 }
 0x226   :  { %v3213_v46 = vsel %vm3173_vm13, %v3148_v6, %v2706_v14  ;;  %v7062_v14 = vld [vmem:[#allocation2 + $0x250] sm:$0xf] }
 0x227   :  { %v3278_v59 = vsel %vm3238_vm14, %v3213_v46, %v6920_v50  ;;  %2545 = vrot.lane.b32.xlu0 %v9060_v3, %s4959_s24  ;;  %v2905_v50 = vsel %vm2881_vm7, %v6539_v8, %v9063_v25  ;;  %v1338_v46 = vshrl.u32 %v7056_v41, 16  ;;  %v1347_v25 = vshrl.u32 %v7062_v14, 16 }
 0x228   :  { %2501 = vrot.lane.b32.xlu2 %v6944_v11, %s4957_s23  ;;  %v3362_v11 = vsel %vm3303_vm15, %v3278_v59, %v2850_v62  ;;  %v2994_v18 = vsel %vm2978_vm10, %v2905_v50, %v9064_v15  ;;  %v475_v62 = vld [vmem:[#allocation2 + $0x240] sm:$0x1]  ;;  %v1322_v59 = vsel %vm5677_vm9, %v4480_v53, %v1321_v54 }
 0x229   :  { %3671 = vmatmul.bf16.gmra.mxu2 %v3362_v11  ;;  %v2682_v2 = vpop.permute.xlu0 %2681  ;;  %v476_v8 = vsel %vm5373_vm3, 0, %v475_v62  ;;  %v708_v11 = vld [vmem:[#allocation2 + $0x248] sm:$0xf]  ;;  %v2089_v0 = vunpack.c.l.b16 %v1322_v59 }
 0x22a   :  { %v7031_v13 = vpop.permute.xlu2 %2495  ;;  %477 = vst [vmem:[#allocation2 + $0x240] sm:$0x1] %v476_v8  ;;  %v1341_v8 = vshll.u32 %v7056_v41, 16 }
 0x22b   :  { %2783 = vrot.lane.b32.xlu1 %v7038_v48, %s4962_s27 }
 0x22d   :  { %v2538_v34 = vpop.permute.xlu1 %2537 }
 0x22e   :  { %v3059_v27 = vsel %vm3043_vm11, %v2994_v18, %v2538_v34  ;;  %v1813_v34 = vrot.slane %v1328_v26, 5  ;;  %v1333_v18 = vshrl.u32 %v708_v11, 16 }
 0x22f   :  { %2759 = vrot.lane.b32.xlu0 %v9065_v30, %s4962_s27  ;;  %v3124_v6 = vsel %vm3108_vm12, %v3059_v27, %v6937_v44  ;;  %v1331_v44 = vsel %vm5677_vm9, %v1323_v4, %v1330_v45  ;;  %v1340_v27 = vrot.slane %v1338_v46, 7  ;;  %v1349_v45 = vrot.slane %v1347_v25, 7 }
 0x230   :  { %2715 = vrot.lane.b32.xlu2 %v7023_v51, %s4960_s25  ;;  %v3189_v28 = vsel %vm3173_vm13, %v3124_v6, %v2682_v2  ;;  %v1809_v2 = vrot.slane %v1316_v39, 4  ;;  %v2090_v15 = vunpack.c.l.b16 %v1331_v44  ;;  %v1350_v39 = vshll.u32 %v7062_v14, 16 }
 0x231   :  { %v2494_v20 = vpop.permute.xlu0 %2493  ;;  %v707_v53 = vld [vmem:[#allocation2 + $0x240] sm:$0x1]  ;;  %v4481_v11 = vrot.slane %v1333_v18, 11 }
 0x232   :  { %v7049_v38 = vpop.permute.xlu2 %2709  ;;  %v1811_v54 = vor.u32 %v1810_v24, %v1809_v2  ;;  %v1819_v4 = vshll.u32 %v707_v53, 16  ;;  %v7092_v44 = vpack.c.b16 %v2090_v15, %v2089_v0  ;;  %v1343_v2 = vor.u32 %v1341_v8, %v1340_v27 }
 0x233   :  { %2619 = vrot.lane.b32.xlu1 %v6951_v16, %s4958_s12 }
 0x234   :  { %v1812_v26 = vrot.slane %v1811_v54, 4 }
 0x235   :  { %v2752_v36 = vpop.permute.xlu1 %2751 }
 0x236   :  { %v3254_v29 = vsel %vm3238_vm14, %v3189_v28, %v2752_v36  ;;  %v1821_v28 = vrot.slane %v1819_v4, 5  ;;  %v9067_v36 = vld [vmem:[#allocation18_spill] sm:$0xff]  ;;  %v1814_v53 = vsel %vm5403_vm6, %v1812_v26, %v1813_v34 }
 0x237   :  { %v3326_v50 = vsel %vm3303_vm15, %v3254_v29, %v6960_v23  ;;  %2571 = vrot.lane.b32.xlu0 %v7038_v48, %s4959_s24  ;;  %v1816_v23 = vor.u32 %v1815_v31, %v1813_v34  ;;  %v2944_v59 = vsel %vm2881_vm7, %v6604_v43, %v9067_v36  ;;  %v1345_v29 = vrot.slane %v1340_v27, 4 }
 0x238   :  { %2547 = vrot.lane.b32.xlu2 %v9065_v30, %s4959_s24  ;;  %3611 = vmatmul.bf16.gmra.mxu0 %v3326_v50  ;;  %v3020_v24 = vsel %vm2978_vm10, %v2944_v59, %v2494_v20  ;;  %v2409_v43 = vunpack.c.l.b16 %v1814_v53  ;;  %v1344_v34 = vsel %vm5677_vm9, %v4481_v11, %v1343_v2  ;;  %v482_v11 = vld [vmem:[#allocation2 + $0x254] sm:$0x1]  ;;  %v9068_v2 = vld [vmem:[#allocation8_spill] sm:$0xff] }
 0x239   :  { %v2708_v62 = vpop.permute.xlu0 %2707  ;;  %v1817_v6 = vrot.slane %v1816_v23, 4  ;;  %v1352_v23 = vor.u32 %v1350_v39, %v1349_v45 }
 0x23a   :  { %v7073_v16 = vpop.permute.xlu2 %2541 }
 0x23b   :  { %2833 = vrot.lane.b32.xlu1 %v4946_v5, %s4961_s26  ;;  %v1822_v54 = vsel %vm5403_vm6, %v1817_v6, %v1821_v28  ;;  %v1353_v27 = vsel %vm5677_vm9, %v1345_v29, %v1352_v23  ;;  %v2091_v6 = vunpack.c.l.b16 %v1344_v34  ;;  %v1827_v34 = vrot.slane %v1350_v39, 5 }
 0x23c   :  { %v2410_v0 = vunpack.c.l.b16 %v1822_v54 }
 0x23d   :  { %v2564_v50 = vpop.permute.xlu1 %2563 }
 0x23e   :  { %v3085_v4 = vsel %vm3043_vm11, %v3020_v24, %v2564_v50  ;;  %v7104_v18 = vpack.c.b16 %v2410_v0, %v2409_v43  ;;  %v4947_v50 = vld [vmem:[#allocation2 + $0x238] sm:$0xff]  ;;  %v2908_v24 = vsel %vm2881_vm7, %v9045_v40, %v9068_v2  ;;  %v4948_v43 = vld [vmem:[#allocation2 + $0x120] sm:$0xff]  ;;  %v1823_v40 = vrot.slane %v1338_v46, 4 }
 0x23f   :  { %2785 = vrot.lane.b32.xlu0 %v7092_v44, %s4962_s27  ;;  %v3150_v20 = vsel %vm3108_vm12, %v3085_v4, %v6971_v19  ;;  %v2092_v19 = vunpack.c.l.b16 %v1353_v27  ;;  %v1829_v27 = vrot.slane %v1347_v25, 4 }
 0x240   :  { %2761 = vrot.lane.b32.xlu2 %v9066_v47, %s4962_s27  ;;  %4694 = vmatmul.msk.bf16.gmra.mxu3 %vm2881_vm7, %v7104_v18  ;;  %v3215_v45 = vsel %vm3173_vm13, %v3150_v20, %v2708_v62  ;;  %v483_v62 = vsel %vm5373_vm3, 0, %v482_v11  ;;  %v1824_v20 = vrot.slane %v1341_v8, 5 }
 0x241   :  { %v2540_v15 = vpop.permute.xlu0 %2539  ;;  %v7125_v29 = vpack.c.b16 %v2092_v19, %v2091_v6  ;;  %484 = vst [vmem:[#allocation2 + $0x254] sm:$0x1] %v483_v62  ;;  %v1830_v19 = vor.u32 %v1829_v27, %v1827_v34 }
 0x242   :  { %v7095_v31 = vpop.permute.xlu2 %2755  ;;  %v1825_v6 = vor.u32 %v1824_v20, %v1823_v40 }
 0x243   :  { %2645 = vrot.lane.b32.xlu1 %v6986_v57, %s4958_s12  ;;  %v1831_v39 = vrot.slane %v1830_v19, 4 }
 0x244   :  { %v1826_v8 = vrot.slane %v1825_v6, 4 }
 0x245   :  { %v2778_v26 = vpop.permute.xlu1 %2777 }
 0x246   :  { %v3280_v28 = vsel %vm3238_vm14, %v3215_v45, %v2778_v26  ;;  %v9070_v26 = vld [vmem:[#allocation12_spill] sm:$0xff] }
 0x247   :  { %v3365_v59 = vsel %vm3303_vm15, %v3280_v28, %v6992_v61  ;;  %2621 = vrot.lane.b32.xlu0 %v4946_v5, %s4958_s12  ;;  %v9069_v61 = vld [vmem:[#allocation44_spill] sm:$0xff] }
 0x248   :  { %2573 = vrot.lane.b32.xlu2 %v7092_v44, %s4959_s24  ;;  %3676 = vmatmul.bf16.gmra.mxu2 %v3365_v59  ;;  %v2996_v5 = vsel %vm2978_vm10, %v2908_v24, %v9069_v61  ;;  %v9071_v61 = vld [vmem:[#allocation31_spill] sm:$0xff] }
 0x249   :  { %v2754_v57 = vpop.permute.xlu0 %2753  ;;  %v3061_v54 = vsel %vm3043_vm11, %v2996_v5, %v2540_v15  ;;  %v711_v15 = vld [vmem:[#allocation2 + $0x254] sm:$0x1]  ;;  %v2947_v5 = vsel %vm2881_vm7, %v6672_v56, %v9071_v61  ;;  %v4950_v56 = vld [vmem:[#allocation2 + $0x24c] sm:$0xff] }
 0x24a   :  { %v7120_v36 = vpop.permute.xlu2 %2567  ;;  %v1833_v28 = vshll.u32 %v711_v15, 16 }
 0x24b   :  { %2859 = vrot.lane.b32.xlu1 %v4947_v50, %s4961_s26 }
 0x24c   :  { %v1835_v59 = vrot.slane %v1833_v28, 5 }
 0x24d   :  { %v2614_v53 = vpop.permute.xlu1 %2613 }
 0x24e   :  { %v3126_v4 = vsel %vm3108_vm12, %v3061_v54, %v2614_v53  ;;  %v1836_v11 = vsel %vm5403_vm6, %v1831_v39, %v1835_v59  ;;  %v7167_v53 = vld [vmem:[#allocation2 + $0x134] sm:$0xff]  ;;  %v9075_v39 = vshll.u32 %v6505_v12, 16 }
 0x24f   :  { %2835 = vrot.lane.b32.xlu0 %v4948_v43, %s4961_s26  ;;  %v3191_v45 = vsel %vm3173_vm13, %v3126_v4, %v7006_v60  ;;  %v1828_v60 = vsel %vm5403_vm6, %v1826_v8, %v1827_v34  ;;  %v2412_v2 = vunpack.c.l.b16 %v1836_v11  ;;  %v652_v4 = vld [vmem:[#allocation2 + $0x130] sm:$0xf]  ;;  %v489_v11 = vld [vmem:[#allocation2 + $0x268] sm:$0x1] }
 0x250   :  { %2787 = vrot.lane.b32.xlu2 %v7125_v29, %s4962_s27  ;;  %v3256_v41 = vsel %vm3238_vm14, %v3191_v45, %v2754_v57  ;;  %v2411_v62 = vunpack.c.l.b16 %v1828_v60  ;;  %v1069_v20 = vshrl.u32 %v652_v4, 16  ;;  %v9072_v45 = vshrl.u32 %v6493_v52, 16 }
 0x251   :  { %v2566_v0 = vpop.permute.xlu0 %2565 }
 0x252   :  { %v7138_v23 = vpop.permute.xlu2 %2781  ;;  %v7160_v24 = vpack.c.b16 %v2412_v2, %v2411_v62  ;;  %v1076_v15 = vrot.slane %v9072_v45, 7  ;;  %v4469_v6 = vrot.slane %v1069_v20, 11  ;;  %v490_v2 = vsel %vm5373_vm3, 0, %v489_v11 }
 0x253   :  { %2691 = vrot.lane.b32.xlu1 %v9070_v26, %s4960_s25  ;;  %491 = vst [vmem:[#allocation2 + $0x268] sm:$0x1] %v490_v2 }
 0x254   :  { %4695 = vmatmul.msk.bf16.gmra.mxu3 %vm2881_vm7, %v7160_v24  ;;  %v7180_v34 = vpop.f32.mrf.mxu2  ;;  %v1081_v8 = vrot.slane %v1076_v15, 4 }
 0x255   :  { %v2828_v46 = vpop.permute.xlu1 %2827 }
 0x256   :  { %v3329_v14 = vsel %vm3303_vm15, %v3256_v41, %v2828_v46  ;;  %v9074_v41 = vshll.u32 %v6493_v52, 16 }
 0x257   :  { %3616 = vmatmul.bf16.gmra.mxu0 %v3329_v14  ;;  %2647 = vrot.lane.b32.xlu0 %v4947_v50, %s4958_s12  ;;  %v3022_v50 = vsel %vm2978_vm10, %v2947_v5, %v7031_v13  ;;  %v9073_v13 = vshrl.u32 %v6505_v12, 16  ;;  %v713_v5 = vld [vmem:[#allocation2 + $0x260] sm:$0xf] }
 0x258   :  { %2623 = vrot.lane.b32.xlu2 %v4948_v43, %s4958_s12  ;;  %v3087_v43 = vsel %vm3043_vm11, %v3022_v50, %v2566_v0  ;;  %v1079_v46 = vor.u32 %v9074_v41, %v1076_v15  ;;  %v714_v50 = vld [vmem:[#allocation2 + $0x264] sm:$0xf]  ;;  %v1360_v45 = vshrl.u32 %v713_v5, 16 }
 0x259   :  { %v2780_v57 = vpop.permute.xlu0 %2779  ;;  %v1085_v26 = vrot.slane %v9073_v13, 7 }
 0x25a   :  { %v7153_v25 = vpop.permute.xlu2 %2617  ;;  %v1080_v12 = vsel %vm5677_vm9, %v4469_v6, %v1079_v46  ;;  %v1369_v6 = vshrl.u32 %v714_v50, 16  ;;  %v3831_v46 = vpop.f32.mrf.mxu3 }
 0x25b   :  { %2503 = vrot.lane.b32.xlu1 %v7023_v51, %s4957_s23  ;;  %v1088_v59 = vor.u32 %v9075_v39, %v1085_v26  ;;  %v712_v26 = vld [vmem:[#allocation2 + $0x25c] sm:$0xf]  ;;  %v1837_v39 = vrot.slane %v1360_v45, 4 }
 0x25d   :  { %v2640_v54 = vpop.permute.xlu1 %2639  ;;  %v1089_v61 = vsel %vm5677_vm9, %v1081_v8, %v1088_v59  ;;  %v656_v8 = vld [vmem:[#allocation2 + $0x144] sm:$0xf] }
 0x25e   :  { %v3152_v40 = vsel %vm3108_vm12, %v3087_v43, %v2640_v54  ;;  %v9078_v54 = vld [vmem:[#allocation39_spill] sm:$0xff]  ;;  %v7212_v43 = vpop.f32.mrf.mxu2  ;;  %v2068_v20 = vunpack.c.l.b16 %v1089_v61 }
 0x25f   :  { %2861 = vrot.lane.b32.xlu0 %v4950_v56, %s4961_s26  ;;  %v3217_v0 = vsel %vm3173_vm13, %v3152_v40, %v7049_v38  ;;  %v9076_v38 = vld [vmem:[#allocation27_spill] sm:$0xff]  ;;  %v7218_v40 = vld [vmem:[#allocation2 + $0x260] sm:$0xff] }
 0x260   :  { %2837 = vrot.lane.b32.xlu2 %v7167_v53, %s4961_s26  ;;  %v3282_v19 = vsel %vm3238_vm14, %v3217_v0, %v2780_v57  ;;  %v9077_v57 = vld [vmem:[#allocation17_spill] sm:$0xff]  ;;  %v1363_v0 = vshll.u32 %v713_v5, 16  ;;  %v1894_v5 = vshrl.u32 %v656_v8, 16 }
 0x261   :  { %v2616_v27 = vpop.permute.xlu0 %2615  ;;  %v2911_v52 = vsel %vm2881_vm7, %v6094_v55, %v9077_v57  ;;  %v715_v57 = vld [vmem:[#allocation2 + $0x268] sm:$0x1] }
 0x262   :  { %v7176_v51 = vpop.permute.xlu2 %2831  ;;  %v2998_v4 = vsel %vm2978_vm10, %v2911_v52, %v9078_v54  ;;  %v1838_v59 = vrot.slane %v1363_v0, 5  ;;  %v1843_v52 = vrot.slane %v1369_v6, 4 }
 0x263   :  { %2717 = vrot.lane.b32.xlu1 %v7104_v18, %s4960_s25  ;;  %v3063_v55 = vsel %vm3043_vm11, %v2998_v4, %v7073_v16 }
 0x264   :  { %v3128_v15 = vsel %vm3108_vm12, %v3063_v55, %v2616_v27  ;;  %v1839_v61 = vor.u32 %v1838_v59, %v1837_v39 }
 0x265   :  { %v2854_v28 = vpop.permute.xlu1 %2853 }
 0x266   :  { %v3368_v14 = vsel %vm3303_vm15, %v3282_v19, %v2854_v28  ;;  %v1372_v19 = vshll.u32 %v714_v50, 16  ;;  %v9079_v50 = vshrl.u32 %v6612_v1, 16 }
 0x267   :  { %3681 = vmatmul.bf16.gmra.mxu2 %v3368_v14  ;;  %2693 = vrot.lane.b32.xlu0 %v9076_v38, %s4960_s25  ;;  %v1355_v38 = vshrl.u32 %v712_v26, 16  ;;  %v9083_v26 = vld [vmem:[#allocation32_spill] sm:$0xff] }
 0x268   :  { %2649 = vrot.lane.b32.xlu2 %v4950_v56, %s4958_s12  ;;  %v2067_v56 = vunpack.c.l.b16 %v1080_v12  ;;  %v1841_v27 = vrot.slane %v1372_v19, 5  ;;  %v1371_v12 = vrot.slane %v1369_v6, 7  ;;  %v1901_v54 = vrot.slane %v9079_v50, 7 }
 0x269   :  { %v2830_v62 = vpop.permute.xlu0 %2829  ;;  %v2950_v6 = vsel %vm2881_vm7, %v6818_v9, %v9083_v26  ;;  %v9084_v9 = vshll.u32 %v6612_v1, 16 }
 0x26a   :  { %v7199_v60 = vpop.permute.xlu2 %2643  ;;  %v7229_v14 = vpack.c.b16 %v2068_v20, %v2067_v56  ;;  %v1844_v4 = vor.u32 %v1843_v52, %v1841_v27  ;;  %v9081_v56 = vld [vmem:[#allocation50_spill] sm:$0xff]  ;;  %v9082_v20 = vshrl.u32 %v6619_v17, 16  ;;  %v1374_v59 = vor.u32 %v1372_v19, %v1371_v12 }
 0x26b   :  { %2549 = vrot.lane.b32.xlu1 %v9066_v47, %s4959_s24  ;;  %v4486_v52 = vrot.slane %v1894_v5, 11 }
 0x26d   :  { %v2686_v13 = vpop.permute.xlu1 %2685 }
 0x26e   :  { %v3193_v28 = vsel %vm3173_vm13, %v3128_v15, %v2686_v13  ;;  %v1840_v15 = vrot.slane %v1839_v61, 4 }
 0x26f   :  { %v3258_v16 = vsel %vm3238_vm14, %v3193_v28, %v7095_v31  ;;  %2505 = vrot.lane.b32.xlu0 %v7104_v18, %s4957_s23  ;;  %v1362_v31 = vrot.slane %v1360_v45, 7  ;;  %v1847_v18 = vshll.u32 %v715_v57, 16  ;;  %v1910_v45 = vrot.slane %v9082_v20, 7 }
 0x270   :  { %2863 = vrot.lane.b32.xlu2 %v7218_v40, %s4961_s26  ;;  %v3332_v41 = vsel %vm3303_vm15, %v3258_v16, %v2830_v62  ;;  %v4482_v28 = vrot.slane %v1355_v38, 11  ;;  %v1904_v38 = vor.u32 %v9084_v9, %v1901_v54 }
 0x271   :  { %3621 = vmatmul.bf16.gmra.mxu0 %v3332_v41  ;;  %v2642_v11 = vpop.permute.xlu0 %2641  ;;  %v1849_v13 = vrot.slane %v1847_v18, 5  ;;  %v1845_v41 = vrot.slane %v1844_v4, 4  ;;  %v1365_v8 = vor.u32 %v1363_v0, %v1362_v31  ;;  %v1367_v39 = vrot.slane %v1362_v31, 4 }
 0x272   :  { %v7231_v2 = vpop.permute.xlu2 %2857  ;;  %v9085_v0 = vshll.u32 %v6619_v17, 16  ;;  %v1905_v17 = vsel %vm5677_vm9, %v4486_v52, %v1904_v38 }
 0x273   :  { %2763 = vrot.lane.b32.xlu1 %v7229_v14, %s4962_s27  ;;  %v3662_v62 = vpop.f32.mrf.mxu2  ;;  %v1850_v61 = vsel %vm5403_vm6, %v1845_v41, %v1849_v13  ;;  %v1375_v50 = vsel %vm5677_vm9, %v1367_v39, %v1374_v59  ;;  %v717_v13 = vld [vmem:[#allocation2 + $0x274] sm:$0xf]  ;;  %v716_v59 = vld [vmem:[#allocation2 + $0x270] sm:$0xf] }
 0x274   :  { %v7237_v55 = vadd.f32 %v3831_v46, %v3662_v62  ;;  %v1842_v46 = vsel %vm5403_vm6, %v1840_v15, %v1841_v27  ;;  %v1906_v62 = vrot.slane %v1901_v54, 4  ;;  %v1913_v19 = vor.u32 %v9085_v0, %v1910_v45 }
 0x275   :  { %v2498_v16 = vpop.permute.xlu1 %2497  ;;  %v2413_v18 = vunpack.c.l.b16 %v1842_v46  ;;  %v2414_v31 = vunpack.c.l.b16 %v1850_v61  ;;  %v1366_v27 = vsel %vm5677_vm9, %v4482_v28, %v1365_v8  ;;  %v2094_v20 = vunpack.c.l.b16 %v1375_v50  ;;  %v7302_v50 = vpop.f32.mrf.mxu3 }
 0x276   :  { %9080 = vst [vmem:[#allocation5_spill] sm:$0xff] %v7237_v55  ;;  %v3024_v57 = vsel %vm2978_vm10, %v2950_v6, %v2498_v16  ;;  %v1914_v54 = vsel %vm5677_vm9, %v1906_v62, %v1913_v19  ;;  %v718_v6 = vld [vmem:[#allocation2 + $0x278] sm:$0xf]  ;;  %v2517_v16 = vunpack.c.l.b16 %v1905_v17  ;;  %v1382_v8 = vshrl.u32 %v717_v13, 16 }
 0x277   :  { %2719 = vrot.lane.b32.xlu0 %v7160_v24, %s4960_s25  ;;  %v3089_v5 = vsel %vm3043_vm11, %v3024_v57, %v7120_v36  ;;  %v7263_v4 = vpack.c.b16 %v2414_v31, %v2413_v18  ;;  %v2093_v36 = vunpack.c.l.b16 %v1366_v27  ;;  %v1391_v46 = vshrl.u32 %v718_v6, 16  ;;  %v9087_v31 = vld [vmem:[#allocation46_spill] sm:$0xff] }
 0x278   :  { %2695 = vrot.lane.b32.xlu2 %v9081_v56, %s4960_s25  ;;  %v3154_v45 = vsel %vm3108_vm12, %v3089_v5, %v2642_v11  ;;  %v1377_v61 = vshrl.u32 %v716_v59, 16  ;;  %v1384_v18 = vrot.slane %v1382_v8, 7  ;;  %v1385_v62 = vshll.u32 %v717_v13, 16  ;;  %v496_v5 = vld [vmem:[#allocation2 + $0x27c] sm:$0x1] }
 0x279   :  { %v2856_v12 = vpop.permute.xlu0 %2855  ;;  %4696 = vmatmul.msk.bf16.gmra.mxu3 %vm2881_vm7, %v7263_v4  ;;  %v7284_v39 = vpack.c.b16 %v2094_v20, %v2093_v36  ;;  %v1393_v0 = vrot.slane %v1391_v46, 7  ;;  %v1394_v19 = vshll.u32 %v718_v6, 16  ;;  %v660_v59 = vld [vmem:[#allocation2 + $0x158] sm:$0xf] }
 0x27a   :  { %v7267_v1 = vpop.permute.xlu2 %2689  ;;  %v1387_v36 = vor.u32 %v1385_v62, %v1384_v18  ;;  %v1389_v20 = vrot.slane %v1384_v18, 4  ;;  %v1857_v18 = vrot.slane %v1391_v46, 4  ;;  %v9090_v46 = vshrl.u32 %v6678_v10, 16 }
 0x27b   :  { %2575 = vrot.lane.b32.xlu1 %v7125_v29, %s4959_s24 }
 0x27d   :  { %v2712_v15 = vpop.permute.xlu1 %2711 }
 0x27e   :  { %v3219_v26 = vsel %vm3173_vm13, %v3154_v45, %v2712_v15  ;;  %v1396_v45 = vor.u32 %v1394_v19, %v1393_v0  ;;  %v7306_v15 = vpop.f32.mrf.mxu2 }
 0x27f   :  { %v3284_v28 = vsel %vm3238_vm14, %v3219_v26, %v7138_v23  ;;  %2551 = vrot.lane.b32.xlu0 %v7229_v14, %s4959_s24  ;;  %v9086_v23 = vld [vmem:[#allocation19_spill] sm:$0xff] }
 0x280   :  { %2507 = vrot.lane.b32.xlu2 %v7160_v24, %s4957_s23  ;;  %v2518_v24 = vunpack.c.l.b16 %v1914_v54  ;;  %v3371_v41 = vsel %vm3303_vm15, %v3284_v28, %v2856_v12  ;;  %v2914_v52 = vsel %vm2881_vm7, %v6123_v7, %v9086_v23  ;;  %v4483_v7 = vrot.slane %v1377_v61, 11 }
 0x281   :  { %3686 = vmatmul.bf16.gmra.mxu2 %v3371_v41  ;;  %v2688_v11 = vpop.permute.xlu0 %2687  ;;  %v3000_v12 = vsel %vm2978_vm10, %v2914_v52, %v9087_v31  ;;  %v497_v54 = vsel %vm5373_vm3, 0, %v496_v5  ;;  %v7322_v41 = vld [vmem:[#allocation2 + $0x148] sm:$0xff]  ;;  %v1851_v23 = vrot.slane %v1382_v8, 4  ;;  %v1852_v52 = vrot.slane %v1385_v62, 5 }
 0x282   :  { %v7288_v57 = vpack.c.b16 %v2518_v24, %v2517_v16  ;;  %v7295_v38 = vpop.permute.xlu2 %2501  ;;  %498 = vst [vmem:[#allocation2 + $0x27c] sm:$0x1] %v497_v54  ;;  %v1388_v28 = vsel %vm5677_vm9, %v4483_v7, %v1387_v36  ;;  %v1397_v16 = vsel %vm5677_vm9, %v1389_v20, %v1396_v45  ;;  %v1855_v61 = vrot.slane %v1394_v19, 5 }
 0x283   :  { %2789 = vrot.lane.b32.xlu1 %v7284_v39, %s4962_s27  ;;  %v2096_v0 = vunpack.c.l.b16 %v1397_v16  ;;  %v1966_v36 = vshrl.u32 %v660_v59, 16  ;;  %v9089_v20 = vshrl.u32 %v6676_v49, 16  ;;  %v1982_v62 = vrot.slane %v9090_v46, 7 }
 0x284   :  { %v1858_v5 = vor.u32 %v1857_v18, %v1855_v61 }
 0x285   :  { %v2544_v9 = vpop.permute.xlu1 %2543  ;;  %v1973_v8 = vrot.slane %v9089_v20, 7  ;;  %v4488_v59 = vrot.slane %v1966_v36, 11 }
 0x286   :  { %v3065_v27 = vsel %vm3043_vm11, %v3000_v12, %v2544_v9  ;;  %v2095_v9 = vunpack.c.l.b16 %v1388_v28  ;;  %v1859_v45 = vrot.slane %v1858_v5, 4  ;;  %v7361_v5 = vld [vmem:[#allocation2 + $0x288] sm:$0xf] }
 0x287   :  { %2765 = vrot.lane.b32.xlu0 %v7288_v57, %s4962_s27  ;;  %v3130_v13 = vsel %vm3108_vm12, %v3065_v27, %v7153_v25  ;;  %v1853_v27 = vor.u32 %v1852_v52, %v1851_v23  ;;  %v1978_v18 = vrot.slane %v1973_v8, 4 }
 0x288   :  { %2721 = vrot.lane.b32.xlu2 %v7263_v4, %s4960_s25  ;;  %v3195_v26 = vsel %vm3173_vm13, %v3130_v13, %v2688_v11  ;;  %v3836_v11 = vpop.f32.mrf.mxu3  ;;  %v7343_v28 = vpack.c.b16 %v2096_v0, %v2095_v9  ;;  %v9093_v9 = vshll.u32 %v6678_v10, 16  ;;  %v7369_v10 = vld [vmem:[#allocation2 + $0x28c] sm:$0xf] }
 0x289   :  { %v2500_v17 = vpop.permute.xlu0 %2499  ;;  %v1854_v19 = vrot.slane %v1853_v27, 4 }
 0x28b   :  { %2625 = vrot.lane.b32.xlu1 %v7167_v53, %s4958_s12  ;;  %v7326_v53 = vpop.permute.xlu2 %2715 }
 0x28d   :  { %v2758_v6 = vpop.permute.xlu1 %2757 }
 0x28e   :  { %v3260_v24 = vsel %vm3238_vm14, %v3195_v26, %v2758_v6  ;;  %v9091_v26 = vld [vmem:[#allocation21_spill] sm:$0xff] }
 0x28f   :  { %v3335_v25 = vsel %vm3303_vm15, %v3260_v24, %v7176_v51  ;;  %2577 = vrot.lane.b32.xlu0 %v7284_v39, %s4959_s24  ;;  %v719_v51 = vld [vmem:[#allocation2 + $0x27c] sm:$0x1]  ;;  %v2953_v6 = vsel %vm2881_vm7, %v6872_v37, %v9091_v26  ;;  %v9092_v37 = vshll.u32 %v6676_v49, 16 }
 0x290   :  { %2483 = vrot.lane.b32.xlu2 %v9081_v56, %s4957_s23  ;;  %v7328_v56 = vpop.f32.mrf.mxu0  ;;  %3626 = vmatmul.bf16.gmra.mxu0 %v3335_v25  ;;  %v1861_v7 = vshll.u32 %v719_v51, 16  ;;  %v3026_v24 = vsel %vm2978_vm10, %v2953_v6, %v2500_v17  ;;  %v1856_v25 = vsel %vm5403_vm6, %v1854_v19, %v1855_v61  ;;  %v1985_v17 = vor.u32 %v9093_v9, %v1982_v62  ;;  %v503_v51 = vld [vmem:[#allocation2 + $0x290] sm:$0x1] }
 0x291   :  { %v2714_v31 = vpop.permute.xlu0 %2713  ;;  %v2415_v23 = vunpack.c.l.b16 %v1856_v25  ;;  %v1976_v52 = vor.u32 %v9092_v37, %v1973_v8  ;;  %v504_v27 = vsel %vm5373_vm3, 0, %v503_v51  ;;  %v1407_v19 = vshll.u32 %v7361_v5, 16 }
 0x292   :  { %v3667_v12 = vpop.f32.mrf.mxu2  ;;  %v1863_v13 = vrot.slane %v1861_v7, 5  ;;  %505 = vst [vmem:[#allocation2 + $0x290] sm:$0x1] %v504_v27  ;;  %v1986_v8 = vsel %vm5677_vm9, %v1978_v18, %v1985_v17  ;;  %v7399_v17 = vld [vmem:[#allocation2 + $0x274] sm:$0xff] }
 0x293   :  { %v7330_v54 = vadd.f32 %v3836_v11, %v3667_v12  ;;  %2839 = vrot.lane.b32.xlu1 %v7322_v41, %s4961_s26  ;;  %v7357_v12 = vpop.permute.xlu2 %2547  ;;  %v1977_v20 = vsel %vm5677_vm9, %v4488_v59, %v1976_v52  ;;  %v2732_v6 = vunpack.c.l.b16 %v1986_v8 }
 0x295   :  { %9088 = vst [vmem:[#allocation6_spill] sm:$0xff] %v7330_v54  ;;  %v2570_v16 = vpop.permute.xlu1 %2569 }
 0x296   :  { %v3091_v11 = vsel %vm3043_vm11, %v3026_v24, %v2570_v16 }
 0x297   :  { %2791 = vrot.lane.b32.xlu0 %v7343_v28, %s4962_s27  ;;  %v3156_v49 = vsel %vm3108_vm12, %v3091_v11, %v7199_v60  ;;  %v1404_v60 = vshrl.u32 %v7361_v5, 16 }
 0x298   :  { %2697 = vrot.lane.b32.xlu2 %v6674_v33, %s4960_s25  ;;  %v1864_v33 = vsel %vm5403_vm6, %v1859_v45, %v1863_v13  ;;  %v7363_v7 = vpop.f32.mrf.mxu0  ;;  %v3221_v46 = vsel %vm3173_vm13, %v3156_v49, %v2714_v31  ;;  %v1416_v45 = vshll.u32 %v7369_v10, 16  ;;  %v1866_v31 = vrot.slane %v1407_v19, 5 }
 0x299   :  { %v2416_v0 = vunpack.c.l.b16 %v1864_v33  ;;  %v2546_v61 = vpop.permute.xlu0 %2545  ;;  %v1865_v16 = vrot.slane %v1404_v60, 4  ;;  %v720_v33 = vld [vmem:[#allocation2 + $0x284] sm:$0xf]  ;;  %v723_v59 = vld [vmem:[#allocation2 + $0x290] sm:$0x1] }
 0x29a   :  { %v1869_v24 = vrot.slane %v1416_v45, 5  ;;  %v1875_v18 = vshll.u32 %v723_v59, 16  ;;  %v1399_v49 = vshrl.u32 %v720_v33, 16 }
 0x29b   :  { %v7367_v36 = vpack.c.b16 %v2416_v0, %v2415_v23  ;;  %2651 = vrot.lane.b32.xlu1 %v7218_v40, %s4958_s12  ;;  %v1413_v40 = vshrl.u32 %v7369_v10, 16  ;;  %v7391_v23 = vpop.f32.mrf.mxu3  ;;  %v1867_v37 = vor.u32 %v1866_v31, %v1865_v16  ;;  %v7403_v51 = vpop.permute.xlu2 %2761 }
 0x29c   :  { %9094 = vst [vmem:[#allocation26_spill] sm:$0xff] %v7391_v23 }
 0x29d   :  { %4697 = vmatmul.msk.bf16.gmra.mxu3 %vm2881_vm7, %v7367_v36  ;;  %v2784_v62 = vpop.permute.xlu1 %2783  ;;  %v1871_v25 = vrot.slane %v1413_v40, 4  ;;  %v1868_v8 = vrot.slane %v1867_v37, 4  ;;  %v1415_v31 = vrot.slane %v1413_v40, 7  ;;  %v7420_v40 = vld [vmem:[#allocation2 + $0x29c] sm:$0xf] }
 0x29e   :  { %v3286_v13 = vsel %vm3238_vm14, %v3221_v46, %v2784_v62  ;;  %v1877_v46 = vrot.slane %v1875_v18, 5  ;;  %v1406_v62 = vrot.slane %v1404_v60, 7 }
 0x29f   :  { %v3374_v26 = vsel %vm3303_vm15, %v3286_v13, %v7231_v2  ;;  %2553 = vrot.lane.b32.xlu0 %v7288_v57, %s4959_s24  ;;  %v1872_v52 = vor.u32 %v1871_v25, %v1869_v24  ;;  %v4905_v2 = vld [vmem:[%s8791_s0 + $0xf8] sm:$0xff]   ;;  %v9095_v57 = vld [vmem:[#allocation9_spill] sm:$0xff]  ;;  %v9097_v13 = vld [vmem:[#allocation47_spill] sm:$0xff]  ;;  %v1870_v33 = vsel %vm5403_vm6, %v1868_v8, %v1869_v24  ;;  %v1418_v8 = vor.u32 %v1416_v45, %v1415_v31 }
 0x2a0   :  { %2509 = vrot.lane.b32.xlu2 %v7263_v4, %s4957_s23  ;;  %v2731_v4 = vunpack.c.l.b16 %v1977_v20  ;;  %3691 = vmatmul.bf16.gmra.mxu2 %v3374_v26  ;;  %v2917_v9 = vsel %vm2881_vm7, %v5983_v63, %v9095_v57  ;;  %v4873_v27 = vunpack.c.l.bf16 %v4905_v2  ;;  %v4874_v5 = vunpack.c.h.bf16 %v4905_v2  ;;  %v7405_v10 = vpop.f32.mrf.mxu0  ;;  %v7407_v20 = vpop.f32.mrf.mxu2  ;;  %v510_v2 = vld [vmem:[#allocation2 + $0x2a4] sm:$0x1] }
 0x2a1   :  { %v2760_v11 = vpop.permute.xlu0 %2759  ;;  %9096 = vst [vmem:[#allocation11_spill] sm:$0xff] %v7407_v20  ;;  %v1873_v63 = vrot.slane %v1872_v52, 4  ;;  %v3002_v26 = vsel %vm2978_vm10, %v2917_v9, %v9097_v13  ;;  %v2417_v60 = vunpack.c.l.b16 %v1870_v33  ;;  %v4484_v9 = vrot.slane %v1399_v49, 11  ;;  %v726_v13 = vld [vmem:[#allocation2 + $0x2a0] sm:$0xf] }
 0x2a2   :  { %v2735_v0 = vpack.c.b16 %v2732_v6, %v2731_v4  ;;  %v205_v6 = vmax.f32 %v4873_v27, 0.0  ;;  %v206_v16 = vmax.f32 %v4874_v5, 0.0  ;;  %v3067_v25 = vsel %vm3043_vm11, %v3002_v26, %v2546_v61  ;;  %v4719_v33 = vld [vmem:[#allocation2 + $0x15c] sm:$0xff] }
 0x2a3   :  { %2865 = vrot.lane.b32.xlu1 %v7399_v17, %s4961_s26  ;;  %v1878_v59 = vsel %vm5403_vm6, %v1873_v63, %v1877_v46  ;;  %v1409_v27 = vor.u32 %v1407_v19, %v1406_v62  ;;  %v511_v24 = vsel %vm5373_vm3, 0, %v510_v2  ;;  %v1411_v5 = vrot.slane %v1406_v62, 4  ;;  %v3841_v63 = vpop.f32.mrf.mxu3 }
 0x2a4   :  { %v2418_v52 = vunpack.c.l.b16 %v1878_v59  ;;  %v269_v18 = vpack.c.bf16 %v205_v6, %v205_v6  ;;  %v270_v57 = vpack.c.bf16 %v206_v16, %v206_v16  ;;  %512 = vst [vmem:[#allocation2 + $0x2a4] sm:$0x1] %v511_v24  ;;  %v1426_v19 = vshrl.u32 %v7420_v40, 16 }
 0x2a5   :  { %v2620_v4 = vpop.permute.xlu1 %2619  ;;  %v1429_v45 = vshll.u32 %v7420_v40, 16  ;;  %v1419_v6 = vsel %vm5677_vm9, %v1411_v5, %v1418_v8  ;;  %v1435_v16 = vshrl.u32 %v726_v13, 16  ;;  %v9099_v5 = vld [vmem:[#allocation33_spill] sm:$0xff] }
 0x2a6   :  { %v3132_v37 = vsel %vm3108_vm12, %v3067_v25, %v2620_v4  ;;  %590 = vst.msk [vmem:[#allocation2 + $0x2b0] sm:$0xf] %vm271_vm0, %v269_v18  ;;  %v7427_v46 = vpack.c.b16 %v2418_v52, %v2417_v60  ;;  %v7443_v4 = vpop.permute.xlu2 %2573  ;;  %v2098_v18 = vunpack.c.l.b16 %v1419_v6  ;;  %v2956_v8 = vsel %vm2881_vm7, %v6907_v35, %v9099_v5 }
 0x2a7   :  { %2767 = vrot.lane.b32.xlu0 %v2735_v0, %s4962_s27  ;;  %v3197_v0 = vsel %vm3173_vm13, %v3132_v37, %v7267_v1  ;;  %591 = vst.msk [vmem:[#allocation2 + $0x2b4] sm:$0xf] %vm271_vm0, %v270_v57  ;;  %v1410_v1 = vsel %vm5677_vm9, %v4484_v9, %v1409_v27  ;;  %v1880_v59 = vrot.slane %v1429_v45, 5  ;;  %v1885_v60 = vrot.slane %v1435_v16, 4  ;;  %v724_v9 = vld [vmem:[#allocation2 + $0x298] sm:$0xf] }
 0x2a8   :  { %2723 = vrot.lane.b32.xlu2 %v7367_v36, %s4960_s25  ;;  %v3262_v62 = vsel %vm3238_vm14, %v3197_v0, %v2760_v11  ;;  %v7447_v31 = vpop.f32.mrf.mxu0  ;;  %v1879_v11 = vrot.slane %v1426_v19, 4  ;;  %v2097_v52 = vunpack.c.l.b16 %v1410_v1  ;;  %v1421_v1 = vshrl.u32 %v724_v9, 16 }
 0x2a9   :  { %v2572_v61 = vpop.permute.xlu0 %2571 }
 0x2aa   :  { %v1881_v27 = vor.u32 %v1880_v59, %v1879_v11 }
 0x2ab   :  { %2627 = vrot.lane.b32.xlu1 %v7322_v41, %s4958_s12  ;;  %v727_v57 = vld [vmem:[#allocation2 + $0x2a4] sm:$0x1] }
 0x2ac   :  { %v3672_v49 = vpop.f32.mrf.mxu2  ;;  %v1889_v24 = vshll.u32 %v727_v57, 16  ;;  %v1882_v0 = vrot.slane %v1881_v27, 4 }
 0x2ad   :  { %4698 = vmatmul.msk.bf16.gmra.mxu3 %vm2881_vm7, %v7427_v46  ;;  %v7441_v26 = vadd.f32 %v3841_v63, %v3672_v49  ;;  %v2834_v41 = vpop.permute.xlu1 %2833  ;;  %v7458_v49 = vpack.c.b16 %v2098_v18, %v2097_v52  ;;  %v7482_v5 = vld [vmem:[#allocation2 + $0x2b0] sm:$0xf] }
 0x2ae   :  { %v3338_v25 = vsel %vm3303_vm15, %v3262_v62, %v2834_v41  ;;  %v1428_v62 = vrot.slane %v1426_v19, 7  ;;  %v3028_v41 = vsel %vm2978_vm10, %v2956_v8, %v7295_v38  ;;  %v7491_v8 = vpop.f32.mrf.mxu3 }
 0x2af   :  { %9098 = vst [vmem:[#allocation14_spill] sm:$0xff] %v7441_v26  ;;  %3631 = vmatmul.bf16.gmra.mxu0 %v3338_v25  ;;  %2579 = vrot.lane.b32.xlu0 %v7343_v28, %s4959_s24  ;;  %v1437_v25 = vrot.slane %v1435_v16, 7  ;;  %v4485_v16 = vrot.slane %v1421_v1, 11 }
 0x2b0   :  { %2511 = vrot.lane.b32.xlu2 %v7367_v36, %s4957_s23  ;;  %v1438_v36 = vshll.u32 %v726_v13, 16  ;;  %v1891_v13 = vrot.slane %v1889_v24, 5  ;;  %v7472_v52 = vpop.f32.mrf.mxu0  ;;  %v1431_v18 = vor.u32 %v1429_v45, %v1428_v62  ;;  %v1433_v57 = vrot.slane %v1428_v62, 4  ;;  %v7484_v45 = vld [vmem:[#allocation2 + $0x2b4] sm:$0xf]  ;;  %9100 = vst [vmem:[#allocation36_spill] sm:$0xff] %v7491_v8 }
 0x2b1   :  { %v2786_v2 = vpop.permute.xlu0 %2785 }
 0x2b2   :  { %v1883_v37 = vrot.slane %v1438_v36, 5  ;;  %v1440_v9 = vor.u32 %v1438_v36, %v1437_v25  ;;  %v1432_v36 = vsel %vm5677_vm9, %v4485_v16, %v1431_v18  ;;  %v9102_v25 = vld [vmem:[#allocation41_spill] sm:$0xff]  ;;  %v8884_v18 = vshll.u32 %v7482_v5, 16 }
 0x2b3   :  { %2841 = vrot.lane.b32.xlu1 %v4719_v33, %s4961_s26  ;;  %v3093_v33 = vsel %vm3043_vm11, %v3028_v41, %v2572_v61  ;;  %v2099_v1 = vunpack.c.l.b16 %v1432_v36 }
 0x2b4   :  { %v1886_v40 = vor.u32 %v1885_v60, %v1883_v37  ;;  %v1884_v35 = vsel %vm5403_vm6, %v1882_v0, %v1883_v37  ;;  %v7470_v60 = vpop.permute.xlu2 %2787  ;;  %v8882_v0 = vshrl.u32 %v7484_v45, 16 }
 0x2b5   :  { %v2646_v6 = vpop.permute.xlu1 %2645  ;;  %v2419_v19 = vunpack.c.l.b16 %v1884_v35 }
 0x2b6   :  { %v1887_v63 = vrot.slane %v1886_v40, 4  ;;  %v3158_v59 = vsel %vm3108_vm12, %v3093_v33, %v2646_v6 }
 0x2b7   :  { %2793 = vrot.lane.b32.xlu0 %v7458_v49, %s4962_s27  ;;  %v3223_v37 = vsel %vm3173_vm13, %v3158_v59, %v7326_v53  ;;  %v1441_v53 = vsel %vm5677_vm9, %v1433_v57, %v1440_v9  ;;  %v7508_v59 = vpop.f32.mrf.mxu2  ;;  %v1932_v57 = vrot.slane %v8882_v0, 7 }
 0x2b8   :  { %2725 = vrot.lane.b32.xlu2 %v7427_v46, %s4960_s25  ;;  %v1892_v11 = vsel %vm5403_vm6, %v1887_v63, %v1891_v13  ;;  %v3288_v40 = vsel %vm3238_vm14, %v3223_v37, %v2786_v2  ;;  %v8885_v2 = vshrl.u32 %v7482_v5, 16  ;;  %v9101_v63 = vld [vmem:[#allocation20_spill] sm:$0xff]  ;;  %v2100_v62 = vunpack.c.l.b16 %v1441_v53  ;;  %v7504_v35 = vpop.f32.mrf.mxu0  ;;  %9103 = vst [vmem:[#allocation24_spill] sm:$0xff] %v7508_v59  ;;  %v3846_v53 = vpop.f32.mrf.mxu3 }
 0x2b9   :  { %v2420_v38 = vunpack.c.l.b16 %v1892_v11  ;;  %v2622_v61 = vpop.permute.xlu0 %2621  ;;  %v2920_v13 = vsel %vm2881_vm7, %v9060_v3, %v9101_v63  ;;  %v7511_v3 = vpop.f32.mrf.mxu1 }
 0x2ba   :  { %v3004_v33 = vsel %vm2978_vm10, %v2920_v13, %v9102_v25  ;;  %v1923_v16 = vrot.slane %v8885_v2, 7  ;;  %v7520_v9 = vpack.c.b16 %v2100_v62, %v2099_v1 }
 0x2bb   :  { %v2452_v27 = vpack.c.b16 %v2420_v38, %v2419_v19  ;;  %2653 = vrot.lane.b32.xlu1 %v7399_v17, %s4958_s12  ;;  %v3069_v11 = vsel %vm3043_vm11, %v3004_v33, %v7357_v12  ;;  %v4953_v19 = vld [vmem:[#allocation2 + $0x288] sm:$0xff]  ;;  %v8883_v12 = vshll.u32 %v7484_v45, 16 }
 0x2bc   :  { %v7500_v41 = vpop.permute.xlu2 %2623  ;;  %v3134_v37 = vsel %vm3108_vm12, %v3069_v11, %v2622_v61  ;;  %v1926_v63 = vor.u32 %v8884_v18, %v1923_v16  ;;  %v1928_v13 = vrot.slane %v1923_v16, 4 }
 0x2bd   :  { %4699 = vmatmul.msk.bf16.gmra.mxu3 %vm2881_vm7, %v2452_v27  ;;  %v2860_v24 = vpop.permute.xlu1 %2859  ;;  %v1935_v61 = vor.u32 %v8883_v12, %v1932_v57  ;;  %v7547_v57 = vld [vmem:[#allocation2 + $0x2c8] sm:$0xf] }
 0x2be   :  { %v3377_v17 = vsel %vm3303_vm15, %v3288_v40, %v2860_v24 }
 0x2bf   :  { %3696 = vmatmul.bf16.gmra.mxu2 %v3377_v17  ;;  %2581 = vrot.lane.b32.xlu0 %v7458_v49, %s4959_s24  ;;  %v1936_v11 = vsel %vm5677_vm9, %v1928_v13, %v1935_v61  ;;  %v517_v61 = vld [vmem:[#allocation2 + $0x2b8] sm:$0x1] }
 0x2c0   :  { %2513 = vrot.lane.b32.xlu2 %v7427_v46, %s4957_s23  ;;  %v728_v46 = vld [vmem:[#allocation2 + $0x2ac] sm:$0xf]  ;;  %v7536_v25 = vpop.f32.mrf.mxu0 }
 0x2c1   :  { %v2836_v6 = vpop.permute.xlu0 %2835  ;;  %v1916_v38 = vshrl.u32 %v728_v46, 16 }
 0x2c3   :  { %2867 = vrot.lane.b32.xlu1 %v4953_v19, %s4961_s26  ;;  %v4487_v17 = vrot.slane %v1916_v38, 11  ;;  %v7545_v38 = vld [vmem:[#allocation2 + $0x2c4] sm:$0xf] }
 0x2c4   :  { %v8890_v12 = vshll.u32 %v7545_v38, 16 }
 0x2c5   :  { %v2692_v40 = vpop.permute.xlu1 %2691 }
 0x2c6   :  { %v3199_v24 = vsel %vm3173_vm13, %v3134_v37, %v2692_v40  ;;  %v7552_v40 = vpop.f32.mrf.mxu1 }
 0x2c7   :  { %v3264_v36 = vsel %vm3238_vm14, %v3199_v24, %v7403_v51  ;;  %2795 = vrot.lane.b32.xlu0 %v7520_v9, %s4962_s27  ;;  %v7534_v51 = vpop.permute.xlu2 %2837 }
 0x2c8   :  { %2727 = vrot.lane.b32.xlu2 %v2452_v27, %s4960_s25  ;;  %v3341_v46 = vsel %vm3303_vm15, %v3264_v36, %v2836_v6  ;;  %v1927_v6 = vsel %vm5677_vm9, %v4487_v17, %v1926_v63  ;;  %v732_v17 = vld [vmem:[#allocation2 + $0x2c0] sm:$0xf]  ;;  %v3848_v63 = vpop.f32.mrf.mxu3 }
 0x2c9   :  { %3636 = vmatmul.bf16.gmra.mxu0 %v3341_v46  ;;  %v2648_v1 = vpop.permute.xlu0 %2647  ;;  %v2519_v36 = vunpack.c.l.b16 %v1927_v6  ;;  %v8886_v46 = vshrl.u32 %v7547_v57, 16 }
 0x2cb   :  { %2655 = vrot.lane.b32.xlu1 %v4953_v19, %s4958_s12  ;;  %v3677_v62 = vpop.f32.mrf.mxu2  ;;  %v9105_v19 = vld [vmem:[#allocation34_spill] sm:$0xff] }
 0x2cc   :  { %v7538_v33 = vadd.f32 %v3846_v53, %v3677_v62  ;;  %v2959_v37 = vsel %vm2881_vm7, %v7038_v48, %v9105_v19  ;;  %v2520_v53 = vunpack.c.l.b16 %v1936_v11  ;;  %v518_v62 = vsel %vm5373_vm3, 0, %v517_v61 }
 0x2cd   :  { %v2504_v16 = vpop.permute.xlu1 %2503  ;;  %v1988_v11 = vshrl.u32 %v732_v17, 16  ;;  %519 = vst [vmem:[#allocation2 + $0x2b8] sm:$0x1] %v518_v62 }
 0x2ce   :  { %9104 = vst [vmem:[#allocation10_spill] sm:$0xff] %v7538_v33  ;;  %v3030_v24 = vsel %vm2978_vm10, %v2959_v37, %v2504_v16  ;;  %v4954_v16 = vld [vmem:[#allocation2 + $0x29c] sm:$0xff]  ;;  %v2522_v6 = vpack.c.b16 %v2520_v53, %v2519_v36  ;;  %v7575_v36 = vpop.f32.mrf.mxu0  ;;  %v7581_v62 = vpop.f32.mrf.mxu1 }
 0x2cf   :  { %2583 = vrot.lane.b32.xlu0 %v7520_v9, %s4959_s24  ;;  %v3095_v48 = vsel %vm3043_vm11, %v3030_v24, %v7443_v4  ;;  %v2004_v4 = vrot.slane %v8886_v46, 7  ;;  %v8891_v24 = vshll.u32 %v7547_v57, 16  ;;  %v7573_v18 = vpop.permute.xlu2 %2649 }
 0x2d0   :  { %2515 = vrot.lane.b32.xlu2 %v2452_v27, %s4957_s23  ;;  %v8887_v27 = vshrl.u32 %v7545_v38, 16  ;;  %v3160_v61 = vsel %vm3108_vm12, %v3095_v48, %v2648_v1 }
 0x2d1   :  { %v2862_v13 = vpop.permute.xlu0 %2861  ;;  %v2007_v46 = vor.u32 %v8891_v24, %v2004_v4 }
 0x2d2   :  { %v1995_v37 = vrot.slane %v8887_v27, 7 }
 0x2d3   :  { %2869 = vrot.lane.b32.xlu1 %v4954_v16, %s4961_s26  ;;  %v3679_v19 = vpop.f32.mrf.mxu2 }
 0x2d4   :  { %v7566_v0 = vadd.f32 %v3848_v63, %v3679_v19  ;;  %v4489_v63 = vrot.slane %v1988_v11, 11  ;;  %v1998_v1 = vor.u32 %v8890_v12, %v1995_v37  ;;  %v2000_v48 = vrot.slane %v1995_v37, 4  ;;  %v731_v33 = vld [vmem:[#allocation2 + $0x2b8] sm:$0x1] }
 0x2d5   :  { %v2718_v2 = vpop.permute.xlu1 %2717  ;;  %v9109_v11 = vshll.u32 %v7484_v45, 16  ;;  %v1961_v12 = vshll.u32 %v731_v33, 16 }
 0x2d6   :  { %9106 = vst [vmem:[#allocation30_spill] sm:$0xff] %v7566_v0  ;;  %v3225_v53 = vsel %vm3173_vm13, %v3160_v61, %v2718_v2  ;;  %v9107_v2 = vshrl.u32 %v7482_v5, 16  ;;  %v1999_v4 = vsel %vm5677_vm9, %v4489_v63, %v1998_v1  ;;  %v4736_v1 = vld [vmem:[#allocation2 + $0x2b0] sm:$0xff] }
 0x2d7   :  { %v3290_v17 = vsel %vm3238_vm14, %v3225_v53, %v7470_v60  ;;  %2797 = vrot.lane.b32.xlu0 %v2522_v6, %s4962_s27  ;;  %v9108_v60 = vshll.u32 %v7482_v5, 16  ;;  %v1955_v0 = vrot.slane %v9109_v11, 5  ;;  %v9111_v5 = vld [vmem:[#allocation22_spill] sm:$0xff]  ;;  %v1963_v26 = vrot.slane %v1961_v12, 5 }
 0x2d8   :  { %v3380_v19 = vsel %vm3303_vm15, %v3290_v17, %v2862_v13  ;;  %v1951_v61 = vrot.slane %v9107_v2, 4  ;;  %v9110_v13 = vshrl.u32 %v7484_v45, 16  ;;  %v9112_v45 = vld [vmem:[#allocation48_spill] sm:$0xff]  ;;  %v2733_v21 = vunpack.c.l.b16 %v1999_v4 }
 0x2d9   :  { %3701 = vmatmul.bf16.gmra.mxu2 %v3380_v19  ;;  %v2694_v27 = vpop.permute.xlu0 %2693  ;;  %v1952_v53 = vrot.slane %v9108_v60, 5  ;;  %v2008_v19 = vsel %vm5677_vm9, %v2000_v48, %v2007_v46  ;;  %v2923_v60 = vsel %vm2881_vm7, %v9065_v30, %v9111_v5 }
 0x2da   :  { %v1957_v17 = vrot.slane %v9110_v13, 4  ;;  %v3006_v13 = vsel %vm2978_vm10, %v2923_v60, %v9112_v45  ;;  %v2734_v46 = vunpack.c.l.b16 %v2008_v19 }
 0x2db   :  { %2657 = vrot.lane.b32.xlu1 %v4954_v16, %s4958_s12  ;;  %v1953_v37 = vor.u32 %v1952_v53, %v1951_v61  ;;  %v7606_v16 = vpop.f32.mrf.mxu0  ;;  %v2864_v61 = vpop.permute.xlu2 %2863 }
 0x2dc   :  { %v1958_v2 = vor.u32 %v1957_v17, %v1955_v0  ;;  %v2736_v5 = vpack.c.b16 %v2734_v46, %v2733_v21 }
 0x2dd   :  { %v2550_v11 = vpop.permute.xlu1 %2549  ;;  %v1954_v24 = vrot.slane %v1953_v37, 4  ;;  %v7614_v37 = vpop.f32.mrf.mxu1 }
 0x2de   :  { %v1959_v33 = vrot.slane %v1958_v2, 4  ;;  %v3071_v63 = vsel %vm3043_vm11, %v3006_v13, %v2550_v11 }
 0x2df   :  { %2585 = vrot.lane.b32.xlu0 %v2522_v6, %s4959_s24  ;;  %v1956_v30 = vsel %vm5403_vm6, %v1954_v24, %v1955_v0  ;;  %v3136_v2 = vsel %vm3108_vm12, %v3071_v63, %v7500_v41  ;;  %v3851_v0 = vpop.f32.mrf.mxu3 }
 0x2e0   :  { %v1964_v12 = vsel %vm5403_vm6, %v1959_v33, %v1963_v26  ;;  %v2663_v48 = vunpack.c.l.b16 %v1956_v30  ;;  %v3201_v4 = vsel %vm3173_vm13, %v3136_v2, %v2694_v27  ;;  %v9114_v33 = vld [vmem:[#allocation25_spill] sm:$0xff] }
 0x2e1   :  { %v2506_v53 = vpop.permute.xlu0 %2505  ;;  %v2664_v17 = vunpack.c.l.b16 %v1964_v12  ;;  %v2962_v63 = vsel %vm2881_vm7, %v7092_v44, %v9114_v33  ;;  %v4737_v30 = vld [vmem:[#allocation2 + $0x2c4] sm:$0xff]  ;;  %v9117_v33 = vld [vmem:[#allocation4_spill] sm:$0xff] }
 0x2e3   :  { %2871 = vrot.lane.b32.xlu1 %v4736_v1, %s4961_s26  ;;  %v2666_v6 = vpack.c.b16 %v2664_v17, %v2663_v48  ;;  %v7626_v41 = vpop.f32.mrf.mxu0  ;;  %v2696_v60 = vpop.permute.xlu2 %2695 }
 0x2e5   :  { %v2764_v19 = vpop.permute.xlu1 %2763  ;;  %2729 = vrot.lane.b32.xlu2 %v2666_v6, %s4960_s25  ;;  %4700 = vmatmul.msk.bf16.gmra.mxu3 %vm2881_vm7, %v2666_v6  ;;  %v7631_v13 = vpop.f32.mrf.mxu1 }
 0x2e6   :  { %v3266_v26 = vsel %vm3238_vm14, %v3201_v4, %v2764_v19 }
 0x2e7   :  { %v3344_v24 = vsel %vm3303_vm15, %v3266_v26, %v7534_v51  ;;  %2799 = vrot.lane.b32.xlu0 %v2736_v5, %s4962_s27  ;;  %v3032_v51 = vsel %vm2978_vm10, %v2962_v63, %v2506_v53  ;;  %v3853_v48 = vpop.f32.mrf.mxu3 }
 0x2e8   :  { %3641 = vmatmul.bf16.gmra.mxu0 %v3344_v24 }
 0x2e9   :  { %v2720_v11 = vpop.permute.xlu0 %2719 }
 0x2ea   :  { %v3682_v45 = vpop.f32.mrf.mxu2 }
 0x2eb   :  { %v7628_v27 = vadd.f32 %v3851_v0, %v3682_v45  ;;  %2659 = vrot.lane.b32.xlu1 %v4736_v1, %s4958_s12  ;;  %v7638_v12 = vpop.f32.mrf.mxu0  ;;  %v2508_v5 = vpop.permute.xlu2 %2507 }
 0x2ed   :  { %9113 = vst [vmem:[#allocation15_spill] sm:$0xff] %v7628_v27  ;;  %v2576_v21 = vpop.permute.xlu1 %2575  ;;  %v7646_v53 = vpop.f32.mrf.mxu1 }
 0x2ee   :  { %v3097_v46 = vsel %vm3043_vm11, %v3032_v51, %v2576_v21 }
 0x2ef   :  { %v3162_v2 = vsel %vm3108_vm12, %v3097_v46, %v7573_v18  ;;  %v9116_v18 = vld [vmem:[#allocation13_spill] sm:$0xff] }
 0x2f0   :  { %v3227_v44 = vsel %vm3173_vm13, %v3162_v2, %v2720_v11  ;;  %v2926_v45 = vsel %vm2881_vm7, %v9066_v47, %v9116_v18 }
 0x2f1   :  { %v2552_v17 = vpop.permute.xlu0 %2551  ;;  %v3008_v63 = vsel %vm2978_vm10, %v2926_v45, %v9117_v33 }
 0x2f2   :  { %v3684_v1 = vpop.f32.mrf.mxu2  ;;  %v3073_v51 = vsel %vm3043_vm11, %v3008_v63, %v2552_v17  ;;  %v9119_v63 = vld [vmem:[#allocation35_spill] sm:$0xff] }
 0x2f3   :  { %v7642_v6 = vadd.f32 %v3853_v48, %v3684_v1  ;;  %2873 = vrot.lane.b32.xlu1 %v4737_v30, %s4961_s26  ;;  %v7650_v24 = vpop.f32.mrf.mxu0  ;;  %v2722_v21 = vpop.permute.xlu2 %2721 }
 0x2f5   :  { %9115 = vst [vmem:[#allocation43_spill] sm:$0xff] %v7642_v6  ;;  %v2790_v4 = vpop.permute.xlu1 %2789  ;;  %v7659_v30 = vpop.f32.mrf.mxu1 }
 0x2f6   :  { %v3292_v19 = vsel %vm3238_vm14, %v3227_v44, %v2790_v4 }
 0x2f7   :  { %v3383_v26 = vsel %vm3303_vm15, %v3292_v19, %v2864_v61  ;;  %v3856_v61 = vpop.f32.mrf.mxu3 }
 0x2f8   :  { %3706 = vmatmul.bf16.gmra.mxu2 %v3383_v26 }
 0x2f9   :  { %v2766_v0 = vpop.permute.xlu0 %2765 }
 0x2fb   :  { %v7661_v2 = vpop.f32.mrf.mxu0  ;;  %v2484_v18 = vpop.permute.xlu2 %2483 }
 0x2fd   :  { %v2626_v11 = vpop.permute.xlu1 %2625  ;;  %v7668_v45 = vpop.f32.mrf.mxu1 }
 0x2fe   :  { %v3138_v46 = vsel %vm3108_vm12, %v3073_v51, %v2626_v11  ;;  %v2965_v11 = vsel %vm2881_vm7, %v7125_v29, %v9119_v63 }
 0x2ff   :  { %v3203_v1 = vsel %vm3173_vm13, %v3138_v46, %v2696_v60  ;;  %v3858_v33 = vpop.f32.mrf.mxu3 }
 0x300   :  { %v3268_v47 = vsel %vm3238_vm14, %v3203_v1, %v2766_v0  ;;  %v3034_v0 = vsel %vm2978_vm10, %v2965_v11, %v2508_v5 }
 0x301   :  { %v2578_v48 = vpop.permute.xlu0 %2577 }
 0x302   :  { %v3099_v1 = vsel %vm3043_vm11, %v3034_v0, %v2578_v48 }
 0x303   :  { %v7673_v51 = vpop.f32.mrf.mxu0 }
 0x304   :  { %v3687_v44 = vpop.f32.mrf.mxu2 }
 0x305   :  { %v7665_v4 = vadd.f32 %v3856_v61, %v3687_v44  ;;  %v2840_v19 = vpop.permute.xlu1 %2839 }
 0x306   :  { %v3347_v26 = vsel %vm3303_vm15, %v3268_v47, %v2840_v19  ;;  %v2698_v47 = vpop.permute.xlu2 %2697 }
 0x307   :  { %9118 = vst [vmem:[#allocation28_spill] sm:$0xff] %v7665_v4  ;;  %3646 = vmatmul.bf16.gmra.mxu0 %v3347_v26  ;;  %v7681_v4 = vpop.f32.mrf.mxu1 }
 0x309   :  { %v2792_v17 = vpop.permute.xlu0 %2791 }
 0x30b   :  { %v7683_v6 = vpop.f32.mrf.mxu0 }
 0x30c   :  { %v3689_v60 = vpop.f32.mrf.mxu2 }
 0x30d   :  { %v7676_v46 = vadd.f32 %v3858_v33, %v3689_v60  ;;  %v2652_v61 = vpop.permute.xlu1 %2651  ;;  %v9121_v60 = vld [vmem:[#allocation23_spill] sm:$0xff] }
 0x30e   :  { %v3164_v44 = vsel %vm3108_vm12, %v3099_v1, %v2652_v61  ;;  %v2510_v11 = vpop.permute.xlu2 %2509  ;;  %v2929_v48 = vsel %vm2881_vm7, %v7229_v14, %v9121_v60 }
 0x30f   :  { %9120 = vst [vmem:[#allocation16_spill] sm:$0xff] %v7676_v46  ;;  %v3229_v26 = vsel %vm3173_vm13, %v3164_v44, %v2722_v21  ;;  %v3010_v0 = vsel %vm2978_vm10, %v2929_v48, %v2484_v18  ;;  %v7691_v21 = vpop.f32.mrf.mxu1 }
 0x310   :  { %v3294_v29 = vsel %vm3238_vm14, %v3229_v26, %v2792_v17  ;;  %v3861_v26 = vpop.f32.mrf.mxu3 }
 0x311   :  { %v2554_v19 = vpop.permute.xlu0 %2553 }
 0x312   :  { %v3075_v44 = vsel %vm3043_vm11, %v3010_v0, %v2554_v19 }
 0x313   :  { %v7693_v1 = vpop.f32.mrf.mxu0 }
 0x315   :  { %v2866_v63 = vpop.permute.xlu1 %2865 }
 0x316   :  { %v3386_v5 = vsel %vm3303_vm15, %v3294_v29, %v2866_v63  ;;  %v2724_v27 = vpop.permute.xlu2 %2723 }
 0x317   :  { %3711 = vmatmul.bf16.gmra.mxu2 %v3386_v5  ;;  %v7704_v8 = vpop.f32.mrf.mxu1 }
 0x318   :  { %v3863_v19 = vpop.f32.mrf.mxu3 }
 0x319   :  { %v2768_v33 = vpop.permute.xlu0 %2767 }
 0x31b   :  { %v7701_v60 = vpop.f32.mrf.mxu0 }
 0x31d   :  { %v2628_v61 = vpop.permute.xlu1 %2627 }
 0x31e   :  { %v3140_v17 = vsel %vm3108_vm12, %v3075_v44, %v2628_v61  ;;  %v9123_v44 = vld [vmem:[#allocation37_spill] sm:$0xff] }
 0x31f   :  { %v3205_v63 = vsel %vm3173_vm13, %v3140_v17, %v2698_v47  ;;  %v2968_v47 = vsel %vm2881_vm7, %v7284_v39, %v9123_v44  ;;  %v7718_v54 = vpop.f32.mrf.mxu1  ;;  %v9127_v44 = vshll.u32 %v7547_v57, 16 }
 0x320   :  { %v3270_v14 = vsel %vm3238_vm14, %v3205_v63, %v2768_v33  ;;  %v3036_v33 = vsel %vm2978_vm10, %v2968_v47, %v2510_v11  ;;  %v9128_v47 = vshrl.u32 %v7547_v57, 16 }
 0x321   :  { %v2580_v29 = vpop.permute.xlu0 %2579 }
 0x323   :  { %v3692_v5 = vpop.f32.mrf.mxu2 }
 0x324   :  { %v7698_v46 = vadd.f32 %v3861_v26, %v3692_v5  ;;  %v524_v26 = vld [vmem:[#allocation2 + $0x2cc] sm:$0x1] }
 0x325   :  { %v2842_v18 = vpop.permute.xlu1 %2841  ;;  %v525_v5 = vsel %vm5373_vm3, 0, %v524_v26  ;;  %v2029_v26 = vrot.slane %v9128_v47, 4 }
 0x326   :  { %9122 = vst [vmem:[#allocation18_spill] sm:$0xff] %v7698_v46  ;;  %v3350_v48 = vsel %vm3303_vm15, %v3270_v14, %v2842_v18  ;;  %v3101_v14 = vsel %vm3043_vm11, %v3036_v33, %v2580_v29  ;;  %v2512_v18 = vpop.permute.xlu2 %2511  ;;  %v7716_v46 = vpop.f32.mrf.mxu0  ;;  %v2027_v29 = vrot.slane %v9127_v44, 5 }
 0x327   :  { %3651 = vmatmul.bf16.gmra.mxu0 %v3350_v48  ;;  %526 = vst [vmem:[#allocation2 + $0x2cc] sm:$0x1] %v525_v5 }
 0x329   :  { %v2794_v0 = vpop.permute.xlu0 %2793 }
 0x32b   :  { %v3694_v61 = vpop.f32.mrf.mxu2 }
 0x32c   :  { %v7709_v17 = vadd.f32 %v3863_v19, %v3694_v61  ;;  %v9125_v19 = vshrl.u32 %v7545_v38, 16  ;;  %v9126_v61 = vshll.u32 %v7545_v38, 16 }
 0x32d   :  { %v2654_v63 = vpop.permute.xlu1 %2653 }
 0x32e   :  { %9124 = vst [vmem:[#allocation8_spill] sm:$0xff] %v7709_v17  ;;  %v3166_v48 = vsel %vm3108_vm12, %v3101_v14, %v2654_v63  ;;  %v2023_v11 = vrot.slane %v9125_v19, 4  ;;  %v2024_v42 = vrot.slane %v9126_v61, 5  ;;  %v735_v5 = vld [vmem:[#allocation2 + $0x2cc] sm:$0x1]  ;;  %v7731_v19 = vpop.f32.mrf.mxu0  ;;  %v2726_v20 = vpop.permute.xlu2 %2725 }
 0x32f   :  { %v3231_v39 = vsel %vm3173_vm13, %v3166_v48, %v2724_v27  ;;  %v2030_v27 = vor.u32 %v2029_v26, %v2027_v29  ;;  %v2033_v48 = vshll.u32 %v735_v5, 16 }
 0x330   :  { %v3296_v33 = vsel %vm3238_vm14, %v3231_v39, %v2794_v0  ;;  %v2025_v17 = vor.u32 %v2024_v42, %v2023_v11  ;;  %v7740_v42 = vpop.f32.mrf.mxu1 }
 0x331   :  { %v2582_v59 = vpop.permute.xlu0 %2581  ;;  %v2031_v61 = vrot.slane %v2030_v27, 4  ;;  %v2035_v23 = vrot.slane %v2033_v48, 5 }
 0x332   :  { %v2026_v38 = vrot.slane %v2025_v17, 4 }
 0x333   :  { %v2036_v0 = vsel %vm5403_vm6, %v2031_v61, %v2035_v23 }
 0x334   :  { %v2028_v57 = vsel %vm5403_vm6, %v2026_v38, %v2027_v29  ;;  %v2878_v47 = vunpack.c.l.b16 %v2036_v0 }
 0x335   :  { %v2868_v63 = vpop.permute.xlu1 %2867  ;;  %v2877_v39 = vunpack.c.l.b16 %v2028_v57 }
 0x336   :  { %v3389_v14 = vsel %vm3303_vm15, %v3296_v33, %v2868_v63  ;;  %v9129_v33 = vld [vmem:[#allocation29_spill] sm:$0xff]  ;;  %v7746_v58 = vpop.f32.mrf.mxu0  ;;  %v2514_v48 = vpop.permute.xlu2 %2513 }
 0x337   :  { %3716 = vmatmul.bf16.gmra.mxu2 %v3389_v14  ;;  %v2971_v11 = vsel %vm2881_vm7, %v7343_v28, %v9129_v33  ;;  %v2880_v63 = vpack.c.b16 %v2878_v47, %v2877_v39  ;;  %v3866_v14 = vpop.f32.mrf.mxu3 }
 0x338   :  { %v3038_v17 = vsel %vm2978_vm10, %v2971_v11, %v2512_v18  ;;  %v7752_v57 = vpop.f32.mrf.mxu1 }
 0x339   :  { %v2796_v44 = vpop.permute.xlu0 %2795  ;;  %v3103_v5 = vsel %vm3043_vm11, %v3038_v17, %v2582_v59  ;;  %4701 = vmatmul.msk.bf16.gmra.mxu3 %vm2881_vm7, %v2880_v63 }
 0x33d   :  { %v2656_v26 = vpop.permute.xlu1 %2655 }
 0x33e   :  { %v3168_v29 = vsel %vm3108_vm12, %v3103_v5, %v2656_v26  ;;  %v7755_v39 = vpop.f32.mrf.mxu0  ;;  %v2728_v26 = vpop.permute.xlu2 %2727 }
 0x33f   :  { %v3233_v23 = vsel %vm3173_vm13, %v3168_v29, %v2726_v20  ;;  %v3868_v0 = vpop.f32.mrf.mxu3  ;;  %v9132_v20 = vld [vmem:[#allocation38_spill] sm:$0xff] }
 0x340   :  { %v3298_v18 = vsel %vm3238_vm14, %v3233_v23, %v2796_v44  ;;  %v2974_v11 = vsel %vm2881_vm7, %v7458_v49, %v9132_v20  ;;  %v7765_v29 = vpop.f32.mrf.mxu1 }
 0x341   :  { %v2584_v38 = vpop.permute.xlu0 %2583  ;;  %v3040_v17 = vsel %vm2978_vm10, %v2974_v11, %v2514_v48 }
 0x342   :  { %v3697_v27 = vpop.f32.mrf.mxu2  ;;  %v3105_v63 = vsel %vm3043_vm11, %v3040_v17, %v2584_v38  ;;  %v9133_v38 = vld [vmem:[#allocation40_spill] sm:$0xff] }
 0x343   :  { %v7749_v28 = vadd.f32 %v3866_v14, %v3697_v27  ;;  %v2977_v20 = vsel %vm2881_vm7, %v7520_v9, %v9133_v38 }
 0x345   :  { %9130 = vst [vmem:[#allocation44_spill] sm:$0xff] %v7749_v28  ;;  %v2870_v61 = vpop.permute.xlu1 %2869 }
 0x346   :  { %v3392_v59 = vsel %vm3303_vm15, %v3298_v18, %v2870_v61  ;;  %v7768_v27 = vpop.f32.mrf.mxu0 }
 0x347   :  { %3721 = vmatmul.bf16.gmra.mxu2 %v3392_v59  ;;  %v2516_v59 = vpop.permute.xlu2 %2515 }
 0x349   :  { %v2798_v5 = vpop.permute.xlu0 %2797 }
 0x34a   :  { %v3699_v47 = vpop.f32.mrf.mxu2 }
 0x34b   :  { %v7757_v33 = vadd.f32 %v3868_v0, %v3699_v47  ;;  %v3871_v0 = vpop.f32.mrf.mxu3  ;;  %v7772_v47 = vpop.f32.mrf.mxu1 }
 0x34d   :  { %9131 = vst [vmem:[#allocation12_spill] sm:$0xff] %v7757_v33  ;;  %v2658_v44 = vpop.permute.xlu1 %2657 }
 0x34e   :  { %v3170_v14 = vsel %vm3108_vm12, %v3105_v63, %v2658_v44  ;;  %v7777_v11 = vpop.f32.mrf.mxu0 }
 0x34f   :  { %v3235_v23 = vsel %vm3173_vm13, %v3170_v14, %v2728_v26  ;;  %v3042_v26 = vsel %vm2978_vm10, %v2977_v20, %v2516_v59 }
 0x350   :  { %v3300_v18 = vsel %vm3238_vm14, %v3235_v23, %v2798_v5  ;;  %v2730_v23 = vpop.permute.xlu2 %2729 }
 0x351   :  { %v2586_v48 = vpop.permute.xlu0 %2585 }
 0x352   :  { %v3107_v5 = vsel %vm3043_vm11, %v3042_v26, %v2586_v48  ;;  %v9136_v48 = vld [vmem:[#allocation45_spill] sm:$0xff]  ;;  %v9138_v26 = vld [vmem:[#allocation42_spill] sm:$0xff] }
 0x353   :  { %v7785_v33 = vpop.f32.mrf.mxu1 }
 0x355   :  { %v2872_v61 = vpop.permute.xlu1 %2871 }
 0x356   :  { %v3395_v49 = vsel %vm3303_vm15, %v3300_v18, %v2872_v61 }
 0x357   :  { %3726 = vmatmul.bf16.gmra.mxu2 %v3395_v49  ;;  %v3873_v49 = vpop.f32.mrf.mxu3 }
 0x359   :  { %v2800_v61 = vpop.permute.xlu0 %2799 }
 0x35c   :  { %v3702_v17 = vpop.f32.mrf.mxu2 }
 0x35d   :  { %v7780_v44 = vadd.f32 %v3871_v0, %v3702_v17  ;;  %v2660_v63 = vpop.permute.xlu1 %2659  ;;  %v7790_v0 = vpop.f32.mrf.mxu0  ;;  %v7795_v17 = vadd.f32 %v9136_v48, %v7363_v7 }
 0x35e   :  { %v3172_v14 = vsel %vm3108_vm12, %v3107_v5, %v2660_v63  ;;  %v7799_v63 = vadd.f32 %v9138_v26, %v7328_v56  ;;  %v9140_v5 = vld [vmem:[#allocation3_spill] sm:$0xff] }
 0x35f   :  { %9134 = vst [vmem:[#allocation31_spill] sm:$0xff] %v7780_v44  ;;  %v3237_v18 = vsel %vm3173_vm13, %v3172_v14, %v2730_v23  ;;  %v7803_v14 = vadd.f32 %v9140_v5, %v7405_v10  ;;  %v7805_v23 = vpop.f32.mrf.mxu1  ;;  %v3907_v56 = vsel %vm2881_vm7, %v7795_v17, 0.0  ;;  %v7834_v5 = vadd.f32 %v6653_v22, %v7504_v35 }
 0x360   :  { %v3302_v38 = vsel %vm3238_vm14, %v3237_v18, %v2800_v61  ;;  %9137 = vst [vmem:[#allocation17_spill] sm:$0xff] %v7795_v17  ;;  %v4041_v61 = vmul.f32 %v7795_v17, %v7795_v17  ;;  %v4040_v7 = vmul.f32 %v7799_v63, %v7799_v63 }
 0x361   :  { %9139 = vst [vmem:[#allocation39_spill] sm:$0xff] %v7799_v63  ;;  %v4042_v10 = vmul.f32 %v7803_v14, %v7803_v14 }
 0x362   :  { %9141 = vst [vmem:[#allocation50_spill] sm:$0xff] %v7803_v14  ;;  %v4105_v48 = vsel %vm2881_vm7, %v4041_v61, 0.0 }
 0x363   :  { %9146 = vst [vmem:[#allocation46_spill] sm:$0xff] %v7834_v5 }
 0x364   :  { %v3704_v9 = vpop.f32.mrf.mxu2 }
 0x365   :  { %v7788_v28 = vadd.f32 %v3873_v49, %v3704_v9  ;;  %v2874_v59 = vpop.permute.xlu1 %2873  ;;  %v7807_v18 = vpop.f32.mrf.mxu0  ;;  %v9142_v49 = vld [vmem:[#allocation49_spill] sm:$0xff] }
 0x366   :  { %v3398_v20 = vsel %vm3303_vm15, %v3302_v38, %v2874_v59  ;;  %v7813_v9 = vadd.f32 %v9142_v49, %v7447_v31  ;;  %v9144_v38 = vld [vmem:[#allocation51_spill] sm:$0xff]  ;;  %v3909_v31 = vsel %vm2881_vm7, %v7803_v14, 0.0  ;;  %v4104_v49 = vsel %vm2881_vm7, %v4040_v7, 0.0 }
 0x367   :  { %9135 = vst [vmem:[#allocation27_spill] sm:$0xff] %v7788_v28  ;;  %3731 = vmatmul.bf16.gmra.mxu2 %v3398_v20  ;;  %v7823_v59 = vadd.f32 %v9144_v38, %v7472_v52  ;;  %v3906_v20 = vsel %vm2881_vm7, %v7799_v63, 0.0  ;;  %v4107_v52 = vsel %vm2881_vm7, %v4042_v10, 0.0  ;;  %v7844_v14 = vadd.f32 %v6704_v32, %v7536_v25  ;;  %v7855_v44 = vpop.f32.mrf.mxu1 }
 0x368   :  { %9143 = vst [vmem:[#allocation32_spill] sm:$0xff] %v7813_v9  ;;  %v4043_v26 = vmul.f32 %v7813_v9, %v7813_v9  ;;  %v3908_v17 = vadd.f32 %v3907_v56, %v3906_v20  ;;  %v3911_v38 = vsel %vm2881_vm7, %v7813_v9, 0.0  ;;  %v4106_v63 = vadd.f32 %v4105_v48, %v4104_v49  ;;  %v9147_v56 = vld [vmem:[#allocation7_spill] sm:$0xff] }
 0x369   :  { %9145 = vst [vmem:[#allocation19_spill] sm:$0xff] %v7823_v59  ;;  %v4044_v61 = vmul.f32 %v7823_v59, %v7823_v59  ;;  %v3913_v35 = vsel %vm2881_vm7, %v7823_v59, 0.0  ;;  %v4045_v7 = vmul.f32 %v7834_v5, %v7834_v5  ;;  %v7853_v10 = vadd.f32 %v9147_v56, %v7575_v36  ;;  %v3876_v36 = vpop.f32.mrf.mxu3 }
 0x36a   :  { %v3910_v28 = vadd.f32 %v3909_v31, %v3908_v17  ;;  %v4109_v22 = vsel %vm2881_vm7, %v4043_v26, 0.0  ;;  %v4108_v20 = vadd.f32 %v4107_v52, %v4106_v63  ;;  %v3915_v17 = vsel %vm2881_vm7, %v7834_v5, 0.0  ;;  %v9148_v31 = vld [vmem:[#allocation52_spill] sm:$0xff] }
 0x36b   :  { %v4111_v25 = vsel %vm2881_vm7, %v4044_v61, 0.0  ;;  %v4046_v48 = vmul.f32 %v7844_v14, %v7844_v14  ;;  %v7866_v26 = vadd.f32 %v9148_v31, %v7606_v16  ;;  %v3917_v52 = vsel %vm2881_vm7, %v7844_v14, 0.0  ;;  %v9149_v61 = vld [vmem:[#allocation53_spill] sm:$0xff] }
 0x36c   :  { %v3912_v9 = vadd.f32 %v3911_v38, %v3910_v28  ;;  %v4110_v49 = vadd.f32 %v4109_v22, %v4108_v20  ;;  %v4113_v28 = vsel %vm2881_vm7, %v4045_v7, 0.0  ;;  %v4047_v38 = vmul.f32 %v7853_v10, %v7853_v10 }
 0x36d   :  { %v7857_v32 = vpop.f32.mrf.mxu0  ;;  %v7875_v56 = vadd.f32 %v9149_v61, %v7626_v41  ;;  %v4115_v22 = vsel %vm2881_vm7, %v4046_v48, 0.0  ;;  %v7886_v7 = vadd.f32 %v7511_v3, %v7638_v12  ;;  %v7917_v61 = vadd.f32 %v7614_v37, %v7673_v51 }
 0x36e   :  { %v3914_v63 = vadd.f32 %v3913_v35, %v3912_v9  ;;  %v4112_v59 = vadd.f32 %v4111_v25, %v4110_v49  ;;  %v3919_v9 = vsel %vm2881_vm7, %v7853_v10, 0.0  ;;  %v4048_v35 = vmul.f32 %v7866_v26, %v7866_v26 }
 0x36f   :  { %v4117_v31 = vsel %vm2881_vm7, %v4047_v38, 0.0  ;;  %v4049_v25 = vmul.f32 %v7875_v56, %v7875_v56  ;;  %v4050_v12 = vmul.f32 %v7886_v7, %v7886_v7  ;;  %v4053_v51 = vmul.f32 %v7917_v61, %v7917_v61 }
 0x370   :  { %v3916_v55 = vadd.f32 %v3915_v17, %v3914_v63  ;;  %v4114_v20 = vadd.f32 %v4113_v28, %v4112_v59  ;;  %v7895_v17 = vadd.f32 %v7552_v40, %v7650_v24  ;;  %v4119_v3 = vsel %vm2881_vm7, %v4048_v35, 0.0  ;;  %v7908_v63 = vpop.f32.mrf.mxu1 }
 0x371   :  { %v7906_v59 = vadd.f32 %v7581_v62, %v7661_v2  ;;  %v4121_v28 = vsel %vm2881_vm7, %v4049_v25, 0.0  ;;  %v4123_v62 = vsel %vm2881_vm7, %v4050_v12, 0.0  ;;  %v7935_v25 = vadd.f32 %v7646_v53, %v7693_v1 }
 0x372   :  { %v3918_v41 = vadd.f32 %v3917_v52, %v3916_v55  ;;  %v4116_v48 = vadd.f32 %v4115_v22, %v4114_v20  ;;  %v3923_v55 = vsel %vm2881_vm7, %v7875_v56, 0.0  ;;  %v3925_v52 = vsel %vm2881_vm7, %v7886_v7, 0.0 }
 0x373   :  { %v4051_v38 = vmul.f32 %v7895_v17, %v7895_v17  ;;  %v3927_v2 = vsel %vm2881_vm7, %v7895_v17, 0.0  ;;  %v4052_v35 = vmul.f32 %v7906_v59, %v7906_v59  ;;  %v7926_v20 = vadd.f32 %v7631_v13, %v7683_v6 }
 0x374   :  { %v4118_v40 = vadd.f32 %v4117_v31, %v4116_v48  ;;  %v3929_v37 = vsel %vm2881_vm7, %v7906_v59, 0.0  ;;  %v3931_v13 = vsel %vm2881_vm7, %v7917_v61, 0.0  ;;  %v4129_v53 = vsel %vm2881_vm7, %v4053_v51, 0.0 }
 0x375   :  { %v7897_v49 = vpop.f32.mrf.mxu0  ;;  %v4054_v6 = vmul.f32 %v7926_v20, %v7926_v20  ;;  %v3933_v1 = vsel %vm2881_vm7, %v7926_v20, 0.0 }
 0x376   :  { %v4120_v22 = vadd.f32 %v4119_v3, %v4118_v40  ;;  %v4127_v3 = vsel %vm2881_vm7, %v4052_v35, 0.0 }
 0x37b   :  { %v3707_v5 = vpop.f32.mrf.mxu2 }
 0x37c   :  { %v7877_v16 = vadd.f32 %v3876_v36, %v3707_v5  ;;  %v3921_v5 = vsel %vm2881_vm7, %v7866_v26, 0.0  ;;  %v3920_v36 = vadd.f32 %v3919_v9, %v3918_v41  ;;  %v4122_v41 = vadd.f32 %v4121_v28, %v4120_v22 }
 0x37d   :  { %v4055_v28 = vmul.f32 %v7935_v25, %v7935_v25  ;;  %v4131_v22 = vsel %vm2881_vm7, %v4054_v6, 0.0  ;;  %v7986_v6 = vpop.f32.mrf.mxu3 }
 0x37e   :  { %v3922_v24 = vadd.f32 %v3921_v5, %v3920_v36  ;;  %v4125_v5 = vsel %vm2881_vm7, %v4051_v38, 0.0  ;;  %v4124_v48 = vadd.f32 %v4123_v62, %v4122_v41  ;;  %v7957_v38 = vpop.f32.mrf.mxu1 }
 0x380   :  { %v3924_v9 = vadd.f32 %v3923_v55, %v3922_v24  ;;  %v7944_v55 = vadd.f32 %v7659_v30, %v7701_v60  ;;  %v4126_v12 = vadd.f32 %v4125_v5, %v4124_v48  ;;  %v7946_v24 = vpop.f32.mrf.mxu0  ;;  %v7975_v5 = vadd.f32 %v7691_v21, %v7746_v58 }
 0x382   :  { %v3926_v31 = vadd.f32 %v3925_v52, %v3924_v9  ;;  %v7955_v52 = vadd.f32 %v7668_v45, %v7716_v46  ;;  %v4128_v30 = vadd.f32 %v4127_v3, %v4126_v12  ;;  %v3935_v9 = vsel %vm2881_vm7, %v7935_v25, 0.0 }
 0x383   :  { %v4056_v62 = vmul.f32 %v7944_v55, %v7944_v55  ;;  %v4133_v45 = vsel %vm2881_vm7, %v4055_v28, 0.0  ;;  %v3937_v46 = vsel %vm2881_vm7, %v7944_v55, 0.0  ;;  %v3943_v28 = vsel %vm2881_vm7, %v7975_v5, 0.0 }
 0x384   :  { %v3928_v36 = vadd.f32 %v3927_v2, %v3926_v31  ;;  %v7966_v2 = vadd.f32 %v7681_v4, %v7731_v19  ;;  %v4130_v35 = vadd.f32 %v4129_v53, %v4128_v30  ;;  %v4057_v31 = vmul.f32 %v7955_v52, %v7955_v52 }
 0x385   :  { %v4135_v48 = vsel %vm2881_vm7, %v4056_v62, 0.0  ;;  %v3939_v4 = vsel %vm2881_vm7, %v7955_v52, 0.0  ;;  %v7995_v53 = vadd.f32 %v7718_v54, %v7768_v27 }
 0x386   :  { %v3930_v40 = vadd.f32 %v3929_v37, %v3928_v36  ;;  %v4132_v37 = vadd.f32 %v4131_v22, %v4130_v35  ;;  %v4058_v19 = vmul.f32 %v7966_v2, %v7966_v2  ;;  %v7984_v36 = vadd.f32 %v7704_v8, %v7755_v39  ;;  %v8006_v22 = vpop.f32.mrf.mxu1 }
 0x387   :  { %v4137_v58 = vsel %vm2881_vm7, %v4057_v31, 0.0  ;;  %v3941_v12 = vsel %vm2881_vm7, %v7966_v2, 0.0  ;;  %v4061_v35 = vmul.f32 %v7995_v53, %v7995_v53 }
 0x388   :  { %v3932_v60 = vadd.f32 %v3931_v13, %v3930_v40  ;;  %v4134_v3 = vadd.f32 %v4133_v45, %v4132_v37  ;;  %v3647_v21 = vpop.f32.mrf.mxu0  ;;  %v4059_v40 = vmul.f32 %v7975_v5, %v7975_v5  ;;  %v4139_v39 = vsel %vm2881_vm7, %v4058_v19, 0.0 }
 0x389   :  { %v4060_v30 = vmul.f32 %v7984_v36, %v7984_v36  ;;  %v3945_v27 = vsel %vm2881_vm7, %v7984_v36, 0.0  ;;  %v8024_v37 = vadd.f32 %v7765_v29, %v7807_v18 }
 0x38a   :  { %v3934_v41 = vadd.f32 %v3933_v1, %v3932_v60  ;;  %v4136_v1 = vadd.f32 %v4135_v48, %v4134_v3  ;;  %v8004_v60 = vadd.f32 %v7740_v42, %v7777_v11  ;;  %v4141_v54 = vsel %vm2881_vm7, %v4059_v40, 0.0 }
 0x38b   :  { %v4143_v42 = vsel %vm2881_vm7, %v4060_v30, 0.0  ;;  %v3947_v11 = vsel %vm2881_vm7, %v7995_v53, 0.0  ;;  %v8035_v3 = vadd.f32 %v7772_v47, %v7857_v32  ;;  %v4064_v40 = vmul.f32 %v8024_v37, %v8024_v37 }
 0x38c   :  { %v3936_v51 = vadd.f32 %v3935_v9, %v3934_v41  ;;  %v4138_v9 = vadd.f32 %v4137_v58, %v4136_v1  ;;  %v8015_v41 = vadd.f32 %v7752_v57, %v7790_v0  ;;  %v4062_v31 = vmul.f32 %v8004_v60, %v8004_v60 }
 0x38d   :  { %v4145_v57 = vsel %vm2881_vm7, %v4061_v35, 0.0  ;;  %v3949_v0 = vsel %vm2881_vm7, %v8004_v60, 0.0  ;;  %v8044_v1 = vadd.f32 %v7785_v33, %v7897_v49  ;;  %v3953_v32 = vsel %vm2881_vm7, %v8024_v37, 0.0 }
 0x38e   :  { %v3938_v13 = vadd.f32 %v3937_v46, %v3936_v51  ;;  %v4140_v45 = vadd.f32 %v4139_v39, %v4138_v9  ;;  %v4063_v19 = vmul.f32 %v8015_v41, %v8015_v41  ;;  %v4147_v18 = vsel %vm2881_vm7, %v4062_v31, 0.0  ;;  %v3826_v9 = vpop.f32.mrf.mxu1 }
 0x38f   :  { %v8053_v30 = vadd.f32 %v7805_v23, %v7946_v24  ;;  %v4151_v33 = vsel %vm2881_vm7, %v4064_v40, 0.0  ;;  %v3955_v49 = vsel %vm2881_vm7, %v8035_v3, 0.0  ;;  %v4066_v35 = vmul.f32 %v8044_v1, %v8044_v1 }
 0x390   :  { %v3940_v8 = vadd.f32 %v3939_v4, %v3938_v13  ;;  %v4142_v51 = vadd.f32 %v4141_v54, %v4140_v45  ;;  %v8026_v4 = vpop.f32.mrf.mxu3  ;;  %v3649_v29 = vpop.f32.mrf.mxu0  ;;  %v4149_v47 = vsel %vm2881_vm7, %v4063_v19, 0.0  ;;  %v8063_v45 = vadd.f32 %v7855_v44, %v3647_v21 }
 0x391   :  { %v3957_v24 = vsel %vm2881_vm7, %v8044_v1, 0.0  ;;  %v8071_v31 = vadd.f32 %v7908_v63, %v3649_v29  ;;  %v4155_v44 = vsel %vm2881_vm7, %v4066_v35, 0.0  ;;  %v3959_v21 = vsel %vm2881_vm7, %v8053_v30, 0.0 }
 0x392   :  { %v3942_v62 = vadd.f32 %v3941_v12, %v3940_v8  ;;  %v4144_v13 = vadd.f32 %v4143_v42, %v4142_v51  ;;  %v3951_v12 = vsel %vm2881_vm7, %v8015_v41, 0.0  ;;  %v4068_v19 = vmul.f32 %v8063_v45, %v8063_v45 }
 0x393   :  { %v3961_v29 = vsel %vm2881_vm7, %v8063_v45, 0.0 }
 0x394   :  { %v3944_v46 = vadd.f32 %v3943_v28, %v3942_v62  ;;  %v4146_v8 = vadd.f32 %v4145_v57, %v4144_v13  ;;  %v4065_v28 = vmul.f32 %v8035_v3, %v8035_v3 }
 0x396   :  { %v3946_v48 = vadd.f32 %v3945_v27, %v3944_v46  ;;  %v4148_v62 = vadd.f32 %v4147_v18, %v4146_v8  ;;  %v8055_v27 = vpop.f32.mrf.mxu2  ;;  %v4153_v23 = vsel %vm2881_vm7, %v4065_v28, 0.0  ;;  %v3828_v28 = vpop.f32.mrf.mxu1 }
 0x398   :  { %v3948_v58 = vadd.f32 %v3947_v11, %v3946_v48  ;;  %v4150_v46 = vadd.f32 %v4149_v47, %v4148_v62  ;;  %v4067_v11 = vmul.f32 %v8053_v30, %v8053_v30  ;;  %v8073_v57 = vpop.f32.mrf.mxu3  ;;  %v4159_v47 = vsel %vm2881_vm7, %v4068_v19, 0.0 }
 0x39a   :  { %v3950_v39 = vadd.f32 %v3949_v0, %v3948_v58  ;;  %v4152_v51 = vadd.f32 %v4151_v33, %v4150_v46  ;;  %v4157_v63 = vsel %vm2881_vm7, %v4067_v11, 0.0  ;;  %v8096_v33 = vadd.f32 %v3826_v9, %v7180_v34 }
 0x39b   :  { %v8104_v11 = vadd.f32 %v3828_v28, %v7212_v43 }
 0x39c   :  { %v3952_v54 = vadd.f32 %v3951_v12, %v3950_v39  ;;  %v4154_v58 = vadd.f32 %v4153_v23, %v4152_v51  ;;  %v4069_v12 = vmul.f32 %v8071_v31, %v8071_v31  ;;  %v3969_v43 = vsel %vm2881_vm7, %v8096_v33, 0.0 }
 0x39e   :  { %v3954_v42 = vadd.f32 %v3953_v32, %v3952_v54  ;;  %v4156_v40 = vadd.f32 %v4155_v44, %v4154_v58  ;;  %v8088_v39 = vpop.f32.mrf.mxu2 }
 0x3a0   :  { %v3956_v48 = vadd.f32 %v3955_v49, %v3954_v42  ;;  %v4158_v62 = vadd.f32 %v4157_v63, %v4156_v40  ;;  %v4161_v49 = vsel %vm2881_vm7, %v4069_v12, 0.0 }
 0x3a2   :  { %v3958_v18 = vadd.f32 %v3957_v24, %v3956_v48  ;;  %v4160_v46 = vadd.f32 %v4159_v47, %v4158_v62  ;;  %v8101_v24 = vpop.f32.mrf.mxu3  ;;  %v3971_v47 = vsel %vm2881_vm7, %v8104_v11, 0.0 }
 0x3a4   :  { %v3652_v0 = vpop.f32.mrf.mxu0  ;;  %v3960_v8 = vadd.f32 %v3959_v21, %v3958_v18  ;;  %v4162_v34 = vadd.f32 %v4161_v49, %v4160_v46  ;;  %v8122_v18 = vadd.f32 %v7302_v50, %v7306_v15  ;;  %v9151_v49 = vld [vmem:[#allocation11_spill] sm:$0xff] }
 0x3a5   :  { %v8081_v13 = vadd.f32 %v7957_v38, %v3652_v0  ;;  %v3963_v38 = vsel %vm2881_vm7, %v8071_v31, 0.0  ;;  %v4072_v0 = vmul.f32 %v8096_v33, %v8096_v33 }
 0x3a6   :  { %v3962_v54 = vadd.f32 %v3961_v29, %v3960_v8  ;;  %v8125_v29 = vpop.f32.mrf.mxu2  ;;  %v4075_v15 = vmul.f32 %v8122_v18, %v8122_v18 }
 0x3a7   :  { %v4070_v32 = vmul.f32 %v8081_v13, %v8081_v13  ;;  %v3965_v35 = vsel %vm2881_vm7, %v8081_v13, 0.0  ;;  %v4167_v8 = vsel %vm2881_vm7, %v4072_v0, 0.0  ;;  %v9154_v0 = vld [vmem:[#allocation6_spill] sm:$0xff] }
 0x3a8   :  { %v3964_v42 = vadd.f32 %v3963_v38, %v3962_v54  ;;  %v9150_v38 = vld [vmem:[#allocation5_spill] sm:$0xff] }
 0x3a9   :  { %v4163_v51 = vsel %vm2881_vm7, %v4070_v32, 0.0  ;;  %v4074_v32 = vmul.f32 %v9150_v38, %v9150_v38  ;;  %v3973_v50 = vsel %vm2881_vm7, %v9150_v38, 0.0 }
 0x3aa   :  { %v3966_v9 = vadd.f32 %v3965_v35, %v3964_v42  ;;  %v4164_v19 = vadd.f32 %v4163_v51, %v4162_v34  ;;  %v9152_v35 = vld [vmem:[#allocation26_spill] sm:$0xff]  ;;  %v8141_v51 = vpop.f32.mrf.mxu3 }
 0x3ab   :  { %v8139_v46 = vadd.f32 %v9152_v35, %v9151_v49  ;;  %v4171_v34 = vsel %vm2881_vm7, %v4074_v32, 0.0 }
 0x3ac   :  { %v3654_v23 = vpop.f32.mrf.mxu0 }
 0x3ad   :  { %v8108_v48 = vadd.f32 %v8006_v22, %v3654_v23  ;;  %v4073_v22 = vmul.f32 %v8104_v11, %v8104_v11  ;;  %9153 = vst [vmem:[#allocation21_spill] sm:$0xff] %v8139_v46 }
 0x3af   :  { %v3967_v44 = vsel %vm2881_vm7, %v8108_v48, 0.0  ;;  %v4071_v21 = vmul.f32 %v8108_v48, %v8108_v48  ;;  %v4169_v54 = vsel %vm2881_vm7, %v4073_v22, 0.0  ;;  %v4077_v22 = vmul.f32 %v8139_v46, %v8139_v46 }
 0x3b0   :  { %v3968_v58 = vadd.f32 %v3967_v44, %v3966_v9  ;;  %v3975_v9 = vsel %vm2881_vm7, %v8122_v18, 0.0  ;;  %v4076_v44 = vmul.f32 %v9154_v0, %v9154_v0 }
 0x3b1   :  { %v4165_v63 = vsel %vm2881_vm7, %v4071_v21, 0.0  ;;  %v4177_v35 = vsel %vm2881_vm7, %v4077_v22, 0.0 }
 0x3b2   :  { %v3970_v12 = vadd.f32 %v3969_v43, %v3968_v58  ;;  %v4166_v40 = vadd.f32 %v4165_v63, %v4164_v19  ;;  %v4173_v58 = vsel %vm2881_vm7, %v4075_v15, 0.0  ;;  %v3977_v43 = vsel %vm2881_vm7, %v9154_v0, 0.0  ;;  %v9155_v63 = vld [vmem:[#allocation24_spill] sm:$0xff]  ;;  %v9170_v0 = vld [vmem:[#allocation27_spill] sm:$0xff] }
 0x3b4   :  { %v3972_v28 = vadd.f32 %v3971_v47, %v3970_v12  ;;  %v4168_v62 = vadd.f32 %v4167_v8, %v4166_v40  ;;  %v9156_v12 = vld [vmem:[#allocation36_spill] sm:$0xff] }
 0x3b5   :  { %v8155_v40 = vadd.f32 %v9156_v12, %v9155_v63  ;;  %v8174_v12 = vpop.f32.mrf.mxu3 }
 0x3b6   :  { %v3974_v42 = vadd.f32 %v3973_v50, %v3972_v28  ;;  %v4170_v23 = vadd.f32 %v4169_v54, %v4168_v62  ;;  %v4175_v28 = vsel %vm2881_vm7, %v4076_v44, 0.0  ;;  %v3979_v62 = vsel %vm2881_vm7, %v8139_v46, 0.0  ;;  %v9158_v54 = vld [vmem:[#allocation14_spill] sm:$0xff] }
 0x3b7   :  { %9157 = vst [vmem:[#allocation9_spill] sm:$0xff] %v8155_v40  ;;  %v4078_v50 = vmul.f32 %v9158_v54, %v9158_v54 }
 0x3b8   :  { %v3976_v21 = vadd.f32 %v3975_v9, %v3974_v42  ;;  %v4172_v19 = vadd.f32 %v4171_v34, %v4170_v23  ;;  %v3981_v42 = vsel %vm2881_vm7, %v9158_v54, 0.0  ;;  %v4079_v23 = vmul.f32 %v8155_v40, %v8155_v40  ;;  %v9167_v54 = vld [vmem:[#allocation44_spill] sm:$0xff] }
 0x3b9   :  { %v4179_v44 = vsel %vm2881_vm7, %v4078_v50, 0.0  ;;  %v4088_v46 = vmul.f32 %v9167_v54, %v9167_v54 }
 0x3ba   :  { %v3978_v8 = vadd.f32 %v3977_v43, %v3976_v21  ;;  %v4174_v47 = vadd.f32 %v4173_v58, %v4172_v19  ;;  %v8157_v32 = vpop.f32.mrf.mxu2  ;;  %v3983_v21 = vsel %vm2881_vm7, %v8155_v40, 0.0  ;;  %v9159_v19 = vld [vmem:[#allocation10_spill] sm:$0xff]  ;;  %v4181_v22 = vsel %vm2881_vm7, %v4079_v23, 0.0 }
 0x3bb   :  { %v4080_v58 = vmul.f32 %v9159_v19, %v9159_v19 }
 0x3bc   :  { %v3980_v15 = vadd.f32 %v3979_v62, %v3978_v8  ;;  %v4176_v49 = vadd.f32 %v4175_v28, %v4174_v47  ;;  %v3985_v8 = vsel %vm2881_vm7, %v9159_v19, 0.0  ;;  %v9160_v47 = vld [vmem:[#allocation30_spill] sm:$0xff]  ;;  %v9162_v19 = vld [vmem:[#allocation43_spill] sm:$0xff] }
 0x3bd   :  { %v4081_v28 = vmul.f32 %v9160_v47, %v9160_v47 }
 0x3be   :  { %v3982_v34 = vadd.f32 %v3981_v42, %v3980_v15  ;;  %v4178_v9 = vadd.f32 %v4177_v35, %v4176_v49  ;;  %v4183_v49 = vsel %vm2881_vm7, %v4080_v58, 0.0  ;;  %v3987_v35 = vsel %vm2881_vm7, %v9160_v47, 0.0  ;;  %v9161_v42 = vld [vmem:[#allocation15_spill] sm:$0xff]  ;;  %v9163_v47 = vld [vmem:[#allocation28_spill] sm:$0xff] }
 0x3bf   :  { %v4084_v40 = vmul.f32 %v9163_v47, %v9163_v47 }
 0x3c0   :  { %v3984_v43 = vadd.f32 %v3983_v21, %v3982_v34  ;;  %v4180_v63 = vadd.f32 %v4179_v44, %v4178_v9  ;;  %v4082_v34 = vmul.f32 %v9161_v42, %v9161_v42  ;;  %v4185_v44 = vsel %vm2881_vm7, %v4081_v28, 0.0 }
 0x3c1   :  { %v3989_v21 = vsel %vm2881_vm7, %v9161_v42, 0.0 }
 0x3c2   :  { %v3986_v62 = vadd.f32 %v3985_v8, %v3984_v43  ;;  %v4182_v50 = vadd.f32 %v4181_v22, %v4180_v63  ;;  %v8181_v15 = vpop.f32.mrf.mxu2  ;;  %v4083_v43 = vmul.f32 %v9162_v19, %v9162_v19  ;;  %v4187_v58 = vsel %vm2881_vm7, %v4082_v34, 0.0  ;;  %v8205_v34 = vpop.f32.mrf.mxu3 }
 0x3c3   :  { %v3991_v8 = vsel %vm2881_vm7, %v9162_v19, 0.0 }
 0x3c4   :  { %v3988_v9 = vadd.f32 %v3987_v35, %v3986_v62  ;;  %v4184_v23 = vadd.f32 %v4183_v49, %v4182_v50  ;;  %v4189_v28 = vsel %vm2881_vm7, %v4083_v43, 0.0  ;;  %v3993_v49 = vsel %vm2881_vm7, %v9163_v47, 0.0  ;;  %v9164_v35 = vld [vmem:[#allocation16_spill] sm:$0xff] }
 0x3c5   :  { %v4085_v42 = vmul.f32 %v9164_v35, %v9164_v35 }
 0x3c6   :  { %v3990_v63 = vadd.f32 %v3989_v21, %v3988_v9  ;;  %v4186_v22 = vadd.f32 %v4185_v44, %v4184_v23  ;;  %v4191_v21 = vsel %vm2881_vm7, %v4084_v40, 0.0 }
 0x3c7   :  { %v4193_v47 = vsel %vm2881_vm7, %v4085_v42, 0.0 }
 0x3c8   :  { %v3992_v62 = vadd.f32 %v3991_v8, %v3990_v63  ;;  %v4188_v50 = vadd.f32 %v4187_v58, %v4186_v22  ;;  %v3995_v63 = vsel %vm2881_vm7, %v9164_v35, 0.0  ;;  %v9165_v22 = vld [vmem:[#allocation18_spill] sm:$0xff] }
 0x3c9   :  { %v4086_v43 = vmul.f32 %v9165_v22, %v9165_v22 }
 0x3ca   :  { %v4190_v9 = vadd.f32 %v4189_v28, %v4188_v50  ;;  %v3994_v23 = vadd.f32 %v3993_v49, %v3992_v62  ;;  %v8203_v44 = vpop.f32.mrf.mxu2  ;;  %v3997_v50 = vsel %vm2881_vm7, %v9165_v22, 0.0  ;;  %v9166_v62 = vld [vmem:[#allocation8_spill] sm:$0xff] }
 0x3cb   :  { %v4087_v28 = vmul.f32 %v9166_v62, %v9166_v62  ;;  %v4195_v40 = vsel %vm2881_vm7, %v4086_v43, 0.0  ;;  %v3999_v35 = vsel %vm2881_vm7, %v9166_v62, 0.0  ;;  %v4199_v43 = vsel %vm2881_vm7, %v4088_v46, 0.0  ;;  %v9169_v62 = vld [vmem:[#allocation31_spill] sm:$0xff] }
 0x3cc   :  { %v3996_v58 = vadd.f32 %v3995_v63, %v3994_v23  ;;  %v4192_v8 = vadd.f32 %v4191_v21, %v4190_v9  ;;  %v4001_v21 = vsel %vm2881_vm7, %v9167_v54, 0.0  ;;  %v9168_v63 = vld [vmem:[#allocation12_spill] sm:$0xff]  ;;  %v4005_v54 = vsel %vm2881_vm7, %v9169_v62, 0.0 }
 0x3cd   :  { %v4197_v42 = vsel %vm2881_vm7, %v4087_v28, 0.0  ;;  %v4089_v22 = vmul.f32 %v9168_v63, %v9168_v63  ;;  %v3896_v28 = vpop.f32.mrf.mxu3  ;;  %v8239_v46 = vadd.f32 %v7986_v6, %v8055_v27  ;;  %v4009_v6 = vsel %vm2881_vm7, %v7877_v16, 0.0 }
 0x3ce   :  { %v3998_v49 = vadd.f32 %v3997_v50, %v3996_v58  ;;  %v4194_v19 = vadd.f32 %v4193_v47, %v4192_v8  ;;  %v4003_v50 = vsel %vm2881_vm7, %v9168_v63, 0.0 }
 0x3cf   :  { %v4093_v27 = vmul.f32 %v8239_v46, %v8239_v46 }
 0x3d0   :  { %v4000_v23 = vadd.f32 %v3999_v35, %v3998_v49  ;;  %v4196_v9 = vadd.f32 %v4195_v40, %v4194_v19  ;;  %v4090_v35 = vmul.f32 %v9169_v62, %v9169_v62  ;;  %v4201_v40 = vsel %vm2881_vm7, %v4089_v22, 0.0 }
 0x3d1   :  { %v4092_v22 = vmul.f32 %v7877_v16, %v7877_v16 }
 0x3d2   :  { %v4002_v58 = vadd.f32 %v4001_v21, %v4000_v23  ;;  %v4198_v47 = vadd.f32 %v4197_v42, %v4196_v9  ;;  %v3724_v8 = vpop.f32.mrf.mxu2  ;;  %v4091_v23 = vmul.f32 %v9170_v0, %v9170_v0  ;;  %v4203_v21 = vsel %vm2881_vm7, %v4090_v35, 0.0 }
 0x3d4   :  { %v4004_v19 = vadd.f32 %v4003_v50, %v4002_v58  ;;  %v4200_v49 = vadd.f32 %v4199_v43, %v4198_v47  ;;  %v4007_v58 = vsel %vm2881_vm7, %v9170_v0, 0.0  ;;  %v8248_v47 = vadd.f32 %v8026_v4, %v8088_v39 }
 0x3d5   :  { %v4205_v62 = vsel %vm2881_vm7, %v4091_v23, 0.0  ;;  %v4207_v4 = vsel %vm2881_vm7, %v4092_v22, 0.0  ;;  %v4011_v39 = vsel %vm2881_vm7, %v8239_v46, 0.0  ;;  %v8266_v23 = vadd.f32 %v8101_v24, %v8157_v32 }
 0x3d6   :  { %v4006_v9 = vadd.f32 %v4005_v54, %v4004_v19  ;;  %v4202_v42 = vadd.f32 %v4201_v40, %v4200_v49  ;;  %v8257_v54 = vadd.f32 %v8073_v57, %v8125_v29  ;;  %v4094_v40 = vmul.f32 %v8248_v47, %v8248_v47 }
 0x3d7   :  { %v4209_v57 = vsel %vm2881_vm7, %v4093_v27, 0.0  ;;  %v4013_v29 = vsel %vm2881_vm7, %v8248_v47, 0.0 }
 0x3d8   :  { %v4008_v43 = vadd.f32 %v4007_v58, %v4006_v9  ;;  %v4204_v50 = vadd.f32 %v4203_v21, %v4202_v42  ;;  %v8275_v21 = vadd.f32 %v8141_v51, %v8181_v15  ;;  %v4211_v24 = vsel %vm2881_vm7, %v4094_v40, 0.0 }
 0x3d9   :  { %v4015_v32 = vsel %vm2881_vm7, %v8257_v54, 0.0  ;;  %v4017_v15 = vsel %vm2881_vm7, %v8266_v23, 0.0 }
 0x3da   :  { %v4010_v35 = vadd.f32 %v4009_v6, %v4008_v43  ;;  %v4206_v19 = vadd.f32 %v4205_v62, %v4204_v50  ;;  %v3727_v49 = vpop.f32.mrf.mxu2  ;;  %v4095_v62 = vmul.f32 %v8257_v54, %v8257_v54  ;;  %v3898_v43 = vpop.f32.mrf.mxu3  ;;  %v4096_v50 = vmul.f32 %v8266_v23, %v8266_v23 }
 0x3db   :  { %v8284_v6 = vadd.f32 %v8174_v12, %v8203_v44  ;;  %v4019_v12 = vsel %vm2881_vm7, %v8275_v21, 0.0 }
 0x3dc   :  { %v4012_v9 = vadd.f32 %v4011_v39, %v4010_v35  ;;  %v4208_v42 = vadd.f32 %v4207_v4, %v4206_v19  ;;  %v4213_v51 = vsel %vm2881_vm7, %v4095_v62, 0.0  ;;  %v4097_v19 = vmul.f32 %v8275_v21, %v8275_v21 }
 0x3dd   :  { %v8292_v4 = vadd.f32 %v8205_v34, %v3724_v8  ;;  %v4098_v44 = vmul.f32 %v8284_v6, %v8284_v6  ;;  %v8304_v8 = vadd.f32 %v3896_v28, %v3727_v49 }
 0x3de   :  { %v4014_v58 = vadd.f32 %v4013_v29, %v4012_v9  ;;  %v4210_v22 = vadd.f32 %v4209_v57, %v4208_v42  ;;  %v4215_v42 = vsel %vm2881_vm7, %v4096_v50, 0.0  ;;  %v4217_v62 = vsel %vm2881_vm7, %v4097_v19, 0.0 }
 0x3df   :  { %9171 = vst [vmem:[#allocation47_spill] sm:$0xff] %v8292_v4  ;;  %v4099_v34 = vmul.f32 %v8292_v4, %v8292_v4  ;;  %v4023_v50 = vsel %vm2881_vm7, %v8292_v4, 0.0  ;;  %v4100_v19 = vmul.f32 %v8304_v8, %v8304_v8  ;;  %v4025_v49 = vsel %vm2881_vm7, %v8304_v8, 0.0 }
 0x3e0   :  { %v4016_v27 = vadd.f32 %v4015_v32, %v4014_v58  ;;  %v4212_v35 = vadd.f32 %v4211_v24, %v4210_v22  ;;  %v4021_v58 = vsel %vm2881_vm7, %v8284_v6, 0.0  ;;  %9172 = vst [vmem:[#allocation33_spill] sm:$0xff] %v8304_v8  ;;  %v4219_v32 = vsel %vm2881_vm7, %v4098_v44, 0.0 }
 0x3e1   :  { %v4223_v44 = vsel %vm2881_vm7, %v4100_v19, 0.0 }
 0x3e2   :  { %v4018_v39 = vadd.f32 %v4017_v15, %v4016_v27  ;;  %v4214_v40 = vadd.f32 %v4213_v51, %v4212_v35  ;;  %v3729_v9 = vpop.f32.mrf.mxu2  ;;  %v3901_v51 = vpop.f32.mrf.mxu3  ;;  %v4221_v15 = vsel %vm2881_vm7, %v4099_v34, 0.0 }
 0x3e4   :  { %v4216_v57 = vadd.f32 %v4215_v42, %v4214_v40  ;;  %v4020_v29 = vadd.f32 %v4019_v12, %v4018_v39  ;;  %v8312_v39 = vadd.f32 %v3898_v43, %v3729_v9 }
 0x3e6   :  { %v4218_v22 = vadd.f32 %v4217_v62, %v4216_v57  ;;  %v4022_v24 = vadd.f32 %v4021_v58, %v4020_v29  ;;  %9173 = vst [vmem:[#allocation20_spill] sm:$0xff] %v8312_v39  ;;  %v4101_v57 = vmul.f32 %v8312_v39, %v8312_v39  ;;  %v4027_v62 = vsel %vm2881_vm7, %v8312_v39, 0.0 }
 0x3e8   :  { %v4220_v27 = vadd.f32 %v4219_v32, %v4218_v22  ;;  %v4024_v35 = vadd.f32 %v4023_v50, %v4022_v24  ;;  %v4225_v58 = vsel %vm2881_vm7, %v4101_v57, 0.0 }
 0x3ea   :  { %v4222_v40 = vadd.f32 %v4221_v15, %v4220_v27  ;;  %v3732_v28 = vpop.f32.mrf.mxu2  ;;  %v4026_v12 = vadd.f32 %v4025_v49, %v4024_v35  ;;  %v3903_v24 = vpop.f32.mrf.mxu3 }
 0x3eb   :  { %v8316_v42 = vadd.f32 %v3901_v51, %v3732_v28 }
 0x3ec   :  { %v4224_v29 = vadd.f32 %v4223_v44, %v4222_v40  ;;  %v4028_v9 = vadd.f32 %v4027_v62, %v4026_v12 }
 0x3ed   :  { %9174 = vst [vmem:[#allocation41_spill] sm:$0xff] %v8316_v42  ;;  %v4102_v43 = vmul.f32 %v8316_v42, %v8316_v42  ;;  %v4029_v34 = vsel %vm2881_vm7, %v8316_v42, 0.0 }
 0x3ee   :  { %v4226_v22 = vadd.f32 %v4225_v58, %v4224_v29  ;;  %v4030_v35 = vadd.f32 %v4029_v34, %v4028_v9 }
 0x3ef   :  { %v4227_v50 = vsel %vm2881_vm7, %v4102_v43, 0.0 }
 0x3f0   :  { %v4228_v19 = vadd.f32 %v4227_v50, %v4226_v22 }
 0x3f2   :  { %v3734_v32 = vpop.f32.mrf.mxu2 }
 0x3f3   :  { %v3904_v27 = vadd.f32 %v3903_v24, %v3734_v32 }
 0x3f5   :  { %v4031_v51 = vsel %vm2881_vm7, %v3904_v27, 0.0  ;;  %v4103_v15 = vmul.f32 %v3904_v27, %v3904_v27 }
 0x3f6   :  { %v4032_v40 = vadd.f32 %v4031_v51, %v4030_v35 }
 0x3f7   :  { %v4229_v28 = vsel %vm2881_vm7, %v4103_v15, 0.0 }
 0x3f8   :  { %v4033_v49 = vrot.slane %v4032_v40, 4  ;;  %v4230_v12 = vadd.f32 %v4229_v28, %v4228_v19 }
 0x3fa   :  { %v4034_v44 = vadd.f32 %v4033_v49, %v4032_v40  ;;  %v4231_v57 = vrot.slane %v4230_v12, 4 }
 0x3fc   :  { %v4035_v62 = vrot.slane %v4034_v44, 2  ;;  %v4232_v42 = vadd.f32 %v4231_v57, %v4230_v12  ;;  %v9175_v57 = vld [vmem:[#allocation39_spill] sm:$0xff] }
 0x3fe   :  { %v4036_v29 = vadd.f32 %v4035_v62, %v4034_v44  ;;  %v4233_v58 = vrot.slane %v4232_v42, 2 }
 0x400   :  { %v4037_v39 = vrot.slane %v4036_v29, 1  ;;  %v4234_v8 = vadd.f32 %v4233_v58, %v4232_v42 }
 0x402   :  { %v4038_v43 = vadd.f32 %v4037_v39, %v4036_v29  ;;  %v4235_v24 = vrot.slane %v4234_v8, 1  ;;  %v4240_v39 = vld [vmem:[%s8793_s2] sm:$0x1] }
 0x403   :  { %v9176_v29 = vld [vmem:[#allocation17_spill] sm:$0xff] }
 0x404   :  { %v4039_v9 = vmul.f32 0.001953125, %v4038_v43  ;;  %v4236_v34 = vadd.f32 %v4235_v24, %v4234_v8  ;;  %v9177_v43 = vld [vmem:[#allocation50_spill] sm:$0xff] }
 0x406   :  { %v4237_v32 = vmul.f32 0.001953125, %v4236_v34  ;;  %v4238_v4 = vmul.f32 %v4039_v9, %v4039_v9 }
 0x408   :  { %v4239_v22 = vsub.f32 %v4237_v32, %v4238_v4  ;;  %v4241_v4 = vld [vmem:[%s8793_s2 + $0x1] sm:$0x1] }
 0x40a   :  { %v4242_v50 = vadd.f32 1e-05, %v4239_v22 }
 0x40c   :  { %4923 = vrsqrt.f32 %v4242_v50  ;;  %vm4249_vm1 = vweird.f32 %v4242_v50 }
 0x412   :  { %v4924_v35 = vpop.eup %4923 }
 0x413   :  { %v4244_v51 = vmul.f32 %v4924_v35, %v4242_v50  ;;  %vm4250_vm0 = vweird.f32 %v4924_v35  ;;  %v9179_v50 = vld [vmem:[#allocation19_spill] sm:$0xff] }
 0x414   :  { %vm4251_vm2 = vmor %vm4249_vm1, %vm4250_vm0 }
 0x415   :  { %v4245_v15 = vmul.f32 %v4924_v35, %v4244_v51 }
 0x417   :  { %v4246_v19 = vmul.f32 0.5, %v4245_v15 }
 0x419   :  { %v4247_v40 = vsub.f32 1.5, %v4246_v19 }
 0x41b   :  { %v4248_v28 = vmul.f32 %v4924_v35, %v4247_v40  ;;  %v9180_v40 = vld [vmem:[#allocation46_spill] sm:$0xff] }
 0x41d   :  { %v4252_v42 = vsel %vm4251_vm2, %v4924_v35, %v4248_v28 }
 0x41e   :  { %v4253_v8 = vmul.f32 %v4252_v42, %v4240_v39 }
 0x420   :  { %v4254_v49 = vmul.f32 %v4253_v8, %v4039_v9  ;;  %v8337_v12 = vperm.slane %v4253_v8, 0  ;;  %v9178_v9 = vld [vmem:[#allocation32_spill] sm:$0xff] }
 0x422   :  { %v4255_v44 = vsub.f32 %v4241_v4, %v4254_v49  ;;  %v4257_v62 = vmul.f32 %v8337_v12, %v9175_v57  ;;  %v4258_v58 = vmul.f32 %v8337_v12, %v9176_v29  ;;  %v4259_v24 = vmul.f32 %v8337_v12, %v9177_v43 }
 0x423   :  { %v4320_v34 = vmul.f32 %v8337_v12, %v3904_v27  ;;  %v4260_v22 = vmul.f32 %v8337_v12, %v9178_v9  ;;  %v4261_v35 = vmul.f32 %v8337_v12, %v9179_v50  ;;  %v4262_v28 = vmul.f32 %v8337_v12, %v9180_v40 }
 0x424   :  { %v8346_v32 = vperm.slane %v4255_v44, 0  ;;  %v4263_v27 = vmul.f32 %v8337_v12, %v7844_v14  ;;  %v4264_v8 = vmul.f32 %v8337_v12, %v7853_v10  ;;  %v4265_v14 = vmul.f32 %v8337_v12, %v7866_v26 }
 0x425   :  { %v4266_v10 = vmul.f32 %v8337_v12, %v7875_v56  ;;  %v4267_v26 = vmul.f32 %v8337_v12, %v7886_v7  ;;  %v4268_v56 = vmul.f32 %v8337_v12, %v7895_v17  ;;  %v4269_v7 = vmul.f32 %v8337_v12, %v7906_v59 }
 0x426   :  { %v4322_v51 = vadd.f32 %v8346_v32, %v4257_v62  ;;  %v4323_v15 = vadd.f32 %v8346_v32, %v4258_v58  ;;  %v4324_v19 = vadd.f32 %v8346_v32, %v4259_v24  ;;  %v4325_v39 = vadd.f32 %v8346_v32, %v4260_v22 }
 0x427   :  { %v4326_v42 = vadd.f32 %v8346_v32, %v4261_v35  ;;  %v4327_v49 = vadd.f32 %v8346_v32, %v4262_v28  ;;  %v4328_v4 = vadd.f32 %v8346_v32, %v4263_v27  ;;  %v4329_v44 = vadd.f32 %v8346_v32, %v4264_v8 }
 0x428   :  { %4386 = vst.msk [vmem:[%s8794_s3] sm:$0xff] %vm2881_vm7, %v4322_v51  ;;  %v4330_v57 = vadd.f32 %v8346_v32, %v4265_v14  ;;  %v4331_v62 = vadd.f32 %v8346_v32, %v4266_v10  ;;  %v4332_v29 = vadd.f32 %v8346_v32, %v4267_v26  ;;  %v4270_v17 = vmul.f32 %v8337_v12, %v7917_v61 }
 0x429   :  { %4387 = vst.msk [vmem:[%s8794_s3 + $0x8] sm:$0xff] %vm2881_vm7, %v4323_v15  ;;  %v4333_v58 = vadd.f32 %v8346_v32, %v4268_v56  ;;  %v4271_v59 = vmul.f32 %v8337_v12, %v7926_v20  ;;  %v4334_v43 = vadd.f32 %v8346_v32, %v4269_v7  ;;  %v4272_v61 = vmul.f32 %v8337_v12, %v7935_v25  ;;  %v9181_v56 = vld [vmem:[#allocation6_spill] sm:$0xff]  ;;  %v9182_v7 = vld [vmem:[#allocation21_spill] sm:$0xff] }
 0x42a   :  { %4388 = vst.msk [vmem:[%s8794_s3 + $0x10] sm:$0xff] %vm2881_vm7, %v4324_v19  ;;  %v4335_v24 = vadd.f32 %v8346_v32, %v4270_v17  ;;  %v4273_v20 = vmul.f32 %v8337_v12, %v7944_v55  ;;  %v4274_v25 = vmul.f32 %v8337_v12, %v7955_v52  ;;  %v4275_v55 = vmul.f32 %v8337_v12, %v7966_v2  ;;  %v9183_v17 = vld [vmem:[#allocation14_spill] sm:$0xff] }
 0x42b   :  { %4389 = vst.msk [vmem:[%s8794_s3 + $0x18] sm:$0xff] %vm2881_vm7, %v4325_v39  ;;  %v4336_v9 = vadd.f32 %v8346_v32, %v4271_v59  ;;  %v4337_v22 = vadd.f32 %v8346_v32, %v4272_v61  ;;  %v4276_v52 = vmul.f32 %v8337_v12, %v7975_v5  ;;  %v8453_v51 = vadd.f32 %v8346_v32, %v4320_v34 }
 0x42c   :  { %4390 = vst.msk [vmem:[%s8794_s3 + $0x20] sm:$0xff] %vm2881_vm7, %v4326_v42  ;;  %v4338_v50 = vadd.f32 %v8346_v32, %v4273_v20  ;;  %v4339_v35 = vadd.f32 %v8346_v32, %v4274_v25  ;;  %v4277_v2 = vmul.f32 %v8337_v12, %v7984_v36  ;;  %v4340_v15 = vadd.f32 %v8346_v32, %v4275_v55  ;;  %v9185_v20 = vld [vmem:[#allocation10_spill] sm:$0xff] }
 0x42d   :  { %4391 = vst.msk [vmem:[%s8794_s3 + $0x28] sm:$0xff] %vm2881_vm7, %v4327_v49  ;;  %v4278_v5 = vmul.f32 %v8337_v12, %v7995_v53  ;;  %v4341_v34 = vadd.f32 %v8346_v32, %v4276_v52  ;;  %v4279_v36 = vmul.f32 %v8337_v12, %v8004_v60  ;;  %v4280_v53 = vmul.f32 %v8337_v12, %v8015_v41  ;;  %v9187_v52 = vld [vmem:[#allocation15_spill] sm:$0xff] }
 0x42e   :  { %4392 = vst.msk [vmem:[%s8794_s3 + $0x30] sm:$0xff] %vm2881_vm7, %v4328_v4  ;;  %v4342_v19 = vadd.f32 %v8346_v32, %v4277_v2  ;;  %v4281_v60 = vmul.f32 %v8337_v12, %v8024_v37  ;;  %v4282_v41 = vmul.f32 %v8337_v12, %v8035_v3  ;;  %v4283_v37 = vmul.f32 %v8337_v12, %v8044_v1 }
 0x42f   :  { %4393 = vst.msk [vmem:[%s8794_s3 + $0x38] sm:$0xff] %vm2881_vm7, %v4329_v44  ;;  %v4343_v40 = vadd.f32 %v8346_v32, %v4278_v5  ;;  %v4344_v28 = vadd.f32 %v8346_v32, %v4279_v36  ;;  %v4345_v39 = vadd.f32 %v8346_v32, %v4280_v53  ;;  %v4284_v3 = vmul.f32 %v8337_v12, %v8053_v30  ;;  %v9189_v36 = vld [vmem:[#allocation28_spill] sm:$0xff] }
 0x430   :  { %4394 = vst.msk [vmem:[%s8794_s3 + $0x40] sm:$0xff] %vm2881_vm7, %v4330_v57  ;;  %v4346_v27 = vadd.f32 %v8346_v32, %v4281_v60  ;;  %v4347_v42 = vadd.f32 %v8346_v32, %v4282_v41  ;;  %v4285_v1 = vmul.f32 %v8337_v12, %v8063_v45  ;;  %v4348_v8 = vadd.f32 %v8346_v32, %v4283_v37  ;;  %v9191_v41 = vld [vmem:[#allocation18_spill] sm:$0xff] }
 0x431   :  { %4395 = vst.msk [vmem:[%s8794_s3 + $0x48] sm:$0xff] %vm2881_vm7, %v4331_v62  ;;  %v4286_v30 = vmul.f32 %v8337_v12, %v8071_v31  ;;  %v4349_v49 = vadd.f32 %v8346_v32, %v4284_v3  ;;  %v4287_v45 = vmul.f32 %v8337_v12, %v8081_v13  ;;  %v4288_v31 = vmul.f32 %v8337_v12, %v8108_v48 }
 0x432   :  { %4396 = vst.msk [vmem:[%s8794_s3 + $0x50] sm:$0xff] %vm2881_vm7, %v4332_v29  ;;  %v4350_v14 = vadd.f32 %v8346_v32, %v4285_v1  ;;  %v4289_v13 = vmul.f32 %v8337_v12, %v8096_v33  ;;  %v4290_v48 = vmul.f32 %v8337_v12, %v8104_v11  ;;  %v4291_v33 = vmul.f32 %v8337_v12, %v9150_v38  ;;  %v9193_v1 = vld [vmem:[#allocation44_spill] sm:$0xff] }
 0x433   :  { %4397 = vst.msk [vmem:[%s8794_s3 + $0x58] sm:$0xff] %vm2881_vm7, %v4333_v58  ;;  %v4351_v4 = vadd.f32 %v8346_v32, %v4286_v30  ;;  %v4352_v10 = vadd.f32 %v8346_v32, %v4287_v45  ;;  %v4353_v44 = vadd.f32 %v8346_v32, %v4288_v31  ;;  %v4292_v11 = vmul.f32 %v8337_v12, %v8122_v18 }
 0x434   :  { %4398 = vst.msk [vmem:[%s8794_s3 + $0x60] sm:$0xff] %vm2881_vm7, %v4334_v43  ;;  %v4354_v26 = vadd.f32 %v8346_v32, %v4289_v13  ;;  %v4355_v57 = vadd.f32 %v8346_v32, %v4290_v48  ;;  %v4293_v38 = vmul.f32 %v8337_v12, %v9181_v56  ;;  %v4356_v62 = vadd.f32 %v8346_v32, %v4291_v33  ;;  %v9184_v43 = vld [vmem:[#allocation9_spill] sm:$0xff] }
 0x435   :  { %4399 = vst.msk [vmem:[%s8794_s3 + $0x68] sm:$0xff] %vm2881_vm7, %v4335_v24  ;;  %v4294_v18 = vmul.f32 %v8337_v12, %v9182_v7  ;;  %v4357_v29 = vadd.f32 %v8346_v32, %v4292_v11  ;;  %v4295_v58 = vmul.f32 %v8337_v12, %v9183_v17  ;;  %v4296_v61 = vmul.f32 %v8337_v12, %v9184_v43  ;;  %v9196_v7 = vld [vmem:[#allocation33_spill] sm:$0xff] }
 0x436   :  { %4400 = vst.msk [vmem:[%s8794_s3 + $0x70] sm:$0xff] %vm2881_vm7, %v4336_v9  ;;  %v4358_v59 = vadd.f32 %v8346_v32, %v4293_v38  ;;  %v4297_v9 = vmul.f32 %v8337_v12, %v9185_v20  ;;  %v9195_v38 = vld [vmem:[#allocation47_spill] sm:$0xff] }
 0x437   :  { %4401 = vst.msk [vmem:[%s8794_s3 + $0x78] sm:$0xff] %vm2881_vm7, %v4337_v22  ;;  %v4359_v24 = vadd.f32 %v8346_v32, %v4294_v18  ;;  %v4360_v25 = vadd.f32 %v8346_v32, %v4295_v58  ;;  %v9186_v22 = vld [vmem:[#allocation30_spill] sm:$0xff] }
 0x438   :  { %4402 = vst.msk [vmem:[%s8794_s3 + $0x80] sm:$0xff] %vm2881_vm7, %v4338_v50  ;;  %v4298_v55 = vmul.f32 %v8337_v12, %v9186_v22  ;;  %v4361_v50 = vadd.f32 %v8346_v32, %v4296_v61  ;;  %v4362_v2 = vadd.f32 %v8346_v32, %v4297_v9 }
 0x439   :  { %4403 = vst.msk [vmem:[%s8794_s3 + $0x88] sm:$0xff] %vm2881_vm7, %v4339_v35  ;;  %v4299_v35 = vmul.f32 %v8337_v12, %v9187_v52 }
 0x43a   :  { %4404 = vst.msk [vmem:[%s8794_s3 + $0x90] sm:$0xff] %vm2881_vm7, %v4340_v15  ;;  %v9188_v15 = vld [vmem:[#allocation43_spill] sm:$0xff] }
 0x43b   :  { %4405 = vst.msk [vmem:[%s8794_s3 + $0x98] sm:$0xff] %vm2881_vm7, %v4341_v34  ;;  %v4300_v5 = vmul.f32 %v8337_v12, %v9188_v15  ;;  %v4363_v34 = vadd.f32 %v8346_v32, %v4298_v55  ;;  %v4364_v53 = vadd.f32 %v8346_v32, %v4299_v35 }
 0x43c   :  { %4406 = vst.msk [vmem:[%s8794_s3 + $0xa0] sm:$0xff] %vm2881_vm7, %v4342_v19  ;;  %v4301_v19 = vmul.f32 %v8337_v12, %v9189_v36 }
 0x43d   :  { %4407 = vst.msk [vmem:[%s8794_s3 + $0xa8] sm:$0xff] %vm2881_vm7, %v4343_v40  ;;  %v9190_v40 = vld [vmem:[#allocation16_spill] sm:$0xff] }
 0x43e   :  { %4408 = vst.msk [vmem:[%s8794_s3 + $0xb0] sm:$0xff] %vm2881_vm7, %v4344_v28  ;;  %v4302_v60 = vmul.f32 %v8337_v12, %v9190_v40  ;;  %v4365_v28 = vadd.f32 %v8346_v32, %v4300_v5  ;;  %v4366_v37 = vadd.f32 %v8346_v32, %v4301_v19 }
 0x43f   :  { %4409 = vst.msk [vmem:[%s8794_s3 + $0xb8] sm:$0xff] %vm2881_vm7, %v4345_v39  ;;  %v4303_v39 = vmul.f32 %v8337_v12, %v9191_v41 }
 0x440   :  { %4410 = vst.msk [vmem:[%s8794_s3 + $0xc0] sm:$0xff] %vm2881_vm7, %v4346_v27  ;;  %v9192_v27 = vld [vmem:[#allocation8_spill] sm:$0xff] }
 0x441   :  { %4411 = vst.msk [vmem:[%s8794_s3 + $0xc8] sm:$0xff] %vm2881_vm7, %v4347_v42  ;;  %v4304_v3 = vmul.f32 %v8337_v12, %v9192_v27  ;;  %v4367_v42 = vadd.f32 %v8346_v32, %v4302_v60  ;;  %v4368_v30 = vadd.f32 %v8346_v32, %v4303_v39 }
 0x442   :  { %4412 = vst.msk [vmem:[%s8794_s3 + $0xd0] sm:$0xff] %vm2881_vm7, %v4348_v8  ;;  %v4305_v8 = vmul.f32 %v8337_v12, %v9193_v1 }
 0x443   :  { %4413 = vst.msk [vmem:[%s8794_s3 + $0xd8] sm:$0xff] %vm2881_vm7, %v4349_v49  ;;  %v4306_v49 = vmul.f32 %v8337_v12, %v9168_v63  ;;  %v4369_v45 = vadd.f32 %v8346_v32, %v4304_v3  ;;  %v4308_v63 = vmul.f32 %v8337_v12, %v9170_v0  ;;  %v4310_v0 = vmul.f32 %v8337_v12, %v8239_v46 }
 0x444   :  { %4414 = vst.msk [vmem:[%s8794_s3 + $0xe0] sm:$0xff] %vm2881_vm7, %v4350_v14  ;;  %v9194_v14 = vld [vmem:[#allocation31_spill] sm:$0xff]  ;;  %v4312_v46 = vmul.f32 %v8337_v12, %v8257_v54  ;;  %v4314_v54 = vmul.f32 %v8337_v12, %v8275_v21  ;;  %v4316_v21 = vmul.f32 %v8337_v12, %v9195_v38 }
 0x445   :  { %4415 = vst.msk [vmem:[%s8794_s3 + $0xe8] sm:$0xff] %vm2881_vm7, %v4351_v4  ;;  %v4307_v31 = vmul.f32 %v8337_v12, %v9194_v14  ;;  %v4370_v4 = vadd.f32 %v8346_v32, %v4305_v8  ;;  %v4371_v13 = vadd.f32 %v8346_v32, %v4306_v49 }
 0x446   :  { %4416 = vst.msk [vmem:[%s8794_s3 + $0xf0] sm:$0xff] %vm2881_vm7, %v4352_v10  ;;  %v4309_v10 = vmul.f32 %v8337_v12, %v7877_v16  ;;  %v4311_v16 = vmul.f32 %v8337_v12, %v8248_v47  ;;  %v4313_v47 = vmul.f32 %v8337_v12, %v8266_v23  ;;  %v4315_v23 = vmul.f32 %v8337_v12, %v8284_v6 }
 0x447   :  { %4417 = vst.msk [vmem:[%s8794_s3 + $0xf8] sm:$0xff] %vm2881_vm7, %v4353_v44  ;;  %v4372_v48 = vadd.f32 %v8346_v32, %v4307_v31  ;;  %v4373_v44 = vadd.f32 %v8346_v32, %v4308_v63  ;;  %v4317_v6 = vmul.f32 %v8337_v12, %v9196_v7  ;;  %v4381_v58 = vadd.f32 %v8346_v32, %v4316_v21 }
 0x448   :  { %4418 = vst.msk [vmem:[%s8794_s3 + $0x100] sm:$0xff] %vm2881_vm7, %v4354_v26  ;;  %v4374_v33 = vadd.f32 %v8346_v32, %v4309_v10  ;;  %v4375_v26 = vadd.f32 %v8346_v32, %v4310_v0  ;;  %v4376_v11 = vadd.f32 %v8346_v32, %v4311_v16  ;;  %v4378_v56 = vadd.f32 %v8346_v32, %v4313_v47 }
 0x449   :  { %4419 = vst.msk [vmem:[%s8794_s3 + $0x108] sm:$0xff] %vm2881_vm7, %v4355_v57  ;;  %v4377_v57 = vadd.f32 %v8346_v32, %v4312_v46  ;;  %v4380_v18 = vadd.f32 %v8346_v32, %v4315_v23  ;;  %v4382_v61 = vadd.f32 %v8346_v32, %v4317_v6 }
 0x44a   :  { %4420 = vst.msk [vmem:[%s8794_s3 + $0x110] sm:$0xff] %vm2881_vm7, %v4356_v62  ;;  %v4379_v62 = vadd.f32 %v8346_v32, %v4314_v54 }
 0x44b   :  { %4421 = vst.msk [vmem:[%s8794_s3 + $0x118] sm:$0xff] %vm2881_vm7, %v4357_v29  ;;  %v9197_v29 = vld [vmem:[#allocation20_spill] sm:$0xff] }
 0x44c   :  { %4422 = vst.msk [vmem:[%s8794_s3 + $0x120] sm:$0xff] %vm2881_vm7, %v4358_v59  ;;  %v4318_v17 = vmul.f32 %v8337_v12, %v9197_v29  ;;  %v9198_v59 = vld [vmem:[#allocation41_spill] sm:$0xff] }
 0x44d   :  { %4423 = vst.msk [vmem:[%s8794_s3 + $0x128] sm:$0xff] %vm2881_vm7, %v4359_v24  ;;  %v4319_v43 = vmul.f32 %v8337_v12, %v9198_v59 }
 0x44e   :  { %4424 = vst.msk [vmem:[%s8794_s3 + $0x130] sm:$0xff] %vm2881_vm7, %v4360_v25  ;;  %v4383_v24 = vadd.f32 %v8346_v32, %v4318_v17 }
 0x44f   :  { %4425 = vst.msk [vmem:[%s8794_s3 + $0x138] sm:$0xff] %vm2881_vm7, %v4361_v50  ;;  %v4384_v20 = vadd.f32 %v8346_v32, %v4319_v43 }
 0x450   :  { %4426 = vst.msk [vmem:[%s8794_s3 + $0x140] sm:$0xff] %vm2881_vm7, %v4362_v2 }
 0x451   :  { %4427 = vst.msk [vmem:[%s8794_s3 + $0x148] sm:$0xff] %vm2881_vm7, %v4363_v34 }
 0x452   :  { %4428 = vst.msk [vmem:[%s8794_s3 + $0x150] sm:$0xff] %vm2881_vm7, %v4364_v53 }
 0x453   :  { %4429 = vst.msk [vmem:[%s8794_s3 + $0x158] sm:$0xff] %vm2881_vm7, %v4365_v28 }
 0x454   :  { %4430 = vst.msk [vmem:[%s8794_s3 + $0x160] sm:$0xff] %vm2881_vm7, %v4366_v37 }
 0x455   :  { %4431 = vst.msk [vmem:[%s8794_s3 + $0x168] sm:$0xff] %vm2881_vm7, %v4367_v42 }
 0x456   :  { %4432 = vst.msk [vmem:[%s8794_s3 + $0x170] sm:$0xff] %vm2881_vm7, %v4368_v30 }
 0x457   :  { %4433 = vst.msk [vmem:[%s8794_s3 + $0x178] sm:$0xff] %vm2881_vm7, %v4369_v45 }
 0x458   :  { %4434 = vst.msk [vmem:[%s8794_s3 + $0x180] sm:$0xff] %vm2881_vm7, %v4370_v4 }
 0x459   :  { %4435 = vst.msk [vmem:[%s8794_s3 + $0x188] sm:$0xff] %vm2881_vm7, %v4371_v13 }
 0x45a   :  { %4436 = vst.msk [vmem:[%s8794_s3 + $0x190] sm:$0xff] %vm2881_vm7, %v4372_v48 }
 0x45b   :  { %4437 = vst.msk [vmem:[%s8794_s3 + $0x198] sm:$0xff] %vm2881_vm7, %v4373_v44 }
 0x45c   :  { %4438 = vst.msk [vmem:[%s8794_s3 + $0x1a0] sm:$0xff] %vm2881_vm7, %v4374_v33 }
 0x45d   :  { %4439 = vst.msk [vmem:[%s8794_s3 + $0x1a8] sm:$0xff] %vm2881_vm7, %v4375_v26 }
 0x45e   :  { %4440 = vst.msk [vmem:[%s8794_s3 + $0x1b0] sm:$0xff] %vm2881_vm7, %v4376_v11 }
 0x45f   :  { %4441 = vst.msk [vmem:[%s8794_s3 + $0x1b8] sm:$0xff] %vm2881_vm7, %v4377_v57 }
 0x460   :  { %4442 = vst.msk [vmem:[%s8794_s3 + $0x1c0] sm:$0xff] %vm2881_vm7, %v4378_v56 }
 0x461   :  { %4443 = vst.msk [vmem:[%s8794_s3 + $0x1c8] sm:$0xff] %vm2881_vm7, %v4379_v62 }
 0x462   :  { %4444 = vst.msk [vmem:[%s8794_s3 + $0x1d0] sm:$0xff] %vm2881_vm7, %v4380_v18 }
 0x463   :  { %4445 = vst.msk [vmem:[%s8794_s3 + $0x1d8] sm:$0xff] %vm2881_vm7, %v4381_v58 }
 0x464   :  { %4446 = vst.msk [vmem:[%s8794_s3 + $0x1e0] sm:$0xff] %vm2881_vm7, %v4382_v61 }
 0x465   :  { %4447 = vst.msk [vmem:[%s8794_s3 + $0x1e8] sm:$0xff] %vm2881_vm7, %v4383_v24 }
 0x466   :  { %4448 = vst.msk [vmem:[%s8794_s3 + $0x1f0] sm:$0xff] %vm2881_vm7, %v4384_v20 }
 0x467   :  { %4449 = vst.msk [vmem:[%s8794_s3 + $0x1f8] sm:$0xff] %vm2881_vm7, %v8453_v51 }

</bundles_post_ra>
